<compile_context>
chip_gen: v5e
topology: v5e:2x2
jax: 0.10.0
libtpu: 0.0.40
codegen_flags: <defaults>
</compile_context>

<pallas_src>
import numpy as np

import jax
import jax.numpy as jnp
from jax.experimental import pallas as pl
from jax.experimental.pallas import tpu as pltpu

TREF = 10.0
T0 = 46.02
BN_EPS = 1e-5
OUT_WIDTH = 128                      # lane-dense packed output width
HEAD_OUT_WIDTHS = (1, 1, 1, 2)       # residual, nee, temp, k


# ----------------------------------------------------------------------------
# Pure-JAX reference (faithful to the PyTorch module, training-mode BN).
# ----------------------------------------------------------------------------
def _bn_train(x, gamma, beta):
    mean = jnp.mean(x, axis=0, keepdims=True)
    var = jnp.mean((x - mean) ** 2, axis=0, keepdims=True)
    return (x - mean) * jax.lax.rsqrt(var + BN_EPS) * gamma + beta


def _leaky(x, slope):
    return jnp.where(x > 0, x, slope * x)


def _res_block_ref(x, blk, slope):
    res = x
    if "projW" in blk:
        res = jnp.dot(x, blk["projW"], preferred_element_type=jnp.float32) + blk["projB"]
    out = jnp.dot(x, blk["fcW"], preferred_element_type=jnp.float32) + blk["fcB"]
    out = _bn_train(out, blk["gamma"], blk["beta"])
    out = _leaky(out, slope)
    return out + res


def _subnet_ref(x, subnet, block_slope=0.0, final_slope=None):
    for blk in subnet["blocks"]:
        x = _res_block_ref(x, blk, block_slope)
    x = jnp.dot(x, subnet["W"], preferred_element_type=jnp.float32) + subnet["b"]
    if final_slope is not None:
        x = _leaky(x, final_slope)
    return x


def pernn_reference(x, b, T, model):
    xb = jnp.concatenate([x, b.reshape(-1, 1)], axis=1)
    z = _subnet_ref(xb, model["encoder"])
    residual = _subnet_ref(z, model["residual"])
    nee = _subnet_ref(z, model["nee"])
    dT_dt = _subnet_ref(z, model["temp"])
    k = _subnet_ref(z, model["k"], block_slope=0.01, final_slope=0.01)
    Tcol = T.reshape(-1, 1)
    E0 = k[:, 0:1]
    rb = k[:, 1:2]
    exp_term = jnp.exp(E0 * (1.0 / (TREF - T0) - 1.0 / (Tcol - T0)))
    dNEE_dT = rb * (E0 / (Tcol - T0) ** 2) * exp_term
    f = dNEE_dT * dT_dt + residual
    return nee, dT_dt, k, f, z


# ----------------------------------------------------------------------------
# Deterministic parameter construction (PyTorch nn.Linear-style init).
# ----------------------------------------------------------------------------
def _init_linear(key, in_dim, out_dim):
    k1, k2 = jax.random.split(key)
    bound = 1.0 / float(in_dim) ** 0.5
    W = jax.random.uniform(k1, (in_dim, out_dim), jnp.float32, -bound, bound)
    b = jax.random.uniform(k2, (out_dim,), jnp.float32, -bound, bound)
    return W, b


def build_raw_model(key, input_dim, latent_dim, encoder_dims, residual_dims,
                    decoder_dims):
    def make_subnet(key, in_dim, hidden, out_dim):
        blocks = []
        for d in hidden:
            key, k1, k2 = jax.random.split(key, 3)
            fcW, fcB = _init_linear(k1, in_dim, d)
            blk = dict(fcW=fcW, fcB=fcB,
                       gamma=jnp.ones((d,), jnp.float32),
                       beta=jnp.zeros((d,), jnp.float32))
            if in_dim != d:
                pW, pB = _init_linear(k2, in_dim, d)
                blk["projW"], blk["projB"] = pW, pB
            blocks.append(blk)
            in_dim = d
        key, k1 = jax.random.split(key)
        W, bias = _init_linear(k1, in_dim, out_dim)
        return dict(blocks=blocks, W=W, b=bias)

    keys = jax.random.split(key, 5)
    return dict(
        encoder=make_subnet(keys[0], input_dim, encoder_dims, latent_dim),
        residual=make_subnet(keys[1], latent_dim, residual_dims, 1),
        nee=make_subnet(keys[2], latent_dim, decoder_dims, 1),
        temp=make_subnet(keys[3], latent_dim, decoder_dims, 1),
        k=make_subnet(keys[4], latent_dim, decoder_dims, 2),
    )


# ----------------------------------------------------------------------------
# Host-side packing: one lane-dense parameter slab + static "program".
# ----------------------------------------------------------------------------
def pack_model(model, input_dim, latent_dim):
    """Slab layout (all offsets are static Python ints baked into the kernel):
       rows [0, v_base)      : stacked weight matrices (each starts at col 0,
                               row offset padded to a multiple of 8 sublanes)
       rows [v_base, n_rows) : one row per packed bias / gamma / beta / slope
    """
    w_mats, w_offsets, v_vecs = [], [], []
    w_off = 0

    def add_w(mat):
        nonlocal w_off
        mat = np.asarray(mat, np.float32)
        row = w_off
        w_mats.append(mat)
        w_offsets.append(row)
        w_off += ((mat.shape[0] + 7) // 8) * 8       # keep sublane alignment
        return row

    def add_v(vec):
        v_vecs.append(np.asarray(vec, np.float32).reshape(-1))
        return len(v_vecs) - 1

    # ---- encoder ------------------------------------------------------------
    enc_blocks = []
    for blk in model["encoder"]["blocks"]:
        fcW = np.asarray(blk["fcW"], np.float32)
        din, dout = int(fcW.shape[0]), int(fcW.shape[1])
        proj = "projW" in blk
        enc_blocks.append(dict(
            din=din, dout=dout, proj=proj, res_tile=1,
            fc_row=add_w(fcW),                      # fc bias dropped: BN cancels it
            proj_row=add_w(blk["projW"]) if proj else None,
            projb_row=add_v(blk["projB"]) if proj else None,
            gamma_row=add_v(blk["gamma"]),
            beta_row=add_v(blk["beta"]),
            slope_row=None))                        # plain ReLU
    W3 = np.asarray(model["encoder"]["W"], np.float32)
    enc_final = dict(din=int(W3.shape[0]), dout=int(W3.shape[1]),
                     w_row=add_w(W3), b_row=add_v(model["encoder"]["b"]))

    # ---- four heads fused along the feature axis ----------------------------
    heads = [model["residual"], model["nee"], model["temp"], model["k"]]
    n_heads = len(heads)
    block_slopes = [0.0, 0.0, 0.0, 0.01]            # ReLU x3, LeakyReLU for k
    final_slopes = [1.0, 1.0, 1.0, 0.01]            # identity x3, LeakyReLU for k
    n_blocks = len(heads[0]["blocks"])
    assert n_blocks >= 1 and all(len(h["blocks"]) == n_blocks for h in heads), \
        "head fusion requires residual_dims == decoder_dims"

    head_blocks = []
    for j in range(n_blocks):
        blks = [h["blocks"][j] for h in heads]
        din = int(np.asarray(blks[0]["fcW"]).shape[0])
        dout = int(np.asarray(blks[0]["fcW"]).shape[1])
        assert all(np.asarray(bb["fcW"]).shape == (din, dout) for bb in blks)
        proj = "projW" in blks[0]
        if j == 0:
            fcW = np.concatenate([np.asarray(bb["fcW"], np.float32) for bb in blks], axis=1)
            prW = (np.concatenate([np.asarray(bb["projW"], np.float32) for bb in blks], axis=1)
                   if proj else None)
            fused_in = din
            res_tile = 1 if proj else n_heads
        else:
            fused_in = n_heads * din
            fcW = np.zeros((fused_in, n_heads * dout), np.float32)
            prW = np.zeros((fused_in, n_heads * dout), np.float32) if proj else None
            for hi, bb in enumerate(blks):
                fcW[hi * din:(hi + 1) * din, hi * dout:(hi + 1) * dout] = np.asarray(bb["fcW"])
                if proj:
                    prW[hi * din:(hi + 1) * din, hi * dout:(hi + 1) * dout] = np.asarray(bb["projW"])
            res_tile = 1
        gamma = np.concatenate([np.asarray(bb["gamma"], np.float32).reshape(-1) for bb in blks])
        beta = np.concatenate([np.asarray(bb["beta"], np.float32).reshape(-1) for bb in blks])
        slope = np.concatenate([np.full((dout,), s, np.float32) for s in block_slopes])
        entry = dict(din=fused_in, dout=n_heads * dout, proj=proj, res_tile=res_tile,
                     fc_row=add_w(fcW),
                     proj_row=add_w(prW) if proj else None,
                     projb_row=None,
                     gamma_row=add_v(gamma), beta_row=add_v(beta),
                     slope_row=add_v(slope))
        if proj:
            projb = np.concatenate([np.asarray(bb["projB"], np.float32).reshape(-1) for bb in blks])
            entry["projb_row"] = add_v(projb)
        head_blocks.append(entry)

    # ---- block-diagonal fused head output linear -----------------------------
    h_last = int(np.asarray(heads[0]["blocks"][-1]["fcW"]).shape[1])
    tot_out = sum(HEAD_OUT_WIDTHS)
    Wout = np.zeros((n_heads * h_last, tot_out), np.float32)
    bout = np.zeros((tot_out,), np.float32)
    oslope = np.ones((tot_out,), np.float32)
    col = 0
    for hi, head in enumerate(heads):
        w = HEAD_OUT_WIDTHS[hi]
        Wout[hi * h_last:(hi + 1) * h_last, col:col + w] = np.asarray(head["W"], np.float32)
        bout[col:col + w] = np.asarray(head["b"], np.float32).reshape(-1)
        oslope[col:col + w] = final_slopes[hi]
        col += w
    head_final = dict(din=n_heads * h_last, dout=tot_out,
                      w_row=add_w(Wout), b_row=add_v(bout), slope_row=add_v(oslope))

    # ---- materialize the slab -------------------------------------------------
    lane_w = max([m.shape[1] for m in w_mats] + [v.shape[0] for v in v_vecs])
    lanes = ((lane_w + 127) // 128) * 128
    v_base = w_off
    n_rows = v_base + len(v_vecs)
    slab = np.zeros((n_rows, lanes), np.float32)
    for m, r in zip(w_mats, w_offsets):
        slab[r:r + m.shape[0], 0:m.shape[1]] = m
    for i, v in enumerate(v_vecs):
        slab[v_base + i, 0:v.shape[0]] = v

    prog = dict(input_dim=int(input_dim), v_base=int(v_base),
                enc_blocks=enc_blocks, enc_final=enc_final,
                head_blocks=head_blocks, head_final=head_final)
    return jnp.asarray(slab), prog


# ----------------------------------------------------------------------------
# Pallas kernel
# ----------------------------------------------------------------------------
def _make_kernel(prog, latent_dim):
    v_base = prog["v_base"]
    input_dim = prog["input_dim"]

    def kernel(xin_ref, p_ref, out_ref):
        f32 = jnp.float32

        def wmat(row, rows, cols):               # lazy static-offset slab slice
            return p_ref[row:row + rows, 0:cols]

        def vrow(idx, cols):                     # (1, cols) row vector
            r = v_base + idx
            return p_ref[r:r + 1, 0:cols]

        def res_block(h, blk):
            din, dout = blk["din"], blk["dout"]
            pre = jnp.dot(h, wmat(blk["fc_row"], din, dout),
                          preferred_element_type=f32)
            if blk["proj"]:
                res = jnp.dot(h, wmat(blk["proj_row"], din, dout),
                              preferred_element_type=f32) + vrow(blk["projb_row"], dout)
            else:
                res = h if blk["res_tile"] == 1 else jnp.tile(h, (1, blk["res_tile"]))
            # Training-mode BatchNorm1d (fc bias omitted: mean subtraction
            # cancels it exactly).
            mean = jnp.mean(pre, axis=0, keepdims=True)
            var = jnp.mean((pre - mean) ** 2, axis=0, keepdims=True)
            out = (pre - mean) * jax.lax.rsqrt(var + BN_EPS)
            out = out * vrow(blk["gamma_row"], dout) + vrow(blk["beta_row"], dout)
            if blk["slope_row"] is None:                         # plain ReLU
                out = jnp.maximum(out, 0.0)
            else:                                                # per-column LeakyReLU
                out = jnp.where(out > 0.0, out, vrow(blk["slope_row"], dout) * out)
            return out + res

        xall = xin_ref[...]
        h = xall[:, 0:input_dim]                     # [x | b]
        Tcol = xall[:, input_dim:input_dim + 1]      # T

        # ----- encoder -------------------------------------------------------
        for blk in prog["enc_blocks"]:
            h = res_block(h, blk)
        ef = prog["enc_final"]
        z = jnp.dot(h, wmat(ef["w_row"], ef["din"], ef["dout"]),
                    preferred_element_type=f32) + vrow(ef["b_row"], ef["dout"])

        # ----- four heads, fused feature-wise --------------------------------
        h = z
        for blk in prog["head_blocks"]:
            h = res_block(h, blk)
        hf = prog["head_final"]
        heads = jnp.dot(h, wmat(hf["w_row"], hf["din"], hf["dout"]),
                        preferred_element_type=f32) + vrow(hf["b_row"], hf["dout"])
        # identity (slope 1) for residual/nee/temp, LeakyReLU (0.01) for k.
        heads = jnp.where(heads > 0.0, heads,
                          vrow(hf["slope_row"], hf["dout"]) * heads)

        residual = heads[:, 0:1]
        nee = heads[:, 1:2]
        dT_dt = heads[:, 2:3]
        E0 = heads[:, 3:4]
        rb = heads[:, 4:5]

        # ----- physics model --------------------------------------------------
        exp_term = jnp.exp(E0 * (1.0 / (TREF - T0) - 1.0 / (Tcol - T0)))
        dNEE_dT = rb * (E0 / (Tcol - T0) ** 2) * exp_term
        f = dNEE_dT * dT_dt + residual

        # ----- single lane-dense output slab ----------------------------------
        # cols [0, latent) = z ; then nee, dT_dt, E0, rb, f ; zeros afterwards.
        col = jax.lax.broadcasted_iota(jnp.int32, out_ref.shape, 1)
        base = latent_dim
        packed = jnp.where(col == base, nee,
                 jnp.where(col == base + 1, dT_dt,
                 jnp.where(col == base + 2, E0,
                 jnp.where(col == base + 3, rb,
                 jnp.where(col == base + 4, f, 0.0)))))
        out_ref[...] = packed
        out_ref[:, 0:latent_dim] = z

    return kernel


def pernn_forward(x, b, T, pslab, prog, latent_dim):
    N = x.shape[0]
    assert latent_dim + 5 <= OUT_WIDTH
    # Pack x, b, T into one input slab -> a single input DMA.
    xin = jnp.concatenate([x, b.reshape(N, 1), T.reshape(N, 1)], axis=1)
    kernel = _make_kernel(prog, latent_dim)
    vmem = pl.BlockSpec(memory_space=pltpu.MemorySpace.VMEM)
    out = pl.pallas_call(
        kernel,
        out_shape=jax.ShapeDtypeStruct((N, OUT_WIDTH), jnp.float32),
        in_specs=[vmem, vmem],
        out_specs=vmem,
    )(xin, pslab)
    z = out[:, 0:latent_dim]
    nee = out[:, latent_dim:latent_dim + 1]
    dT_dt = out[:, latent_dim + 1:latent_dim + 2]
    k = out[:, latent_dim + 2:latent_dim + 4]
    f = out[:, latent_dim + 4:latent_dim + 5]
    return nee, dT_dt, k, f, z


# ----------------------------------------------------------------------------
if __name__ == "__main__":
    # Model hyperparameters (small, consistent with the module's __init__).
    input_dim = 16        # x has input_dim - 1 features; b supplies the last one
    latent_dim = 16
    encoder_dims = [32, 32]
    residual_dims = [32]
    decoder_dims = [32]
    N = 128               # multiple of 8 sublanes; amortizes per-call overhead

    assert list(residual_dims) == list(decoder_dims)

    key = jax.random.PRNGKey(0)
    kmodel, kx, kb, kT = jax.random.split(key, 4)
    model = build_raw_model(kmodel, input_dim, latent_dim, encoder_dims,
                            residual_dims, decoder_dims)
    pslab, prog = pack_model(model, input_dim, latent_dim)

    # Deterministic example inputs.
    x = jax.random.normal(kx, (N, input_dim - 1), jnp.float32)
    b = jax.random.normal(kb, (N,), jnp.float32)
    T = 15.0 + 5.0 * jax.random.normal(kT, (N,), jnp.float32)

    outs = pernn_forward(x, b, T, pslab, prog, latent_dim)
    outs = jax.block_until_ready(outs)

    # Pure-JAX reference (faithful module math, including the fc biases that
    # the kernel drops because training-mode BN cancels them).
    ref = pernn_reference(x, b, T, model)
    for name, got, want in zip(["nee", "dT_dt", "k_pred", "f", "z"], outs, ref):
        np.testing.assert_allclose(np.asarray(got), np.asarray(want),
                                   rtol=2e-4, atol=2e-5, err_msg=name)

    print("KERNEL_OK")
</pallas_src>

<mosaic_0001>
module attributes {stable_mosaic.version = 11 : i64} {
  func.func @kernel(%arg0: memref<128x17xf32, #tpu.memory_space<vmem>>, %arg1: memref<268x128xf32, #tpu.memory_space<vmem>>, %arg2: memref<128x128xf32, #tpu.memory_space<vmem>>) attributes {dimension_semantics = [], scalar_prefetch = 0 : i64, scratch_operands = 0 : i64, tpu.core_type = #tpu.core_type<tc>} {
    %c0 = arith.constant 0 : index
    %c0_0 = arith.constant 0 : index
    %0 = vector.load %arg0[%c0, %c0_0] : memref<128x17xf32, #tpu.memory_space<vmem>>, vector<128x17xf32>
    %1 = vector.extract_strided_slice %0 {offsets = [0, 0], sizes = [128, 16], strides = [1, 1]} : vector<128x17xf32> to vector<128x16xf32>
    %2 = vector.extract_strided_slice %0 {offsets = [0, 16], sizes = [128, 1], strides = [1, 1]} : vector<128x17xf32> to vector<128x1xf32>
    %c0_1 = arith.constant 0 : index
    %c0_2 = arith.constant 0 : index
    %3 = vector.load %arg1[%c0_1, %c0_2] : memref<268x128xf32, #tpu.memory_space<vmem>>, vector<16x32xf32>
    %cst = arith.constant dense<0.000000e+00> : vector<128x32xf32>
    %4 = tpu.matmul %1, %3, %cst {dimension_numbers = #tpu.dot_dimension_numbers<[1], [0], [0], [1], [0, 0, 1, 1], [], []>} : vector<128x16xf32>, vector<16x32xf32>, vector<128x32xf32> -> vector<128x32xf32>
    %c16 = arith.constant 16 : index
    %c0_3 = arith.constant 0 : index
    %5 = vector.load %arg1[%c16, %c0_3] : memref<268x128xf32, #tpu.memory_space<vmem>>, vector<16x32xf32>
    %cst_4 = arith.constant dense<0.000000e+00> : vector<128x32xf32>
    %6 = tpu.matmul %1, %5, %cst_4 {dimension_numbers = #tpu.dot_dimension_numbers<[1], [0], [0], [1], [0, 0, 1, 1], [], []>} : vector<128x16xf32>, vector<16x32xf32>, vector<128x32xf32> -> vector<128x32xf32>
    %c256 = arith.constant 256 : index
    %c0_5 = arith.constant 0 : index
    %7 = vector.load %arg1[%c256, %c0_5] : memref<268x128xf32, #tpu.memory_space<vmem>>, vector<1x32xf32>
    %8 = vector.broadcast %7 : vector<1x32xf32> to vector<128x32xf32>
    %9 = arith.addf %6, %8 : vector<128x32xf32>
    %cst_6 = arith.constant dense<0.000000e+00> : vector<32xf32>
    %10 = vector.multi_reduction <add>, %4, %cst_6 [0] : vector<128x32xf32> to vector<32xf32>
    %11 = vector.shape_cast %10 : vector<32xf32> to vector<1x32xf32>
    %cst_7 = arith.constant 1.280000e+02 : f32
    %12 = vector.broadcast %cst_7 : f32 to vector<1x32xf32>
    %13 = arith.divf %11, %12 : vector<1x32xf32>
    %14 = vector.broadcast %13 : vector<1x32xf32> to vector<128x32xf32>
    %15 = arith.subf %4, %14 : vector<128x32xf32>
    %16 = arith.mulf %15, %15 : vector<128x32xf32>
    %cst_8 = arith.constant dense<0.000000e+00> : vector<32xf32>
    %17 = vector.multi_reduction <add>, %16, %cst_8 [0] : vector<128x32xf32> to vector<32xf32>
    %18 = vector.shape_cast %17 : vector<32xf32> to vector<1x32xf32>
    %cst_9 = arith.constant 1.280000e+02 : f32
    %19 = vector.broadcast %cst_9 : f32 to vector<1x32xf32>
    %20 = arith.divf %18, %19 : vector<1x32xf32>
    %21 = vector.broadcast %13 : vector<1x32xf32> to vector<128x32xf32>
    %22 = arith.subf %4, %21 : vector<128x32xf32>
    %cst_10 = arith.constant 9.99999974E-6 : f32
    %23 = vector.broadcast %cst_10 : f32 to vector<1x32xf32>
    %24 = arith.addf %20, %23 : vector<1x32xf32>
    %25 = math.rsqrt %24 : vector<1x32xf32>
    %26 = vector.broadcast %25 : vector<1x32xf32> to vector<128x32xf32>
    %27 = arith.mulf %22, %26 : vector<128x32xf32>
    %c257 = arith.constant 257 : index
    %c0_11 = arith.constant 0 : index
    %28 = vector.load %arg1[%c257, %c0_11] : memref<268x128xf32, #tpu.memory_space<vmem>>, vector<1x32xf32>
    %29 = vector.broadcast %28 : vector<1x32xf32> to vector<128x32xf32>
    %30 = arith.mulf %27, %29 : vector<128x32xf32>
    %c258 = arith.constant 258 : index
    %c0_12 = arith.constant 0 : index
    %31 = vector.load %arg1[%c258, %c0_12] : memref<268x128xf32, #tpu.memory_space<vmem>>, vector<1x32xf32>
    %32 = vector.broadcast %31 : vector<1x32xf32> to vector<128x32xf32>
    %33 = arith.addf %30, %32 : vector<128x32xf32>
    %cst_13 = arith.constant 0.000000e+00 : f32
    %34 = vector.broadcast %cst_13 : f32 to vector<128x32xf32>
    %35 = arith.maximumf %33, %34 : vector<128x32xf32>
    %36 = arith.addf %35, %9 : vector<128x32xf32>
    %c32 = arith.constant 32 : index
    %c0_14 = arith.constant 0 : index
    %37 = vector.load %arg1[%c32, %c0_14] : memref<268x128xf32, #tpu.memory_space<vmem>>, vector<32x32xf32>
    %cst_15 = arith.constant dense<0.000000e+00> : vector<128x32xf32>
    %38 = tpu.matmul %36, %37, %cst_15 {dimension_numbers = #tpu.dot_dimension_numbers<[1], [0], [0], [1], [0, 0, 1, 1], [], []>} : vector<128x32xf32>, vector<32x32xf32>, vector<128x32xf32> -> vector<128x32xf32>
    %cst_16 = arith.constant dense<0.000000e+00> : vector<32xf32>
    %39 = vector.multi_reduction <add>, %38, %cst_16 [0] : vector<128x32xf32> to vector<32xf32>
    %40 = vector.shape_cast %39 : vector<32xf32> to vector<1x32xf32>
    %cst_17 = arith.constant 1.280000e+02 : f32
    %41 = vector.broadcast %cst_17 : f32 to vector<1x32xf32>
    %42 = arith.divf %40, %41 : vector<1x32xf32>
    %43 = vector.broadcast %42 : vector<1x32xf32> to vector<128x32xf32>
    %44 = arith.subf %38, %43 : vector<128x32xf32>
    %45 = arith.mulf %44, %44 : vector<128x32xf32>
    %cst_18 = arith.constant dense<0.000000e+00> : vector<32xf32>
    %46 = vector.multi_reduction <add>, %45, %cst_18 [0] : vector<128x32xf32> to vector<32xf32>
    %47 = vector.shape_cast %46 : vector<32xf32> to vector<1x32xf32>
    %cst_19 = arith.constant 1.280000e+02 : f32
    %48 = vector.broadcast %cst_19 : f32 to vector<1x32xf32>
    %49 = arith.divf %47, %48 : vector<1x32xf32>
    %50 = vector.broadcast %42 : vector<1x32xf32> to vector<128x32xf32>
    %51 = arith.subf %38, %50 : vector<128x32xf32>
    %cst_20 = arith.constant 9.99999974E-6 : f32
    %52 = vector.broadcast %cst_20 : f32 to vector<1x32xf32>
    %53 = arith.addf %49, %52 : vector<1x32xf32>
    %54 = math.rsqrt %53 : vector<1x32xf32>
    %55 = vector.broadcast %54 : vector<1x32xf32> to vector<128x32xf32>
    %56 = arith.mulf %51, %55 : vector<128x32xf32>
    %c259 = arith.constant 259 : index
    %c0_21 = arith.constant 0 : index
    %57 = vector.load %arg1[%c259, %c0_21] : memref<268x128xf32, #tpu.memory_space<vmem>>, vector<1x32xf32>
    %58 = vector.broadcast %57 : vector<1x32xf32> to vector<128x32xf32>
    %59 = arith.mulf %56, %58 : vector<128x32xf32>
    %c260 = arith.constant 260 : index
    %c0_22 = arith.constant 0 : index
    %60 = vector.load %arg1[%c260, %c0_22] : memref<268x128xf32, #tpu.memory_space<vmem>>, vector<1x32xf32>
    %61 = vector.broadcast %60 : vector<1x32xf32> to vector<128x32xf32>
    %62 = arith.addf %59, %61 : vector<128x32xf32>
    %cst_23 = arith.constant 0.000000e+00 : f32
    %63 = vector.broadcast %cst_23 : f32 to vector<128x32xf32>
    %64 = arith.maximumf %62, %63 : vector<128x32xf32>
    %65 = arith.addf %64, %36 : vector<128x32xf32>
    %c64 = arith.constant 64 : index
    %c0_24 = arith.constant 0 : index
    %66 = vector.load %arg1[%c64, %c0_24] : memref<268x128xf32, #tpu.memory_space<vmem>>, vector<32x16xf32>
    %cst_25 = arith.constant dense<0.000000e+00> : vector<128x16xf32>
    %67 = tpu.matmul %65, %66, %cst_25 {dimension_numbers = #tpu.dot_dimension_numbers<[1], [0], [0], [1], [0, 0, 1, 1], [], []>} : vector<128x32xf32>, vector<32x16xf32>, vector<128x16xf32> -> vector<128x16xf32>
    %c261 = arith.constant 261 : index
    %c0_26 = arith.constant 0 : index
    %68 = vector.load %arg1[%c261, %c0_26] : memref<268x128xf32, #tpu.memory_space<vmem>>, vector<1x16xf32>
    %69 = vector.broadcast %68 : vector<1x16xf32> to vector<128x16xf32>
    %70 = arith.addf %67, %69 : vector<128x16xf32>
    %c96 = arith.constant 96 : index
    %c0_27 = arith.constant 0 : index
    %71 = vector.load %arg1[%c96, %c0_27] : memref<268x128xf32, #tpu.memory_space<vmem>>, vector<16x128xf32>
    %cst_28 = arith.constant dense<0.000000e+00> : vector<128x128xf32>
    %72 = tpu.matmul %70, %71, %cst_28 {dimension_numbers = #tpu.dot_dimension_numbers<[1], [0], [0], [1], [0, 0, 1, 1], [], []>} : vector<128x16xf32>, vector<16x128xf32>, vector<128x128xf32> -> vector<128x128xf32>
    %c112 = arith.constant 112 : index
    %c0_29 = arith.constant 0 : index
    %73 = vector.load %arg1[%c112, %c0_29] : memref<268x128xf32, #tpu.memory_space<vmem>>, vector<16x128xf32>
    %cst_30 = arith.constant dense<0.000000e+00> : vector<128x128xf32>
    %74 = tpu.matmul %70, %73, %cst_30 {dimension_numbers = #tpu.dot_dimension_numbers<[1], [0], [0], [1], [0, 0, 1, 1], [], []>} : vector<128x16xf32>, vector<16x128xf32>, vector<128x128xf32> -> vector<128x128xf32>
    %c265 = arith.constant 265 : index
    %c0_31 = arith.constant 0 : index
    %75 = vector.load %arg1[%c265, %c0_31] : memref<268x128xf32, #tpu.memory_space<vmem>>, vector<1x128xf32>
    %76 = vector.broadcast %75 : vector<1x128xf32> to vector<128x128xf32>
    %77 = arith.addf %74, %76 : vector<128x128xf32>
    %cst_32 = arith.constant dense<0.000000e+00> : vector<128xf32>
    %78 = vector.multi_reduction <add>, %72, %cst_32 [0] : vector<128x128xf32> to vector<128xf32>
    %79 = vector.shape_cast %78 : vector<128xf32> to vector<1x128xf32>
    %cst_33 = arith.constant 1.280000e+02 : f32
    %80 = vector.broadcast %cst_33 : f32 to vector<1x128xf32>
    %81 = arith.divf %79, %80 : vector<1x128xf32>
    %82 = vector.broadcast %81 : vector<1x128xf32> to vector<128x128xf32>
    %83 = arith.subf %72, %82 : vector<128x128xf32>
    %84 = arith.mulf %83, %83 : vector<128x128xf32>
    %cst_34 = arith.constant dense<0.000000e+00> : vector<128xf32>
    %85 = vector.multi_reduction <add>, %84, %cst_34 [0] : vector<128x128xf32> to vector<128xf32>
    %86 = vector.shape_cast %85 : vector<128xf32> to vector<1x128xf32>
    %cst_35 = arith.constant 1.280000e+02 : f32
    %87 = vector.broadcast %cst_35 : f32 to vector<1x128xf32>
    %88 = arith.divf %86, %87 : vector<1x128xf32>
    %89 = vector.broadcast %81 : vector<1x128xf32> to vector<128x128xf32>
    %90 = arith.subf %72, %89 : vector<128x128xf32>
    %cst_36 = arith.constant 9.99999974E-6 : f32
    %91 = vector.broadcast %cst_36 : f32 to vector<1x128xf32>
    %92 = arith.addf %88, %91 : vector<1x128xf32>
    %93 = math.rsqrt %92 : vector<1x128xf32>
    %94 = vector.broadcast %93 : vector<1x128xf32> to vector<128x128xf32>
    %95 = arith.mulf %90, %94 : vector<128x128xf32>
    %c262 = arith.constant 262 : index
    %c0_37 = arith.constant 0 : index
    %96 = vector.load %arg1[%c262, %c0_37] : memref<268x128xf32, #tpu.memory_space<vmem>>, vector<1x128xf32>
    %97 = vector.broadcast %96 : vector<1x128xf32> to vector<128x128xf32>
    %98 = arith.mulf %95, %97 : vector<128x128xf32>
    %c263 = arith.constant 263 : index
    %c0_38 = arith.constant 0 : index
    %99 = vector.load %arg1[%c263, %c0_38] : memref<268x128xf32, #tpu.memory_space<vmem>>, vector<1x128xf32>
    %100 = vector.broadcast %99 : vector<1x128xf32> to vector<128x128xf32>
    %101 = arith.addf %98, %100 : vector<128x128xf32>
    %cst_39 = arith.constant 0.000000e+00 : f32
    %102 = vector.broadcast %cst_39 : f32 to vector<128x128xf32>
    %103 = arith.cmpf ogt, %101, %102 : vector<128x128xf32>
    %c264 = arith.constant 264 : index
    %c0_40 = arith.constant 0 : index
    %104 = vector.load %arg1[%c264, %c0_40] : memref<268x128xf32, #tpu.memory_space<vmem>>, vector<1x128xf32>
    %105 = vector.broadcast %104 : vector<1x128xf32> to vector<128x128xf32>
    %106 = arith.mulf %105, %101 : vector<128x128xf32>
    %107 = arith.select %103, %101, %106 : vector<128x128xi1>, vector<128x128xf32>
    %108 = arith.addf %107, %77 : vector<128x128xf32>
    %c128 = arith.constant 128 : index
    %c0_41 = arith.constant 0 : index
    %109 = vector.load %arg1[%c128, %c0_41] : memref<268x128xf32, #tpu.memory_space<vmem>>, vector<128x5xf32>
    %cst_42 = arith.constant dense<0.000000e+00> : vector<128x5xf32>
    %110 = tpu.matmul %108, %109, %cst_42 {dimension_numbers = #tpu.dot_dimension_numbers<[1], [0], [0], [1], [0, 0, 1, 1], [], []>} : vector<128x128xf32>, vector<128x5xf32>, vector<128x5xf32> -> vector<128x5xf32>
    %c266 = arith.constant 266 : index
    %c0_43 = arith.constant 0 : index
    %111 = vector.load %arg1[%c266, %c0_43] : memref<268x128xf32, #tpu.memory_space<vmem>>, vector<1x5xf32>
    %112 = vector.broadcast %111 : vector<1x5xf32> to vector<128x5xf32>
    %113 = arith.addf %110, %112 : vector<128x5xf32>
    %cst_44 = arith.constant 0.000000e+00 : f32
    %114 = vector.broadcast %cst_44 : f32 to vector<128x5xf32>
    %115 = arith.cmpf ogt, %113, %114 : vector<128x5xf32>
    %c267 = arith.constant 267 : index
    %c0_45 = arith.constant 0 : index
    %116 = vector.load %arg1[%c267, %c0_45] : memref<268x128xf32, #tpu.memory_space<vmem>>, vector<1x5xf32>
    %117 = vector.broadcast %116 : vector<1x5xf32> to vector<128x5xf32>
    %118 = arith.mulf %117, %113 : vector<128x5xf32>
    %119 = arith.select %115, %113, %118 : vector<128x5xi1>, vector<128x5xf32>
    %120 = vector.extract_strided_slice %119 {offsets = [0, 0], sizes = [128, 1], strides = [1, 1]} : vector<128x5xf32> to vector<128x1xf32>
    %121 = vector.extract_strided_slice %119 {offsets = [0, 1], sizes = [128, 1], strides = [1, 1]} : vector<128x5xf32> to vector<128x1xf32>
    %122 = vector.extract_strided_slice %119 {offsets = [0, 2], sizes = [128, 1], strides = [1, 1]} : vector<128x5xf32> to vector<128x1xf32>
    %123 = vector.extract_strided_slice %119 {offsets = [0, 3], sizes = [128, 1], strides = [1, 1]} : vector<128x5xf32> to vector<128x1xf32>
    %124 = vector.extract_strided_slice %119 {offsets = [0, 4], sizes = [128, 1], strides = [1, 1]} : vector<128x5xf32> to vector<128x1xf32>
    %cst_46 = arith.constant 4.602000e+01 : f32
    %125 = vector.broadcast %cst_46 : f32 to vector<128x1xf32>
    %126 = arith.subf %2, %125 : vector<128x1xf32>
    %cst_47 = arith.constant 1.000000e+00 : f32
    %127 = vector.broadcast %cst_47 : f32 to vector<128x1xf32>
    %128 = arith.divf %127, %126 : vector<128x1xf32>
    %cst_48 = arith.constant -0.0277623534 : f32
    %129 = vector.broadcast %cst_48 : f32 to vector<128x1xf32>
    %130 = arith.subf %129, %128 : vector<128x1xf32>
    %131 = arith.mulf %123, %130 : vector<128x1xf32>
    %132 = math.exp %131 : vector<128x1xf32>
    %cst_49 = arith.constant 4.602000e+01 : f32
    %133 = vector.broadcast %cst_49 : f32 to vector<128x1xf32>
    %134 = arith.subf %2, %133 : vector<128x1xf32>
    %135 = arith.mulf %134, %134 : vector<128x1xf32>
    %136 = arith.divf %123, %135 : vector<128x1xf32>
    %137 = arith.mulf %124, %136 : vector<128x1xf32>
    %138 = arith.mulf %137, %132 : vector<128x1xf32>
    %139 = arith.mulf %138, %122 : vector<128x1xf32>
    %140 = arith.addf %139, %120 : vector<128x1xf32>
    %141 = tpu.iota {dimensions = array<i32: 1>} : vector<128x128xi32>
    %c16_i32 = arith.constant 16 : i32
    %142 = vector.broadcast %c16_i32 : i32 to vector<128x128xi32>
    %143 = arith.cmpi eq, %141, %142 : vector<128x128xi32>
    %c17_i32 = arith.constant 17 : i32
    %144 = vector.broadcast %c17_i32 : i32 to vector<128x128xi32>
    %145 = arith.cmpi eq, %141, %144 : vector<128x128xi32>
    %c18_i32 = arith.constant 18 : i32
    %146 = vector.broadcast %c18_i32 : i32 to vector<128x128xi32>
    %147 = arith.cmpi eq, %141, %146 : vector<128x128xi32>
    %c19_i32 = arith.constant 19 : i32
    %148 = vector.broadcast %c19_i32 : i32 to vector<128x128xi32>
    %149 = arith.cmpi eq, %141, %148 : vector<128x128xi32>
    %c20_i32 = arith.constant 20 : i32
    %150 = vector.broadcast %c20_i32 : i32 to vector<128x128xi32>
    %151 = arith.cmpi eq, %141, %150 : vector<128x128xi32>
    %cst_50 = arith.constant 0.000000e+00 : f32
    %152 = vector.shape_cast %140 : vector<128x1xf32> to vector<128x1xf32>
    %153 = vector.broadcast %152 : vector<128x1xf32> to vector<128x128xf32>
    %154 = vector.broadcast %cst_50 : f32 to vector<128x128xf32>
    %155 = arith.select %151, %153, %154 : vector<128x128xi1>, vector<128x128xf32>
    %156 = vector.shape_cast %124 : vector<128x1xf32> to vector<128x1xf32>
    %157 = vector.broadcast %156 : vector<128x1xf32> to vector<128x128xf32>
    %158 = arith.select %149, %157, %155 : vector<128x128xi1>, vector<128x128xf32>
    %159 = vector.shape_cast %123 : vector<128x1xf32> to vector<128x1xf32>
    %160 = vector.broadcast %159 : vector<128x1xf32> to vector<128x128xf32>
    %161 = arith.select %147, %160, %158 : vector<128x128xi1>, vector<128x128xf32>
    %162 = vector.shape_cast %122 : vector<128x1xf32> to vector<128x1xf32>
    %163 = vector.broadcast %162 : vector<128x1xf32> to vector<128x128xf32>
    %164 = arith.select %145, %163, %161 : vector<128x128xi1>, vector<128x128xf32>
    %165 = vector.shape_cast %121 : vector<128x1xf32> to vector<128x1xf32>
    %166 = vector.broadcast %165 : vector<128x1xf32> to vector<128x128xf32>
    %167 = arith.select %143, %166, %164 : vector<128x128xi1>, vector<128x128xf32>
    %c0_51 = arith.constant 0 : index
    %c0_52 = arith.constant 0 : index
    %168 = vector.load %arg2[%c0_51, %c0_52] : memref<128x128xf32, #tpu.memory_space<vmem>>, vector<128x128xf32>
    tpu.vector_store %arg2[%c0_51, %c0_52], %167 {strides = array<i32>} : memref<128x128xf32, #tpu.memory_space<vmem>>, vector<128x128xf32>,
    %c0_53 = arith.constant 0 : index
    %c0_54 = arith.constant 0 : index
    %169 = vector.load %arg2[%c0_53, %c0_54] : memref<128x128xf32, #tpu.memory_space<vmem>>, vector<128x16xf32>
    tpu.vector_store %arg2[%c0_53, %c0_54], %70 {strides = array<i32>} : memref<128x128xf32, #tpu.memory_space<vmem>>, vector<128x16xf32>,
    return
  }
}

</mosaic_0001>

<bundles_post_ra>
// kernel: tpu_custom_call.1
= control target key start
LH: loop header
LB: loop body
LE: loop exit
PB: predicated region body
PF: predicated region fallthrough
CT: control target
= control target key end

     0   :  { %7 = vsyncpa [#allocation3], 0  ;;  %s5789_s0 = inlined_call_operand.vmem [shape: f32[128,17], index: 0, kind: input, shape index: {}]   ;;  %s5790_s1 = inlined_call_operand.hbm [shape: f32[268,128], index: 1, kind: input, shape index: {}]   ;;  %s5791_s2 = inlined_call_operand.hbm [shape: f32[128,128], index: 2, kind: output, shape index: {}]  }
   0x1   :  { %8 = vsyncpa [#allocation4], 0  ;;  %s15_s11 = sshll.u32 %s5790_s1, 4  ;;  %s3269_s12 = smov [#allocation2]   ;;  %s16_s11 = int_to_ptr.hbm [resolvable:$true] %s15_s11 }
   0x2   :  { %s17_s13 = sshll.u32 %s3269_s12, 4  ;;  %s3270_s14 = smov 128   ;;  %s18_s13 = int_to_ptr.vmem [resolvable:$true] %s17_s13 }
   0x3   :  { %s3271_s15 = smov 8  }
   0x4   :  { %23 = dma.hbm_to_vmem [thread:$0]  %s16_s11, 4352, %s18_s13, [#allocation3], %s3270_s14, %s3270_s14, %s3271_s15  }
   0x5   :  { %3265 = dma.done.wait [#allocation3], 4352  }
   0x6   :  { %3266 = vsyncadd [#allocation3], 4294962944  ;;  %v45_v0 = vld [vmem:[#allocation2 + $0x8] sm:$0xff]  ;;  %v44_v1 = vld [vmem:[#allocation2] sm:$0xff]  ;;  %vm46_vm0 = vcmask 130048   ;;  %vm229_vm1 = vcmask 261120  }
   0x7   :  { %109 = vmatpush.msra.mxu0 %v45_v0  ;;  %v28_v2 = vld [vmem:[%s5789_s0] sm:$0xff]  ;;  %2995 = vmatpush.msra.mxu2 %v45_v0  ;;  %v29_v3 = vld [vmem:[%s5789_s0 + $0x8] sm:$0xff]  ;;  %v30_v4 = vld [vmem:[%s5789_s0 + $0x10] sm:$0xff]  ;;  %v3272_v52 = vmov 128.0   ;;  %s3273_s21 = smov 115   ;;  %s3278_s26 = smov 2  }
   0x8   :  { %v31_v5 = vld [vmem:[%s5789_s0 + $0x18] sm:$0xff]  ;;  %v32_v6 = vld [vmem:[%s5789_s0 + $0x20] sm:$0xff]  ;;  %v33_v7 = vld [vmem:[%s5789_s0 + $0x28] sm:$0xff]  ;;  %3095 = vrcp.f32 %v3272_v52  ;;  %s3280_s27 = smov 1   ;;  %s3281_s28 = smov [#allocation5]  }
   0x9   :  { %110 = vmatpush.msra.mxu0 %v44_v1  ;;  %2996 = vmatpush.msra.mxu2 %v44_v1  ;;  %v34_v8 = vld [vmem:[%s5789_s0 + $0x30] sm:$0xff]  ;;  %v41_v9 = vld [vmem:[%s5789_s0 + $0x68] sm:$0xff]  ;;  %v35_v10 = vld [vmem:[%s5789_s0 + $0x38] sm:$0xff]  ;;  %s2868_s29 = sshll.u32 %s3281_s28, 4  ;;  %s2870_s4 = sshll.u32 %s5791_s2, 4  ;;  %s2869_s29 = int_to_ptr.vmem [resolvable:$true] %s2868_s29  ;;  %s2871_s4 = int_to_ptr.hbm [resolvable:$true] %s2870_s4 }
   0xa   :  { %2883 = vmatmul.msk.f32.vlgmr.msra.gmra.mxu0 %vm46_vm0, %v28_v2  ;;  %2896 = vmatmul.msk.f32.vlgmr.msra.gmra.mxu2 %vm46_vm0, %v41_v9  ;;  %v42_v11 = vld [vmem:[%s5789_s0 + $0x70] sm:$0xff]  ;;  %v161_v12 = vld [vmem:[#allocation2 + $0x18] sm:$0xff]  ;;  %v36_v13 = vld [vmem:[%s5789_s0 + $0x40] sm:$0xff] }
   0xb   :  { %178 = vmatpush.msra.mxu1 %v161_v12  ;;  %2997 = vmatpush.msrb.mxu2 %v161_v12  ;;  %v43_v14 = vld [vmem:[%s5789_s0 + $0x78] sm:$0xff]  ;;  %v160_v15 = vld [vmem:[#allocation2 + $0x10] sm:$0xff]  ;;  %v37_v16 = vld [vmem:[%s5789_s0 + $0x48] sm:$0xff] }
   0xc   :  { %v38_v17 = vld [vmem:[%s5789_s0 + $0x50] sm:$0xff]  ;;  %v39_v18 = vld [vmem:[%s5789_s0 + $0x58] sm:$0xff]  ;;  %v40_v19 = vld [vmem:[%s5789_s0 + $0x60] sm:$0xff] }
   0xd   :  { %179 = vmatpush.msra.mxu1 %v160_v15  ;;  %2998 = vmatpush.msrb.mxu2 %v160_v15 }
   0xe   :  { %2899 = vmatmul.msk.f32.vlgmr.msra.gmra.mxu1 %vm46_vm0, %v28_v2  ;;  %v3096_v57 = vpop.eup %3095 }
   0xf   :  { %v268_v0 = vmul.f32 128.0, %v3096_v57  ;;  %vm272_vm2 = vweird.f32 %v3096_v57 }
  0x12   :  { %2884 = vmatmul.msk.f32.gmra.mxu0 %vm46_vm0, %v29_v3  ;;  %2897 = vmatmul.msk.f32.gmra.mxu2 %vm46_vm0, %v42_v11 }
  0x16   :  { %2900 = vmatmul.msk.f32.gmra.mxu1 %vm46_vm0, %v29_v3 }
  0x1a   :  { %2885 = vmatmul.msk.f32.gmra.mxu0 %vm46_vm0, %v30_v4  ;;  %2898 = vmatmul.msk.f32.gmra.mxu2 %vm46_vm0, %v43_v14 }
  0x1e   :  { %2901 = vmatmul.msk.f32.gmra.mxu1 %vm46_vm0, %v30_v4 }
  0x22   :  { %2886 = vmatmul.msk.f32.gmra.mxu0 %vm46_vm0, %v31_v5  ;;  %2912 = vmatmul.msk.f32.vlgmr.msrb.gmra.mxu2 %vm46_vm0, %v41_v9 }
  0x26   :  { %2902 = vmatmul.msk.f32.gmra.mxu1 %vm46_vm0, %v31_v5  ;;  %v269_v5 = vsub.f32 1.0, %v268_v0 }
  0x2a   :  { %2887 = vmatmul.msk.f32.gmra.mxu0 %vm46_vm0, %v32_v6  ;;  %2913 = vmatmul.msk.f32.gmra.mxu2 %vm46_vm0, %v42_v11 }
  0x2e   :  { %2903 = vmatmul.msk.f32.gmra.mxu1 %vm46_vm0, %v32_v6 }
  0x32   :  { %2888 = vmatmul.msk.f32.gmra.mxu0 %vm46_vm0, %v33_v7  ;;  %2914 = vmatmul.msk.f32.gmra.mxu2 %vm46_vm0, %v43_v14 }
  0x36   :  { %2904 = vmatmul.msk.f32.gmra.mxu1 %vm46_vm0, %v33_v7 }
  0x3a   :  { %2889 = vmatmul.msk.f32.gmra.mxu0 %vm46_vm0, %v34_v8 }
  0x3e   :  { %2905 = vmatmul.msk.f32.gmra.mxu1 %vm46_vm0, %v34_v8  ;;  %v270_v8 = vmul.f32 %v3096_v57, %v269_v5 }
  0x40   :  { %v271_v11 = vadd.f32 %v3096_v57, %v270_v8 }
  0x42   :  { %2890 = vmatmul.msk.f32.gmra.mxu0 %vm46_vm0, %v35_v10  ;;  %v3444_v14 = vsel %vm272_vm2, %v3096_v57, %v271_v11 }
  0x46   :  { %2906 = vmatmul.msk.f32.gmra.mxu1 %vm46_vm0, %v35_v10 }
  0x4a   :  { %2891 = vmatmul.msk.f32.gmra.mxu0 %vm46_vm0, %v36_v13 }
  0x4e   :  { %2907 = vmatmul.msk.f32.gmra.mxu1 %vm46_vm0, %v36_v13 }
  0x52   :  { %2892 = vmatmul.msk.f32.gmra.mxu0 %vm46_vm0, %v37_v16 }
  0x56   :  { %2908 = vmatmul.msk.f32.gmra.mxu1 %vm46_vm0, %v37_v16 }
  0x5a   :  { %2893 = vmatmul.msk.f32.gmra.mxu0 %vm46_vm0, %v38_v17 }
  0x5e   :  { %2909 = vmatmul.msk.f32.gmra.mxu1 %vm46_vm0, %v38_v17 }
  0x62   :  { %2894 = vmatmul.msk.f32.gmra.mxu0 %vm46_vm0, %v39_v18 }
  0x66   :  { %2910 = vmatmul.msk.f32.gmra.mxu1 %vm46_vm0, %v39_v18 }
  0x6a   :  { %2895 = vmatmul.msk.f32.gmra.mxu0 %vm46_vm0, %v40_v19 }
  0x6e   :  { %2911 = vmatmul.msk.f32.gmra.mxu1 %vm46_vm0, %v40_v19 }
  0x87   :  { %v3378_v20 = vpop.f32.mrf.mxu0 }
  0x88   :  { %v230_v31 = vsel %vm229_vm1, %v3378_v20, 0.0 }
  0x8d   :  { %v3411_v36 = vpop.f32.mrf.mxu2 }
  0x8e   :  { %v255_v63 = vsel %vm229_vm1, %v3411_v36, 0.0 }
  0x8f   :  { %v3381_v21 = vpop.f32.mrf.mxu0 }
  0x90   :  { %v231_v30 = vsel %vm229_vm1, %v3381_v21, 0.0 }
  0x91   :  { %v232_v33 = vadd.f32 %v231_v30, %v230_v31 }
  0x95   :  { %v3427_v49 = vpop.f32.mrf.mxu2 }
  0x96   :  { %v257_v2 = vsel %vm229_vm1, %v3427_v49, 0.0 }
  0x97   :  { %v3384_v22 = vpop.f32.mrf.mxu0 }
  0x98   :  { %v233_v32 = vsel %vm229_vm1, %v3384_v22, 0.0 }
  0x99   :  { %v234_v35 = vadd.f32 %v233_v32, %v232_v33 }
  0x9d   :  { %v3436_v62 = vpop.f32.mrf.mxu2 }
  0x9e   :  { %v259_v3 = vsel %vm229_vm1, %v3436_v62, 0.0 }
  0x9f   :  { %v3387_v23 = vpop.f32.mrf.mxu0 }
  0xa0   :  { %v235_v34 = vsel %vm229_vm1, %v3387_v23, 0.0 }
  0xa1   :  { %v236_v38 = vadd.f32 %v235_v34, %v234_v35 }
  0xa7   :  { %v3390_v24 = vpop.f32.mrf.mxu0 }
  0xa8   :  { %v237_v37 = vsel %vm229_vm1, %v3390_v24, 0.0 }
  0xa9   :  { %v238_v41 = vadd.f32 %v237_v37, %v236_v38 }
  0xaf   :  { %v3393_v25 = vpop.f32.mrf.mxu0 }
  0xb0   :  { %v239_v40 = vsel %vm229_vm1, %v3393_v25, 0.0 }
  0xb1   :  { %v240_v43 = vadd.f32 %v239_v40, %v238_v41 }
  0xb7   :  { %v3395_v26 = vpop.f32.mrf.mxu0 }
  0xb8   :  { %v241_v42 = vsel %vm229_vm1, %v3395_v26, 0.0 }
  0xb9   :  { %v242_v45 = vadd.f32 %v241_v42, %v240_v43 }
  0xbf   :  { %v3397_v27 = vpop.f32.mrf.mxu0 }
  0xc0   :  { %v243_v44 = vsel %vm229_vm1, %v3397_v27, 0.0 }
  0xc1   :  { %v244_v47 = vadd.f32 %v243_v44, %v242_v45 }
  0xc7   :  { %v3399_v28 = vpop.f32.mrf.mxu0 }
  0xc8   :  { %v245_v46 = vsel %vm229_vm1, %v3399_v28, 0.0 }
  0xc9   :  { %v246_v51 = vadd.f32 %v245_v46, %v244_v47 }
  0xcf   :  { %v3401_v29 = vpop.f32.mrf.mxu0 }
  0xd0   :  { %v247_v50 = vsel %vm229_vm1, %v3401_v29, 0.0 }
  0xd1   :  { %v248_v54 = vadd.f32 %v247_v50, %v246_v51 }
  0xd7   :  { %v3415_v39 = vpop.f32.mrf.mxu0 }
  0xd8   :  { %v249_v53 = vsel %vm229_vm1, %v3415_v39, 0.0 }
  0xd9   :  { %v250_v56 = vadd.f32 %v249_v53, %v248_v54  ;;  %v3505_v54 = vpop.f32.mrf.mxu1 }
  0xdf   :  { %v3425_v48 = vpop.f32.mrf.mxu0 }
  0xe0   :  { %v251_v55 = vsel %vm229_vm1, %v3425_v48, 0.0 }
  0xe1   :  { %v252_v58 = vadd.f32 %v251_v55, %v250_v56 }
  0xe7   :  { %v148_v59 = vpop.f32.mrf.mxu0 }
  0xe8   :  { %v253_v60 = vsel %vm229_vm1, %v148_v59, 0.0 }
  0xe9   :  { %v254_v61 = vadd.f32 %v253_v60, %v252_v58 }
  0xeb   :  { %v256_v1 = vadd.f32 %v255_v63, %v254_v61 }
  0xed   :  { %v258_v4 = vadd.f32 %v257_v2, %v256_v1 }
  0xef   :  { %v260_v6 = vadd.f32 %v259_v3, %v258_v4 }
  0xf1   :  { %v261_v7 = vrot.slane %v260_v6, 4 }
  0xf3   :  { %v262_v9 = vadd.f32 %v261_v7, %v260_v6 }
  0xf5   :  { %v263_v10 = vrot.slane %v262_v9, 2 }
  0xf7   :  { %v264_v12 = vadd.f32 %v263_v10, %v262_v9  ;;  %v3534_v9 = vpop.f32.mrf.mxu1 }
  0xf9   :  { %v265_v13 = vrot.slane %v264_v12, 1 }
  0xfb   :  { %v266_v15 = vadd.f32 %v265_v13, %v264_v12 }
  0xfd   :  { %v274_v16 = vmul.f32 %v3444_v14, %v266_v15 }
  0xff   :  { %v3448_v17 = vsub.f32 %v3378_v20, %v274_v16  ;;  %v3451_v18 = vsub.f32 %v3381_v21, %v274_v16  ;;  %v3454_v19 = vsub.f32 %v3384_v22, %v274_v16  ;;  %v3457_v30 = vsub.f32 %v3387_v23, %v274_v16 }
 0x100   :  { %v3464_v33 = vsub.f32 %v3390_v24, %v274_v16  ;;  %v3469_v21 = vsub.f32 %v3393_v25, %v274_v16  ;;  %v3476_v37 = vsub.f32 %v3395_v26, %v274_v16  ;;  %v3482_v25 = vsub.f32 %v3397_v27, %v274_v16 }
 0x101   :  { %v291_v31 = vmul.f32 %v3448_v17, %v3448_v17  ;;  %v292_v32 = vmul.f32 %v3451_v18, %v3451_v18  ;;  %v293_v20 = vmul.f32 %v3454_v19, %v3454_v19  ;;  %v294_v22 = vmul.f32 %v3457_v30, %v3457_v30 }
 0x102   :  { %v295_v24 = vmul.f32 %v3464_v33, %v3464_v33  ;;  %v296_v41 = vmul.f32 %v3469_v21, %v3469_v21  ;;  %v3488_v44 = vsub.f32 %v3399_v28, %v274_v16  ;;  %v297_v26 = vmul.f32 %v3476_v37, %v3476_v37 }
 0x103   :  { %v307_v23 = vsel %vm229_vm1, %v291_v31, 0.0  ;;  %v308_v34 = vsel %vm229_vm1, %v292_v32, 0.0  ;;  %v310_v38 = vsel %vm229_vm1, %v293_v20, 0.0  ;;  %v312_v42 = vsel %vm229_vm1, %v294_v22, 0.0  ;;  %v3542_v22 = vpop.f32.mrf.mxu1 }
 0x104   :  { %v309_v35 = vadd.f32 %v308_v34, %v307_v23  ;;  %v314_v45 = vsel %vm229_vm1, %v295_v24, 0.0  ;;  %v3494_v47 = vsub.f32 %v3401_v29, %v274_v16  ;;  %v298_v27 = vmul.f32 %v3482_v25, %v3482_v25 }
 0x105   :  { %v316_v50 = vsel %vm229_vm1, %v296_v41, 0.0  ;;  %v3500_v52 = vsub.f32 %v3415_v39, %v274_v16  ;;  %v299_v28 = vmul.f32 %v3488_v44, %v3488_v44  ;;  %v318_v53 = vsel %vm229_vm1, %v297_v26, 0.0  ;;  %v442_v26 = vld [vmem:[#allocation2 + $0x30] sm:$0xff] }
 0x106   :  { %v311_v40 = vadd.f32 %v310_v38, %v309_v35  ;;  %v3508_v29 = vsub.f32 %v3425_v48, %v274_v16  ;;  %v300_v56 = vmul.f32 %v3494_v47, %v3494_v47  ;;  %v320_v57 = vsel %vm229_vm1, %v298_v27, 0.0  ;;  %v440_v27 = vld [vmem:[#allocation2 + $0x20] sm:$0xff] }
 0x107   :  { %v3513_v60 = vsub.f32 %v148_v59, %v274_v16  ;;  %v301_v39 = vmul.f32 %v3500_v52, %v3500_v52  ;;  %v322_v61 = vsel %vm229_vm1, %v299_v28, 0.0  ;;  %v3519_v0 = vsub.f32 %v3411_v36, %v274_v16 }
 0x108   :  { %v313_v43 = vadd.f32 %v312_v42, %v311_v40  ;;  %v302_v48 = vmul.f32 %v3508_v29, %v3508_v29  ;;  %v324_v1 = vsel %vm229_vm1, %v300_v56, 0.0  ;;  %v3525_v3 = vsub.f32 %v3427_v49, %v274_v16 }
 0x109   :  { %v303_v59 = vmul.f32 %v3513_v60, %v3513_v60  ;;  %v326_v4 = vsel %vm229_vm1, %v301_v39, 0.0  ;;  %v290_v6 = vsub.f32 %v3436_v62, %v274_v16  ;;  %v304_v36 = vmul.f32 %v3519_v0, %v3519_v0 }
 0x10a   :  { %v315_v46 = vadd.f32 %v314_v45, %v313_v43  ;;  %v328_v7 = vsel %vm229_vm1, %v302_v48, 0.0  ;;  %v305_v49 = vmul.f32 %v3525_v3, %v3525_v3  ;;  %v443_v43 = vld [vmem:[#allocation2 + $0x38] sm:$0xff]  ;;  %v441_v45 = vld [vmem:[#allocation2 + $0x28] sm:$0xff] }
 0x10b   :  { %v330_v10 = vsel %vm229_vm1, %v303_v59, 0.0  ;;  %v306_v12 = vmul.f32 %v290_v6, %v290_v6  ;;  %v332_v13 = vsel %vm229_vm1, %v304_v36, 0.0  ;;  %v3544_v40 = vpop.f32.mrf.mxu1  ;;  %504 = vmatpush.msra.mxu2 %v443_v43  ;;  %2999 = vmatpush.msra.mxu3 %v443_v43  ;;  %v3559_v59 = vld [vmem:[#allocation2 + $0x100] ss:$0 sm:$0xff] }
 0x10c   :  { %v317_v51 = vadd.f32 %v316_v50, %v315_v46  ;;  %v334_v62 = vsel %vm229_vm1, %v305_v49, 0.0 }
 0x10d   :  { %v336_v31 = vsel %vm229_vm1, %v306_v12, 0.0  ;;  %505 = vmatpush.msra.mxu2 %v442_v26  ;;  %3000 = vmatpush.msra.mxu3 %v442_v26 }
 0x10e   :  { %v319_v55 = vadd.f32 %v318_v53, %v317_v51 }
 0x10f   :  { %506 = vmatpush.msra.mxu2 %v441_v45  ;;  %3001 = vmatpush.msra.mxu3 %v441_v45 }
 0x110   :  { %v321_v58 = vadd.f32 %v320_v57, %v319_v55 }
 0x111   :  { %507 = vmatpush.msra.mxu2 %v440_v27  ;;  %3002 = vmatpush.msra.mxu3 %v440_v27 }
 0x112   :  { %v323_v63 = vadd.f32 %v322_v61, %v321_v58  ;;  %v3547_v58 = vld [vmem:[#allocation2 + $0x101] ss:$0 sm:$0xff] }
 0x113   :  { %v193_v46 = vpop.f32.mrf.mxu1 }
 0x114   :  { %v325_v2 = vadd.f32 %v324_v1, %v323_v63  ;;  %v3552_v63 = vld [vmem:[#allocation2 + $0x102] ss:$0 sm:$0xff] }
 0x116   :  { %v327_v5 = vadd.f32 %v326_v4, %v325_v2 }
 0x118   :  { %v329_v8 = vadd.f32 %v328_v7, %v327_v5  ;;  %v194_v5 = vadd.f32 %v3559_v59, %v193_v46 }
 0x11a   :  { %v331_v11 = vadd.f32 %v330_v10, %v329_v8 }
 0x11b   :  { %v196_v56 = vpop.f32.mrf.mxu1 }
 0x11c   :  { %v333_v15 = vadd.f32 %v332_v13, %v331_v11 }
 0x11e   :  { %v335_v16 = vadd.f32 %v334_v62, %v333_v15  ;;  %v197_v15 = vadd.f32 %v3559_v59, %v196_v56 }
 0x120   :  { %v337_v32 = vadd.f32 %v336_v31, %v335_v16 }
 0x122   :  { %v338_v20 = vrot.slane %v337_v32, 4 }
 0x123   :  { %v199_v7 = vpop.f32.mrf.mxu1 }
 0x124   :  { %v339_v23 = vadd.f32 %v338_v20, %v337_v32  ;;  %v200_v26 = vadd.f32 %v3559_v59, %v199_v7  ;;  %v188_v7 = vadd.f32 %v3559_v59, %v3542_v22 }
 0x126   :  { %v340_v34 = vrot.slane %v339_v23, 2 }
 0x128   :  { %v341_v35 = vadd.f32 %v340_v34, %v339_v23 }
 0x12a   :  { %v342_v24 = vrot.slane %v341_v35, 1 }
 0x12b   :  { %v202_v34 = vpop.f32.mrf.mxu1 }
 0x12c   :  { %v343_v38 = vadd.f32 %v342_v24, %v341_v35 }
 0x12e   :  { %v344_v41 = vmul.f32 %v343_v38, %v3444_v14 }
 0x130   :  { %v345_v42 = vadd.f32 1e-05, %v344_v41 }
 0x132   :  { %3097 = vrsqrt.f32 %v345_v42  ;;  %vm352_vm4 = vweird.f32 %v345_v42 }
 0x133   :  { %v205_v56 = vpop.f32.mrf.mxu1 }
 0x138   :  { %v3098_v50 = vpop.eup %3097 }
 0x139   :  { %v347_v51 = vmul.f32 %v3098_v50, %v345_v42  ;;  %vm353_vm3 = vweird.f32 %v3098_v50  ;;  %v182_v42 = vadd.f32 %v3559_v59, %v3505_v54 }
 0x13a   :  { %vm354_vm5 = vmor %vm352_vm4, %vm353_vm3 }
 0x13b   :  { %v348_v28 = vmul.f32 %v3098_v50, %v347_v51 }
 0x13d   :  { %v349_v53 = vmul.f32 0.5, %v348_v28 }
 0x13f   :  { %v350_v55 = vsub.f32 1.5, %v349_v53 }
 0x141   :  { %v351_v57 = vmul.f32 %v3098_v50, %v350_v55 }
 0x143   :  { %v3549_v39 = vsel %vm354_vm5, %v3098_v50, %v351_v57  ;;  %v203_v57 = vadd.f32 %v3559_v59, %v202_v34 }
 0x144   :  { %v371_v61 = vmul.f32 %v3549_v39, %v290_v6  ;;  %v360_v48 = vmul.f32 %v3549_v39, %v3464_v33  ;;  %v361_v1 = vmul.f32 %v3549_v39, %v3469_v21  ;;  %v362_v21 = vmul.f32 %v3549_v39, %v3476_v37 }
 0x145   :  { %v369_v10 = vmul.f32 %v3549_v39, %v3519_v0  ;;  %v370_v11 = vmul.f32 %v3549_v39, %v3525_v3  ;;  %v368_v12 = vmul.f32 %v3549_v39, %v3513_v60  ;;  %v357_v60 = vmul.f32 %v3549_v39, %v3451_v18 }
 0x146   :  { %v389_v2 = vmul.f32 %v3547_v58, %v371_v61  ;;  %v378_v4 = vmul.f32 %v3547_v58, %v360_v48  ;;  %v379_v6 = vmul.f32 %v3547_v58, %v361_v1  ;;  %v380_v16 = vmul.f32 %v3547_v58, %v362_v21 }
 0x147   :  { %v387_v62 = vmul.f32 %v3547_v58, %v369_v10  ;;  %v388_v0 = vmul.f32 %v3547_v58, %v370_v11  ;;  %v386_v3 = vmul.f32 %v3547_v58, %v368_v12  ;;  %v356_v32 = vmul.f32 %v3549_v39, %v3448_v17 }
 0x148   :  { %v396_v36 = vadd.f32 %v3552_v63, %v378_v4  ;;  %v397_v33 = vadd.f32 %v3552_v63, %v379_v6  ;;  %v3577_v13 = vadd.f32 %v3552_v63, %v389_v2  ;;  %v398_v38 = vadd.f32 %v3552_v63, %v380_v16 }
 0x149   :  { %v3589_v31 = vadd.f32 %v3552_v63, %v387_v62  ;;  %v3594_v20 = vadd.f32 %v3552_v63, %v388_v0  ;;  %v3597_v23 = vadd.f32 %v3552_v63, %v386_v3  ;;  %v374_v35 = vmul.f32 %v3547_v58, %v356_v32 }
 0x14a   :  { %v412_v8 = vmax.f32 %v396_v36, 0.0  ;;  %v413_v37 = vmax.f32 %v397_v33, 0.0  ;;  %v363_v18 = vmul.f32 %v3549_v39, %v3482_v25  ;;  %v375_v41 = vmul.f32 %v3547_v58, %v357_v60 }
 0x14b   :  { %v392_v17 = vadd.f32 %v3552_v63, %v374_v35  ;;  %v414_v45 = vmax.f32 %v398_v38, 0.0  ;;  %v358_v25 = vmul.f32 %v3549_v39, %v3454_v19  ;;  %v364_v28 = vmul.f32 %v3549_v39, %v3488_v44 }
 0x14c   :  { %v3565_v49 = vadd.f32 %v412_v8, %v194_v5  ;;  %v3600_v24 = vadd.f32 %v413_v37, %v197_v15  ;;  %v381_v46 = vmul.f32 %v3547_v58, %v363_v18  ;;  %v393_v27 = vadd.f32 %v3552_v63, %v375_v41 }
 0x14d   :  { %v408_v43 = vmax.f32 %v392_v17, 0.0  ;;  %v3620_v51 = vadd.f32 %v414_v45, %v200_v26  ;;  %v376_v55 = vmul.f32 %v3547_v58, %v358_v25  ;;  %v185_v19 = vadd.f32 %v3559_v59, %v3534_v9  ;;  %v220_v45 = vpop.f32.mrf.mxu2 }
 0x14e   :  { %2919 = vmatmul.msk.f32.vlgmr.msra.gmra.mxu3 %vm229_vm1, %v3565_v49  ;;  %v399_v54 = vadd.f32 %v3552_v63, %v381_v46  ;;  %v409_v53 = vmax.f32 %v393_v27, 0.0  ;;  %v382_v48 = vmul.f32 %v3547_v58, %v364_v28  ;;  %v359_v44 = vmul.f32 %v3549_v39, %v3457_v30  ;;  %v208_v30 = vpop.f32.mrf.mxu1 }
 0x14f   :  { %v3616_v50 = vadd.f32 %v408_v43, %v182_v42  ;;  %v394_v2 = vadd.f32 %v3552_v63, %v376_v55  ;;  %v365_v9 = vmul.f32 %v3549_v39, %v3494_v47  ;;  %v206_v8 = vadd.f32 %v3559_v59, %v205_v56 }
 0x150   :  { %v415_v61 = vmax.f32 %v399_v54, 0.0  ;;  %v3632_v1 = vadd.f32 %v409_v53, %v185_v19  ;;  %v400_v5 = vadd.f32 %v3552_v63, %v382_v48  ;;  %v377_v6 = vmul.f32 %v3547_v58, %v359_v44 }
 0x151   :  { %2915 = vmatmul.msk.f32.vlgmr.msra.gmra.mxu2 %vm229_vm1, %v3616_v50  ;;  %v410_v36 = vmax.f32 %v394_v2, 0.0  ;;  %v383_v21 = vmul.f32 %v3547_v58, %v365_v9  ;;  %v366_v22 = vmul.f32 %v3549_v39, %v3500_v52  ;;  %v191_v62 = vadd.f32 %v3559_v59, %v3544_v40 }
 0x152   :  { %v3639_v4 = vadd.f32 %v415_v61, %v203_v57  ;;  %v416_v33 = vmax.f32 %v400_v5, 0.0  ;;  %v395_v11 = vadd.f32 %v3552_v63, %v377_v6  ;;  %v209_v37 = vadd.f32 %v3559_v59, %v208_v30 }
 0x153   :  { %v3651_v10 = vadd.f32 %v410_v36, %v188_v7  ;;  %v401_v12 = vadd.f32 %v3552_v63, %v383_v21  ;;  %v384_v0 = vmul.f32 %v3547_v58, %v366_v22  ;;  %v367_v34 = vmul.f32 %v3549_v39, %v3508_v29 }
 0x154   :  { %v3656_v47 = vadd.f32 %v416_v33, %v206_v8  ;;  %v411_v15 = vmax.f32 %v395_v11, 0.0  ;;  %v421_v27 = vmax.f32 %v3589_v31, 0.0  ;;  %v423_v31 = vmax.f32 %v3577_v13, 0.0 }
 0x155   :  { %v417_v16 = vmax.f32 %v401_v12, 0.0  ;;  %v402_v52 = vadd.f32 %v3552_v63, %v384_v0  ;;  %v385_v38 = vmul.f32 %v3547_v58, %v367_v34  ;;  %v420_v58 = vmax.f32 %v3597_v23, 0.0  ;;  %v223_v25 = vpop.f32.mrf.mxu2 }
 0x156   :  { %2920 = vmatmul.msk.f32.gmra.mxu3 %vm229_vm1, %v3600_v24  ;;  %v3667_v3 = vadd.f32 %v411_v15, %v191_v62  ;;  %v211_v60 = vpop.f32.mrf.mxu1  ;;  %v224_v28 = vadd.f32 %v3559_v59, %v223_v25  ;;  %v422_v23 = vmax.f32 %v3594_v20, 0.0 }
 0x157   :  { %v3671_v32 = vadd.f32 %v417_v16, %v209_v37  ;;  %v212_v40 = vadd.f32 %v3559_v59, %v211_v60  ;;  %v418_v35 = vmax.f32 %v402_v52, 0.0  ;;  %v403_v17 = vadd.f32 %v3552_v63, %v385_v38 }
 0x158   :  { %v221_v63 = vadd.f32 %v3559_v59, %v220_v45  ;;  %v3704_v53 = vadd.f32 %v422_v23, %v224_v28 }
 0x159   :  { %2916 = vmatmul.msk.f32.gmra.mxu2 %vm229_vm1, %v3632_v1  ;;  %v3680_v41 = vadd.f32 %v418_v35, %v212_v40  ;;  %v419_v43 = vmax.f32 %v403_v17, 0.0 }
 0x15a   :  { %v3698_v54 = vadd.f32 %v421_v27, %v221_v63 }
 0x15d   :  { %v226_v55 = vpop.f32.mrf.mxu2 }
 0x15e   :  { %2921 = vmatmul.msk.f32.gmra.mxu3 %vm229_vm1, %v3620_v51  ;;  %v214_v18 = vpop.f32.mrf.mxu1  ;;  %v227_v56 = vadd.f32 %v3559_v59, %v226_v55 }
 0x15f   :  { %v215_v42 = vadd.f32 %v3559_v59, %v214_v18 }
 0x160   :  { %v3710_v19 = vadd.f32 %v423_v31, %v227_v56 }
 0x161   :  { %2917 = vmatmul.msk.f32.gmra.mxu2 %vm229_vm1, %v3651_v10  ;;  %v3686_v29 = vadd.f32 %v419_v43, %v215_v42 }
 0x166   :  { %2922 = vmatmul.msk.f32.gmra.mxu3 %vm229_vm1, %v3639_v4  ;;  %v217_v39 = vpop.f32.mrf.mxu1 }
 0x167   :  { %v218_v26 = vadd.f32 %v3559_v59, %v217_v39 }
 0x169   :  { %2918 = vmatmul.msk.f32.gmra.mxu2 %vm229_vm1, %v3667_v3  ;;  %v3692_v46 = vadd.f32 %v420_v58, %v218_v26 }
 0x16e   :  { %2923 = vmatmul.msk.f32.gmra.mxu3 %vm229_vm1, %v3656_v47 }
 0x176   :  { %2924 = vmatmul.msk.f32.gmra.mxu3 %vm229_vm1, %v3671_v32 }
 0x17e   :  { %2925 = vmatmul.msk.f32.gmra.mxu3 %vm229_vm1, %v3680_v41 }
 0x186   :  { %2926 = vmatmul.msk.f32.gmra.mxu3 %vm229_vm1, %v3686_v29 }
 0x18e   :  { %2927 = vmatmul.msk.f32.gmra.mxu3 %vm229_vm1, %v3692_v46 }
 0x196   :  { %2928 = vmatmul.msk.f32.gmra.mxu3 %vm229_vm1, %v3698_v54 }
 0x19e   :  { %2929 = vmatmul.msk.f32.gmra.mxu3 %vm229_vm1, %v3704_v53 }
 0x1a6   :  { %2930 = vmatmul.msk.f32.gmra.mxu3 %vm229_vm1, %v3710_v19 }
 0x1d1   :  { %v521_v57 = vpop.f32.mrf.mxu3 }
 0x1d2   :  { %v564_v22 = vsel %vm229_vm1, %v521_v57, 0.0 }
 0x1d4   :  { %v509_v20 = vpop.f32.mrf.mxu2 }
 0x1d5   :  { %v557_v7 = vsel %vm229_vm1, %v509_v20, 0.0 }
 0x1d9   :  { %v524_v61 = vpop.f32.mrf.mxu3 }
 0x1da   :  { %v566_v62 = vsel %vm229_vm1, %v524_v61, 0.0 }
 0x1dc   :  { %v512_v44 = vpop.f32.mrf.mxu2 }
 0x1dd   :  { %v558_v13 = vsel %vm229_vm1, %v512_v44, 0.0 }
 0x1de   :  { %v559_v8 = vadd.f32 %v558_v13, %v557_v7 }
 0x1e1   :  { %v3714_v48 = vpop.f32.mrf.mxu3 }
 0x1e2   :  { %v568_v0 = vsel %vm229_vm1, %v3714_v48, 0.0 }
 0x1e4   :  { %v515_v9 = vpop.f32.mrf.mxu2 }
 0x1e5   :  { %v560_v30 = vsel %vm229_vm1, %v515_v9, 0.0 }
 0x1e6   :  { %v561_v21 = vadd.f32 %v560_v30, %v559_v8 }
 0x1e9   :  { %v3716_v2 = vpop.f32.mrf.mxu3 }
 0x1ea   :  { %v570_v52 = vsel %vm229_vm1, %v3716_v2, 0.0 }
 0x1ec   :  { %v518_v6 = vpop.f32.mrf.mxu2 }
 0x1ed   :  { %v562_v33 = vsel %vm229_vm1, %v518_v6, 0.0 }
 0x1ee   :  { %v563_v11 = vadd.f32 %v562_v33, %v561_v21 }
 0x1f0   :  { %v565_v15 = vadd.f32 %v564_v22, %v563_v11 }
 0x1f1   :  { %v3718_v5 = vpop.f32.mrf.mxu3 }
 0x1f2   :  { %v567_v37 = vadd.f32 %v566_v62, %v565_v15  ;;  %v572_v35 = vsel %vm229_vm1, %v3718_v5, 0.0 }
 0x1f4   :  { %v569_v60 = vadd.f32 %v568_v0, %v567_v37 }
 0x1f6   :  { %v571_v34 = vadd.f32 %v570_v52, %v569_v60 }
 0x1f8   :  { %v573_v18 = vadd.f32 %v572_v35, %v571_v34 }
 0x1f9   :  { %v3720_v36 = vpop.f32.mrf.mxu3 }
 0x1fa   :  { %v574_v38 = vsel %vm229_vm1, %v3720_v36, 0.0 }
 0x1fb   :  { %v575_v42 = vadd.f32 %v574_v38, %v573_v18 }
 0x201   :  { %v3722_v59 = vpop.f32.mrf.mxu3 }
 0x202   :  { %v576_v17 = vsel %vm229_vm1, %v3722_v59, 0.0 }
 0x203   :  { %v577_v39 = vadd.f32 %v576_v17, %v575_v42 }
 0x209   :  { %v3728_v12 = vpop.f32.mrf.mxu3 }
 0x20a   :  { %v578_v43 = vsel %vm229_vm1, %v3728_v12, 0.0 }
 0x20b   :  { %v579_v45 = vadd.f32 %v578_v43, %v577_v39 }
 0x211   :  { %v3732_v16 = vpop.f32.mrf.mxu3 }
 0x212   :  { %v580_v58 = vsel %vm229_vm1, %v3732_v16, 0.0 }
 0x213   :  { %v581_v27 = vadd.f32 %v580_v58, %v579_v45 }
 0x219   :  { %v3738_v40 = vpop.f32.mrf.mxu3 }
 0x21a   :  { %v582_v63 = vsel %vm229_vm1, %v3738_v40, 0.0 }
 0x21b   :  { %v583_v28 = vadd.f32 %v582_v63, %v581_v27 }
 0x221   :  { %v3748_v26 = vpop.f32.mrf.mxu3 }
 0x222   :  { %v584_v25 = vsel %vm229_vm1, %v3748_v26, 0.0 }
 0x223   :  { %v585_v23 = vadd.f32 %v584_v25, %v583_v28 }
 0x229   :  { %v554_v55 = vpop.f32.mrf.mxu3 }
 0x22a   :  { %v586_v56 = vsel %vm229_vm1, %v554_v55, 0.0 }
 0x22b   :  { %v587_v31 = vadd.f32 %v586_v56, %v585_v23 }
 0x22d   :  { %v588_v13 = vrot.slane %v587_v31, 4 }
 0x22f   :  { %v589_v7 = vadd.f32 %v588_v13, %v587_v31 }
 0x231   :  { %v590_v30 = vrot.slane %v589_v7, 2 }
 0x233   :  { %v591_v8 = vadd.f32 %v590_v30, %v589_v7 }
 0x235   :  { %v592_v33 = vrot.slane %v591_v8, 1 }
 0x237   :  { %v593_v21 = vadd.f32 %v592_v33, %v591_v8 }
 0x239   :  { %v594_v11 = vmul.f32 %v593_v21, %v3444_v14 }
 0x23b   :  { %v3758_v22 = vsub.f32 %v509_v20, %v594_v11  ;;  %v3760_v15 = vsub.f32 %v512_v44, %v594_v11  ;;  %v3762_v62 = vsub.f32 %v515_v9, %v594_v11  ;;  %v3764_v37 = vsub.f32 %v518_v6, %v594_v11 }
 0x23c   :  { %v3770_v52 = vsub.f32 %v521_v57, %v594_v11  ;;  %v3774_v35 = vsub.f32 %v524_v61, %v594_v11  ;;  %v3781_v38 = vsub.f32 %v3714_v48, %v594_v11  ;;  %v3787_v61 = vsub.f32 %v3716_v2, %v594_v11 }
 0x23d   :  { %v611_v0 = vmul.f32 %v3758_v22, %v3758_v22  ;;  %v612_v60 = vmul.f32 %v3760_v15, %v3760_v15  ;;  %v613_v34 = vmul.f32 %v3762_v62, %v3762_v62  ;;  %v614_v20 = vmul.f32 %v3764_v37, %v3764_v37 }
 0x23e   :  { %v615_v57 = vmul.f32 %v3770_v52, %v3770_v52  ;;  %v616_v42 = vmul.f32 %v3774_v35, %v3774_v35  ;;  %v3793_v58 = vsub.f32 %v3718_v5, %v594_v11  ;;  %v617_v48 = vmul.f32 %v3781_v38, %v3781_v38 }
 0x23f   :  { %v627_v44 = vsel %vm229_vm1, %v611_v0, 0.0  ;;  %v628_v9 = vsel %vm229_vm1, %v612_v60, 0.0  ;;  %v630_v18 = vsel %vm229_vm1, %v613_v34, 0.0  ;;  %v632_v43 = vsel %vm229_vm1, %v614_v20, 0.0 }
 0x240   :  { %v629_v6 = vadd.f32 %v628_v9, %v627_v44  ;;  %v634_v45 = vsel %vm229_vm1, %v615_v57, 0.0  ;;  %v3799_v27 = vsub.f32 %v3720_v36, %v594_v11  ;;  %v618_v2 = vmul.f32 %v3787_v61, %v3787_v61 }
 0x241   :  { %v636_v25 = vsel %vm229_vm1, %v616_v42, 0.0  ;;  %v3805_v23 = vsub.f32 %v3722_v59, %v594_v11  ;;  %v619_v5 = vmul.f32 %v3793_v58, %v3793_v58  ;;  %v638_v56 = vsel %vm229_vm1, %v617_v48, 0.0 }
 0x242   :  { %v631_v17 = vadd.f32 %v630_v18, %v629_v6  ;;  %v3811_v13 = vsub.f32 %v3728_v12, %v594_v11  ;;  %v620_v36 = vmul.f32 %v3799_v27, %v3799_v27  ;;  %v640_v7 = vsel %vm229_vm1, %v618_v2, 0.0 }
 0x243   :  { %v3817_v8 = vsub.f32 %v3732_v16, %v594_v11  ;;  %v621_v59 = vmul.f32 %v3805_v23, %v3805_v23  ;;  %v642_v33 = vsel %vm229_vm1, %v619_v5, 0.0  ;;  %v3823_v0 = vsub.f32 %v3738_v40, %v594_v11 }
 0x244   :  { %v633_v39 = vadd.f32 %v632_v43, %v631_v17  ;;  %v622_v12 = vmul.f32 %v3811_v13, %v3811_v13  ;;  %v644_v60 = vsel %vm229_vm1, %v620_v36, 0.0  ;;  %v3829_v20 = vsub.f32 %v3748_v26, %v594_v11  ;;  %v762_v36 = vld [vmem:[#allocation2 + $0x50] sm:$0xff] }
 0x245   :  { %v623_v16 = vmul.f32 %v3817_v8, %v3817_v8  ;;  %v646_v44 = vsel %vm229_vm1, %v621_v59, 0.0  ;;  %v610_v6 = vsub.f32 %v554_v55, %v594_v11  ;;  %v624_v40 = vmul.f32 %v3823_v0, %v3823_v0 }
 0x246   :  { %v635_v63 = vadd.f32 %v634_v45, %v633_v39  ;;  %v648_v57 = vsel %vm229_vm1, %v622_v12, 0.0  ;;  %v625_v17 = vmul.f32 %v3829_v20, %v3829_v20 }
 0x247   :  { %v650_v42 = vsel %vm229_vm1, %v623_v16, 0.0  ;;  %v626_v43 = vmul.f32 %v610_v6, %v610_v6  ;;  %v652_v39 = vsel %vm229_vm1, %v624_v40, 0.0  ;;  %v3844_v40 = vld [vmem:[#allocation2 + $0x103] ss:$0 sm:$0xff] }
 0x248   :  { %v637_v28 = vadd.f32 %v636_v25, %v635_v63  ;;  %v654_v45 = vsel %vm229_vm1, %v625_v17, 0.0  ;;  %v3849_v17 = vld [vmem:[#allocation2 + $0x104] ss:$0 sm:$0xff] }
 0x249   :  { %v656_v55 = vsel %vm229_vm1, %v626_v43, 0.0 }
 0x24a   :  { %v639_v31 = vadd.f32 %v638_v56, %v637_v28 }
 0x24c   :  { %v641_v30 = vadd.f32 %v640_v7, %v639_v31  ;;  %v763_v31 = vld [vmem:[#allocation2 + $0x58] sm:$0xff] }
 0x24d   :  { %826 = vmatpush.msrb.mxu3 %v763_v31 }
 0x24e   :  { %v643_v21 = vadd.f32 %v642_v33, %v641_v30  ;;  %v761_v30 = vld [vmem:[#allocation2 + $0x48] sm:$0xff]  ;;  %v760_v33 = vld [vmem:[#allocation2 + $0x40] sm:$0xff] }
 0x24f   :  { %827 = vmatpush.msrb.mxu3 %v762_v36 }
 0x250   :  { %v645_v34 = vadd.f32 %v644_v60, %v643_v21 }
 0x251   :  { %828 = vmatpush.msrb.mxu3 %v761_v30 }
 0x252   :  { %v647_v9 = vadd.f32 %v646_v44, %v645_v34 }
 0x253   :  { %829 = vmatpush.msrb.mxu3 %v760_v33 }
 0x254   :  { %v649_v18 = vadd.f32 %v648_v57, %v647_v9 }
 0x256   :  { %v651_v26 = vadd.f32 %v650_v42, %v649_v18 }
 0x258   :  { %v653_v48 = vadd.f32 %v652_v39, %v651_v26 }
 0x25a   :  { %v655_v63 = vadd.f32 %v654_v45, %v653_v48  ;;  %v880_v48 = vld [vmem:[#allocation2 + $0x68] sm:$0xff] }
 0x25b   :  { %943 = vmatpush.msrb.mxu0 %v880_v48 }
 0x25c   :  { %v657_v11 = vadd.f32 %v656_v55, %v655_v63 }
 0x25e   :  { %v658_v2 = vrot.slane %v657_v11, 4 }
 0x260   :  { %v659_v25 = vadd.f32 %v658_v2, %v657_v11 }
 0x262   :  { %v660_v28 = vrot.slane %v659_v25, 2 }
 0x264   :  { %v661_v5 = vadd.f32 %v660_v28, %v659_v25 }
 0x266   :  { %v662_v56 = vrot.slane %v661_v5, 1 }
 0x268   :  { %v663_v7 = vadd.f32 %v662_v56, %v661_v5 }
 0x26a   :  { %v664_v59 = vmul.f32 %v663_v7, %v3444_v14 }
 0x26c   :  { %v665_v21 = vadd.f32 1e-05, %v664_v59 }
 0x26e   :  { %3099 = vrsqrt.f32 %v665_v21  ;;  %vm672_vm7 = vweird.f32 %v665_v21 }
 0x274   :  { %v3100_v12 = vpop.eup %3099 }
 0x275   :  { %v667_v60 = vmul.f32 %v3100_v12, %v665_v21  ;;  %vm673_vm6 = vweird.f32 %v3100_v12 }
 0x276   :  { %vm674_vm8 = vmor %vm672_vm7, %vm673_vm6 }
 0x277   :  { %v668_v34 = vmul.f32 %v3100_v12, %v667_v60 }
 0x279   :  { %v669_v16 = vmul.f32 0.5, %v668_v34 }
 0x27b   :  { %v670_v44 = vsub.f32 1.5, %v669_v16 }
 0x27d   :  { %v671_v9 = vmul.f32 %v3100_v12, %v670_v44 }
 0x27f   :  { %v3846_v57 = vsel %vm674_vm8, %v3100_v12, %v671_v9 }
 0x280   :  { %v691_v18 = vmul.f32 %v3846_v57, %v610_v6  ;;  %v676_v42 = vmul.f32 %v3846_v57, %v3758_v22  ;;  %v677_v26 = vmul.f32 %v3846_v57, %v3760_v15  ;;  %v678_v22 = vmul.f32 %v3846_v57, %v3762_v62 }
 0x281   :  { %v684_v25 = vmul.f32 %v3846_v57, %v3793_v58  ;;  %v685_v28 = vmul.f32 %v3846_v57, %v3799_v27  ;;  %v686_v5 = vmul.f32 %v3846_v57, %v3805_v23  ;;  %v687_v62 = vmul.f32 %v3846_v57, %v3811_v13 }
 0x282   :  { %v709_v43 = vmul.f32 %v3844_v40, %v691_v18  ;;  %v694_v39 = vmul.f32 %v3844_v40, %v676_v42  ;;  %v695_v6 = vmul.f32 %v3844_v40, %v677_v26  ;;  %v696_v2 = vmul.f32 %v3844_v40, %v678_v22 }
 0x283   :  { %v689_v56 = vmul.f32 %v3846_v57, %v3823_v0  ;;  %v690_v31 = vmul.f32 %v3846_v57, %v3829_v20  ;;  %v702_v58 = vmul.f32 %v3844_v40, %v684_v25  ;;  %v703_v27 = vmul.f32 %v3844_v40, %v685_v28 }
 0x284   :  { %v3858_v45 = vadd.f32 %v3849_v17, %v709_v43  ;;  %v712_v63 = vadd.f32 %v3849_v17, %v694_v39  ;;  %v713_v15 = vadd.f32 %v3849_v17, %v695_v6  ;;  %v704_v7 = vmul.f32 %v3844_v40, %v686_v5  ;;  %v879_v5 = vld [vmem:[#allocation2 + $0x60] sm:$0xff] }
 0x285   :  { %v705_v23 = vmul.f32 %v3844_v40, %v687_v62  ;;  %v707_v30 = vmul.f32 %v3844_v40, %v689_v56  ;;  %v720_v0 = vadd.f32 %v3849_v17, %v702_v58  ;;  %v721_v59 = vadd.f32 %v3849_v17, %v703_v27  ;;  %944 = vmatpush.msrb.mxu0 %v879_v5  ;;  %v995_v58 = vld [vmem:[#allocation2 + $0x78] sm:$0xff] }
 0x286   :  { %v728_v55 = vmax.f32 %v712_v63, 0.0  ;;  %v729_v36 = vmax.f32 %v713_v15, 0.0  ;;  %v722_v20 = vadd.f32 %v3849_v17, %v704_v7  ;;  %v714_v16 = vadd.f32 %v3849_v17, %v696_v2  ;;  %1012 = vmatpush.msrb.mxu1 %v995_v58 }
 0x287   :  { %v723_v33 = vadd.f32 %v3849_v17, %v705_v23  ;;  %v725_v12 = vadd.f32 %v3849_v17, %v707_v30  ;;  %v679_v44 = vmul.f32 %v3846_v57, %v3764_v37  ;;  %v680_v43 = vmul.f32 %v3846_v57, %v3770_v52  ;;  %v3088_v23 = vld [vmem:[#allocation2 + $0x105] ss:$0 sm:$0xff] }
 0x288   :  { %v744_v11 = vadd.f32 %v728_v55, %v3616_v50  ;;  %v688_v50 = vmul.f32 %v3846_v57, %v3817_v8  ;;  %v708_v8 = vmul.f32 %v3844_v40, %v690_v31  ;;  %v745_v34 = vadd.f32 %v729_v36, %v3632_v1 }
 0x289   :  { %v730_v9 = vmax.f32 %v714_v16, 0.0  ;;  %v697_v18 = vmul.f32 %v3844_v40, %v679_v44  ;;  %v698_v39 = vmul.f32 %v3844_v40, %v680_v43  ;;  %v681_v63 = vmul.f32 %v3846_v57, %v3774_v35 }
 0x28a   :  { %2931 = vmatmul.msk.f32.vlgmr.msrb.gmra.mxu3 %vm229_vm1, %v744_v11  ;;  %v706_v13 = vmul.f32 %v3844_v40, %v688_v50  ;;  %v3896_v60 = vadd.f32 %v3849_v17, %v708_v8  ;;  %v682_v22 = vmul.f32 %v3846_v57, %v3781_v38  ;;  %v683_v2 = vmul.f32 %v3846_v57, %v3787_v61 }
 0x28b   :  { %v746_v42 = vadd.f32 %v730_v9, %v3651_v10  ;;  %v715_v26 = vadd.f32 %v3849_v17, %v697_v18  ;;  %v716_v37 = vadd.f32 %v3849_v17, %v698_v39  ;;  %v699_v6 = vmul.f32 %v3844_v40, %v681_v63 }
 0x28c   :  { %v724_v21 = vadd.f32 %v3849_v17, %v706_v13  ;;  %v700_v11 = vmul.f32 %v3844_v40, %v682_v22  ;;  %v701_v25 = vmul.f32 %v3844_v40, %v683_v2  ;;  %v736_v50 = vmax.f32 %v720_v0, 0.0 }
 0x28d   :  { %v731_v1 = vmax.f32 %v715_v26, 0.0  ;;  %v732_v10 = vmax.f32 %v716_v37, 0.0  ;;  %v717_v52 = vadd.f32 %v3849_v17, %v699_v6  ;;  %v737_v57 = vmax.f32 %v721_v59, 0.0 }
 0x28e   :  { %v718_v35 = vadd.f32 %v3849_v17, %v700_v11  ;;  %v719_v38 = vadd.f32 %v3849_v17, %v701_v25  ;;  %v752_v61 = vadd.f32 %v736_v50, %v3656_v47  ;;  %v739_v56 = vmax.f32 %v723_v33, 0.0 }
 0x28f   :  { %v747_v48 = vadd.f32 %v731_v1, %v3667_v3  ;;  %v748_v55 = vadd.f32 %v732_v10, %v3565_v49  ;;  %v733_v3 = vmax.f32 %v717_v52, 0.0  ;;  %v753_v40 = vadd.f32 %v737_v57, %v3671_v32  ;;  %v994_v32 = vld [vmem:[#allocation2 + $0x70] sm:$0xff] }
 0x290   :  { %v734_v49 = vmax.f32 %v718_v35, 0.0  ;;  %v735_v62 = vmax.f32 %v719_v38, 0.0  ;;  %v740_v31 = vmax.f32 %v724_v21, 0.0  ;;  %v741_v36 = vmax.f32 %v725_v12, 0.0  ;;  %1013 = vmatpush.msrb.mxu1 %v994_v32 }
 0x291   :  { %v749_v15 = vadd.f32 %v733_v3, %v3600_v24  ;;  %v743_v7 = vmax.f32 %v3858_v45, 0.0 }
 0x292   :  { %2932 = vmatmul.msk.f32.gmra.mxu3 %vm229_vm1, %v745_v34  ;;  %v750_v28 = vadd.f32 %v734_v49, %v3620_v51  ;;  %v751_v24 = vadd.f32 %v735_v62, %v3639_v4  ;;  %v738_v51 = vmax.f32 %v722_v20, 0.0  ;;  %v755_v4 = vadd.f32 %v739_v56, %v3686_v29 }
 0x293   :  { %v756_v47 = vadd.f32 %v740_v31, %v3692_v46  ;;  %v757_v27 = vadd.f32 %v741_v36, %v3698_v54  ;;  %v759_v46 = vadd.f32 %v743_v7, %v3710_v19 }
 0x294   :  { %v754_v17 = vadd.f32 %v738_v51, %v3680_v41  ;;  %v742_v41 = vmax.f32 %v3896_v60, 0.0 }
 0x296   :  { %v758_v29 = vadd.f32 %v742_v41, %v3704_v53 }
 0x29a   :  { %2933 = vmatmul.msk.f32.gmra.mxu3 %vm229_vm1, %v746_v42 }
 0x2a2   :  { %2934 = vmatmul.msk.f32.gmra.mxu3 %vm229_vm1, %v747_v48 }
 0x2aa   :  { %2935 = vmatmul.msk.f32.gmra.mxu3 %vm229_vm1, %v748_v55 }
 0x2b2   :  { %2936 = vmatmul.msk.f32.gmra.mxu3 %vm229_vm1, %v749_v15 }
 0x2ba   :  { %2937 = vmatmul.msk.f32.gmra.mxu3 %vm229_vm1, %v750_v28 }
 0x2c2   :  { %2938 = vmatmul.msk.f32.gmra.mxu3 %vm229_vm1, %v751_v24 }
 0x2ca   :  { %2939 = vmatmul.msk.f32.gmra.mxu3 %vm229_vm1, %v752_v61 }
 0x2d2   :  { %2940 = vmatmul.msk.f32.gmra.mxu3 %vm229_vm1, %v753_v40 }
 0x2da   :  { %2941 = vmatmul.msk.f32.gmra.mxu3 %vm229_vm1, %v754_v17 }
 0x2e2   :  { %2942 = vmatmul.msk.f32.gmra.mxu3 %vm229_vm1, %v755_v4 }
 0x2ea   :  { %2943 = vmatmul.msk.f32.gmra.mxu3 %vm229_vm1, %v756_v47 }
 0x2f2   :  { %2944 = vmatmul.msk.f32.gmra.mxu3 %vm229_vm1, %v757_v27 }
 0x2fa   :  { %2945 = vmatmul.msk.f32.gmra.mxu3 %vm229_vm1, %v758_v29 }
 0x302   :  { %2946 = vmatmul.msk.f32.gmra.mxu3 %vm229_vm1, %v759_v46 }
 0x30d   :  { %v831_v13 = vpop.f32.mrf.mxu3 }
 0x30e   :  { %v3951_v30 = vadd.f32 %v3088_v23, %v831_v13 }
 0x310   :  { %2947 = vmatmul.msk.f32.vlgmr.msrb.gmra.mxu0 %vm46_vm0, %v3951_v30  ;;  %2963 = vmatmul.msk.f32.vlgmr.msrb.gmra.mxu1 %vm46_vm0, %v3951_v30 }
 0x315   :  { %v834_v54 = vpop.f32.mrf.mxu3 }
 0x316   :  { %v3957_v53 = vadd.f32 %v3088_v23, %v834_v54 }
 0x318   :  { %5815 = vst [vmem:[#allocation8_spill] sm:$0xff] %v3957_v53  ;;  %2948 = vmatmul.msk.f32.gmra.mxu0 %vm46_vm0, %v3957_v53  ;;  %2964 = vmatmul.msk.f32.gmra.mxu1 %vm46_vm0, %v3957_v53 }
 0x31d   :  { %v837_v19 = vpop.f32.mrf.mxu3 }
 0x31e   :  { %v3963_v45 = vadd.f32 %v3088_v23, %v837_v19 }
 0x320   :  { %5816 = vst [vmem:[#allocation9_spill] sm:$0xff] %v3963_v45  ;;  %2949 = vmatmul.msk.f32.gmra.mxu0 %vm46_vm0, %v3963_v45  ;;  %2965 = vmatmul.msk.f32.gmra.mxu1 %vm46_vm0, %v3963_v45 }
 0x325   :  { %v840_v8 = vpop.f32.mrf.mxu3 }
 0x326   :  { %v3969_v0 = vadd.f32 %v3088_v23, %v840_v8 }
 0x328   :  { %5817 = vst [vmem:[#allocation10_spill] sm:$0xff] %v3969_v0  ;;  %2950 = vmatmul.msk.f32.gmra.mxu0 %vm46_vm0, %v3969_v0  ;;  %2966 = vmatmul.msk.f32.gmra.mxu1 %vm46_vm0, %v3969_v0 }
 0x32d   :  { %v843_v59 = vpop.f32.mrf.mxu3 }
 0x32e   :  { %v3975_v20 = vadd.f32 %v3088_v23, %v843_v59 }
 0x330   :  { %5818 = vst [vmem:[#allocation11_spill] sm:$0xff] %v3975_v20  ;;  %2951 = vmatmul.msk.f32.gmra.mxu0 %vm46_vm0, %v3975_v20  ;;  %2967 = vmatmul.msk.f32.gmra.mxu1 %vm46_vm0, %v3975_v20 }
 0x335   :  { %v846_v33 = vpop.f32.mrf.mxu3 }
 0x336   :  { %v3981_v21 = vadd.f32 %v3088_v23, %v846_v33  ;;  %v3199_v33 = vld [vmem:[%s5789_s0] sm:$0xff] }
 0x338   :  { %5819 = vst [vmem:[#allocation12_spill] sm:$0xff] %v3981_v21  ;;  %2952 = vmatmul.msk.f32.gmra.mxu0 %vm46_vm0, %v3981_v21  ;;  %2968 = vmatmul.msk.f32.gmra.mxu1 %vm46_vm0, %v3981_v21 }
 0x33d   :  { %v849_v12 = vpop.f32.mrf.mxu3 }
 0x33e   :  { %v3987_v60 = vadd.f32 %v3088_v23, %v849_v12  ;;  %v4089_v12 = vadd.f32 -46.02, %v3199_v33 }
 0x340   :  { %5820 = vst [vmem:[#allocation13_spill] sm:$0xff] %v3987_v60  ;;  %2953 = vmatmul.msk.f32.gmra.mxu0 %vm46_vm0, %v3987_v60  ;;  %2969 = vmatmul.msk.f32.gmra.mxu1 %vm46_vm0, %v3987_v60  ;;  %3101 = vrcp.f32 %v4089_v12  ;;  %vm1422_vm1 = vweird.f32 %v4089_v12 }
 0x345   :  { %v852_v34 = vpop.f32.mrf.mxu3 }
 0x346   :  { %v3993_v16 = vadd.f32 %v3088_v23, %v852_v34 }
 0x348   :  { %5821 = vst [vmem:[#allocation14_spill] sm:$0xff] %v3993_v16  ;;  %2954 = vmatmul.msk.f32.gmra.mxu0 %vm46_vm0, %v3993_v16  ;;  %2970 = vmatmul.msk.f32.gmra.mxu1 %vm46_vm0, %v3993_v16 }
 0x34d   :  { %v855_v44 = vpop.f32.mrf.mxu3 }
 0x34e   :  { %v3999_v9 = vadd.f32 %v3088_v23, %v855_v44  ;;  %v3200_v44 = vld [vmem:[%s5789_s0 + $0x8] sm:$0xff] }
 0x350   :  { %5822 = vst [vmem:[#allocation15_spill] sm:$0xff] %v3999_v9  ;;  %2955 = vmatmul.msk.f32.gmra.mxu0 %vm46_vm0, %v3999_v9  ;;  %2971 = vmatmul.msk.f32.gmra.mxu1 %vm46_vm0, %v3999_v9 }
 0x355   :  { %v858_v18 = vpop.f32.mrf.mxu3 }
 0x356   :  { %v4005_v42 = vadd.f32 %v3088_v23, %v858_v18  ;;  %v4094_v18 = vadd.f32 -46.02, %v3200_v44  ;;  %v3210_v44 = vld [vmem:[%s5789_s0 + $0x68] sm:$0xff] }
 0x358   :  { %5823 = vst [vmem:[#allocation16_spill] sm:$0xff] %v4005_v42  ;;  %2956 = vmatmul.msk.f32.gmra.mxu0 %vm46_vm0, %v4005_v42  ;;  %2972 = vmatmul.msk.f32.gmra.mxu1 %vm46_vm0, %v4005_v42  ;;  %3103 = vrcp.f32 %v4094_v18 }
 0x35d   :  { %v861_v26 = vpop.f32.mrf.mxu3 }
 0x35e   :  { %v4011_v43 = vadd.f32 %v3088_v23, %v861_v26  ;;  %v3201_v26 = vld [vmem:[%s5789_s0 + $0x10] sm:$0xff] }
 0x360   :  { %5824 = vst [vmem:[#allocation17_spill] sm:$0xff] %v4011_v43  ;;  %2957 = vmatmul.msk.f32.gmra.mxu0 %vm46_vm0, %v4011_v43  ;;  %2973 = vmatmul.msk.f32.gmra.mxu1 %vm46_vm0, %v4011_v43 }
 0x365   :  { %v864_v1 = vpop.f32.mrf.mxu3 }
 0x366   :  { %v4017_v39 = vadd.f32 %v3088_v23, %v864_v1  ;;  %v4099_v1 = vadd.f32 -46.02, %v3201_v26  ;;  %v4187_v26 = vadd.f32 -46.02, %v3210_v44 }
 0x368   :  { %5825 = vst [vmem:[#allocation18_spill] sm:$0xff] %v4017_v39  ;;  %2958 = vmatmul.msk.f32.gmra.mxu0 %vm46_vm0, %v4017_v39  ;;  %2974 = vmatmul.msk.f32.gmra.mxu1 %vm46_vm0, %v4017_v39  ;;  %3105 = vrcp.f32 %v4099_v1  ;;  %vm1452_vm9 = vweird.f32 %v4099_v1 }
 0x36d   :  { %v867_v48 = vpop.f32.mrf.mxu3 }
 0x36e   :  { %v4023_v37 = vadd.f32 %v3088_v23, %v867_v48 }
 0x370   :  { %5826 = vst [vmem:[#allocation19_spill] sm:$0xff] %v4023_v37  ;;  %2959 = vmatmul.msk.f32.gmra.mxu0 %vm46_vm0, %v4023_v37  ;;  %2975 = vmatmul.msk.f32.gmra.mxu1 %vm46_vm0, %v4023_v37 }
 0x375   :  { %v870_v63 = vpop.f32.mrf.mxu3 }
 0x376   :  { %v4029_v10 = vadd.f32 %v3088_v23, %v870_v63  ;;  %v3202_v63 = vld [vmem:[%s5789_s0 + $0x18] sm:$0xff] }
 0x378   :  { %5827 = vst [vmem:[#allocation20_spill] sm:$0xff] %v4029_v10  ;;  %2960 = vmatmul.msk.f32.gmra.mxu0 %vm46_vm0, %v4029_v10  ;;  %2976 = vmatmul.msk.f32.gmra.mxu1 %vm46_vm0, %v4029_v10 }
 0x37d   :  { %v873_v6 = vpop.f32.mrf.mxu3 }
 0x37e   :  { %v4035_v55 = vadd.f32 %v3088_v23, %v873_v6  ;;  %v4107_v6 = vadd.f32 -46.02, %v3202_v63 }
 0x380   :  { %5828 = vst [vmem:[#allocation21_spill] sm:$0xff] %v4035_v55  ;;  %2961 = vmatmul.msk.f32.gmra.mxu0 %vm46_vm0, %v4035_v55  ;;  %2977 = vmatmul.msk.f32.gmra.mxu1 %vm46_vm0, %v4035_v55  ;;  %3107 = vrcp.f32 %v4107_v6  ;;  %vm1467_vm13 = vweird.f32 %v4107_v6 }
 0x385   :  { %v876_v52 = vpop.f32.mrf.mxu3 }
 0x386   :  { %v4041_v22 = vadd.f32 %v3088_v23, %v876_v52  ;;  %v3203_v52 = vld [vmem:[%s5789_s0 + $0x20] sm:$0xff] }
 0x388   :  { %5829 = vst [vmem:[#allocation22_spill] sm:$0xff] %v4041_v22  ;;  %2962 = vmatmul.msk.f32.gmra.mxu0 %vm46_vm0, %v4041_v22  ;;  %2978 = vmatmul.msk.f32.gmra.mxu1 %vm46_vm0, %v4041_v22 }
 0x38d   :  { %v946_v3 = vpop.f32.mrf.mxu0 }
 0x395   :  { %v949_v11 = vpop.f32.mrf.mxu0 }
 0x396   :  { %v1063_v50 = vadd.f32 %v949_v11, %v946_v3 }
 0x39d   :  { %v952_v15 = vpop.f32.mrf.mxu0 }
 0x39e   :  { %v1064_v61 = vadd.f32 %v1063_v50, %v952_v15  ;;  %v4113_v50 = vadd.f32 -46.02, %v3203_v52 }
 0x3a0   :  { %3109 = vrcp.f32 %v4113_v50 }
 0x3a5   :  { %v4047_v35 = vpop.f32.mrf.mxu0 }
 0x3a6   :  { %v1065_v40 = vadd.f32 %v1064_v61, %v4047_v35 }
 0x3ad   :  { %v4049_v2 = vpop.f32.mrf.mxu0 }
 0x3ae   :  { %v1066_v51 = vadd.f32 %v1065_v40, %v4049_v2 }
 0x3b5   :  { %v4051_v49 = vpop.f32.mrf.mxu0 }
 0x3b6   :  { %v1067_v17 = vadd.f32 %v1066_v51, %v4051_v49  ;;  %v3204_v51 = vld [vmem:[%s5789_s0 + $0x28] sm:$0xff] }
 0x3bd   :  { %v4053_v25 = vpop.f32.mrf.mxu0 }
 0x3be   :  { %v1068_v56 = vadd.f32 %v1067_v17, %v4053_v25  ;;  %v4125_v17 = vadd.f32 -46.02, %v3204_v51 }
 0x3c0   :  { %3111 = vrcp.f32 %v4125_v17 }
 0x3c5   :  { %v4055_v28 = vpop.f32.mrf.mxu0 }
 0x3c6   :  { %v1069_v31 = vadd.f32 %v1068_v56, %v4055_v28  ;;  %v3205_v56 = vld [vmem:[%s5789_s0 + $0x30] sm:$0xff] }
 0x3cd   :  { %v4057_v38 = vpop.f32.mrf.mxu0 }
 0x3ce   :  { %v1070_v47 = vadd.f32 %v1069_v31, %v4057_v38  ;;  %v4131_v31 = vadd.f32 -46.02, %v3205_v56 }
 0x3d0   :  { %3113 = vrcp.f32 %v4131_v31 }
 0x3d5   :  { %v4059_v5 = vpop.f32.mrf.mxu0 }
 0x3d6   :  { %v1071_v36 = vadd.f32 %v1070_v47, %v4059_v5 }
 0x3dd   :  { %v4061_v62 = vpop.f32.mrf.mxu0 }
 0x3de   :  { %v1072_v58 = vadd.f32 %v1071_v36, %v4061_v62 }
 0x3e5   :  { %v4063_v24 = vpop.f32.mrf.mxu0 }
 0x3e6   :  { %v1073_v27 = vadd.f32 %v1072_v58, %v4063_v24 }
 0x3ed   :  { %v4065_v57 = vpop.f32.mrf.mxu0 }
 0x3ee   :  { %v1074_v41 = vadd.f32 %v1073_v27, %v4065_v57  ;;  %v3207_v27 = vld [vmem:[%s5789_s0 + $0x40] sm:$0xff] }
 0x3f5   :  { %v4071_v4 = vpop.f32.mrf.mxu0 }
 0x3f6   :  { %v1075_v29 = vadd.f32 %v1074_v41, %v4071_v4  ;;  %v4151_v41 = vadd.f32 -46.02, %v3207_v27 }
 0x3fd   :  { %v4077_v32 = vpop.f32.mrf.mxu0 }
 0x3fe   :  { %v1076_v7 = vadd.f32 %v1075_v29, %v4077_v32  ;;  %v4153_v29 = vpop.eup %3101 }
 0x3ff   :  { %v1418_v60 = vmul.f32 %v4153_v29, %v4089_v12  ;;  %vm1423_vm3 = vweird.f32 %v4153_v29 }
 0x400   :  { %vm1424_vm4 = vmor %vm1422_vm1, %vm1423_vm3 }
 0x401   :  { %v1419_v0 = vsub.f32 1.0, %v1418_v60 }
 0x405   :  { %v4083_v46 = vpop.f32.mrf.mxu0 }
 0x406   :  { %v1077_v23 = vadd.f32 %v1076_v7, %v4083_v46  ;;  %v4160_v7 = vpop.eup %3103 }
 0x408   :  { %v1078_v13 = vrot.slane %v1077_v23, 4 }
 0x40a   :  { %v1079_v54 = vadd.f32 %v1078_v13, %v1077_v23  ;;  %v3208_v23 = vld [vmem:[%s5789_s0 + $0x48] sm:$0xff] }
 0x40b   :  { %v4166_v13 = vadd.f32 -46.02, %v3208_v23 }
 0x40c   :  { %v1080_v19 = vrot.slane %v1079_v54, 2 }
 0x40e   :  { %v1081_v8 = vadd.f32 %v1080_v19, %v1079_v54  ;;  %v4168_v54 = vpop.eup %3105  ;;  %v3209_v19 = vld [vmem:[%s5789_s0 + $0x50] sm:$0xff] }
 0x40f   :  { %vm1453_vm10 = vweird.f32 %v4168_v54 }
 0x410   :  { %v1082_v59 = vrot.slane %v1081_v8, 1  ;;  %vm1454_vm11 = vmor %vm1452_vm9, %vm1453_vm10  ;;  %vm1437_vm9 = vweird.f32 %v4094_v18 }
 0x412   :  { %v1083_v34 = vadd.f32 %v1082_v59, %v1081_v8  ;;  %v4173_v8 = vadd.f32 -46.02, %v3209_v19 }
 0x414   :  { %v4102_v48 = vmul.f32 %v1083_v34, %v3444_v14  ;;  %v4181_v34 = vpop.eup %3107 }
 0x415   :  { %v4189_v63 = vpop.eup %3109  ;;  %v1463_v43 = vmul.f32 %v4181_v34, %v4107_v6  ;;  %vm1468_vm14 = vweird.f32 %v4181_v34 }
 0x416   :  { %v4116_v61 = vsub.f32 %v946_v3, %v4102_v48  ;;  %v4119_v40 = vsub.f32 %v949_v11, %v4102_v48  ;;  %v3206_v3 = vld [vmem:[%s5789_s0 + $0x38] sm:$0xff]  ;;  %v4141_v47 = vsub.f32 %v952_v15, %v4102_v48  ;;  %v4158_v15 = vsub.f32 %v4047_v35, %v4102_v48  ;;  %vm1469_vm15 = vmor %vm1467_vm13, %vm1468_vm14 }
 0x417   :  { %v4137_v11 = vadd.f32 -46.02, %v3206_v3  ;;  %v4177_v35 = vsub.f32 %v4049_v2, %v4102_v48  ;;  %v3211_v2 = vld [vmem:[%s5789_s0 + $0x58] sm:$0xff]  ;;  %v4198_v51 = vsub.f32 %v4051_v49, %v4102_v48  ;;  %v4212_v23 = vsub.f32 %v4053_v25, %v4102_v48 }
 0x418   :  { %v1101_v36 = vmul.f32 %v4116_v61, %v4116_v61  ;;  %v1102_v58 = vmul.f32 %v4119_v40, %v4119_v40  ;;  %v1103_v59 = vmul.f32 %v4141_v47, %v4141_v47  ;;  %v4194_v52 = vadd.f32 -46.02, %v3211_v2 }
 0x419   :  { %3115 = vrcp.f32 %v4137_v11  ;;  %v1104_v56 = vmul.f32 %v4158_v15, %v4158_v15  ;;  %v1105_v49 = vmul.f32 %v4177_v35, %v4177_v35  ;;  %v4222_v44 = vsub.f32 %v4055_v28, %v4102_v48 }
 0x41a   :  { %v1117_v33 = vadd.f32 %v1102_v58, %v1101_v36  ;;  %3117 = vrcp.f32 %v4151_v41  ;;  %v4202_v36 = vpop.eup %3111  ;;  %v1448_v58 = vmul.f32 %v4168_v54, %v4099_v1  ;;  %v1106_v2 = vmul.f32 %v4198_v51, %v4198_v51 }
 0x41b   :  { %3119 = vrcp.f32 %v4166_v13  ;;  %v4207_v27 = vpop.eup %3113  ;;  %v4239_v28 = vsub.f32 %v4059_v5, %v4102_v48  ;;  %v1456_v5 = vand.u32 2147483647, %v4099_v1  ;;  %v4284_v20 = vsub.f32 %v4077_v32, %v4102_v48 }
 0x41c   :  { %v1118_v3 = vadd.f32 %v1117_v33, %v1103_v59  ;;  %3121 = vrcp.f32 %v4173_v8  ;;  %v1449_v33 = vsub.f32 1.0, %v1448_v58  ;;  %v4235_v58 = vsub.f32 %v4057_v38, %v4102_v48 }
 0x41d   :  { %3123 = vrcp.f32 %v4187_v26  ;;  %vm1457_vm12 = vcmp.eq.f32.partialorder %v1456_v5, 8.507059e+37  ;;  %v1464_v5 = vsub.f32 1.0, %v1463_v43  ;;  %v1110_v53 = vmul.f32 %v4239_v28, %v4239_v28 }
 0x41e   :  { %v1119_v19 = vadd.f32 %v1118_v3, %v1104_v56  ;;  %3125 = vrcp.f32 %v4194_v52  ;;  %v3212_v56 = vld [vmem:[%s5789_s0 + $0x60] sm:$0xff]  ;;  %v1450_v22 = vmul.f32 %v4168_v54, %v1449_v33  ;;  %v1420_v43 = vmul.f32 %v4153_v29, %v1419_v0 }
 0x41f   :  { %v4216_v59 = vpop.eup %3115  ;;  %v4231_v3 = vadd.f32 -46.02, %v3212_v56  ;;  %v1458_v56 = vand.u32 2147483648, %v4099_v1  ;;  %v1465_v60 = vmul.f32 %v4181_v34, %v1464_v5  ;;  %v1426_v5 = vand.u32 2147483647, %v4089_v12 }
 0x420   :  { %v1120_v25 = vadd.f32 %v1119_v19, %v1105_v49  ;;  %v4226_v55 = vpop.eup %3117  ;;  %v4244_v49 = vsub.f32 %v4061_v62, %v4102_v48  ;;  %v1107_v19 = vmul.f32 %v4212_v23, %v4212_v23  ;;  %v1451_v38 = vadd.f32 %v4168_v54, %v1450_v22 }
 0x421   :  { %v4249_v37 = vpop.eup %3119  ;;  %v4259_v62 = vsub.f32 %v4063_v24, %v4102_v48  ;;  %v1459_v39 = vor.u32 1.1754944e-38, %v1458_v56  ;;  %v4274_v24 = vsub.f32 %v4065_v57, %v4102_v48  ;;  %v4288_v57 = vsub.f32 %v4083_v46, %v4102_v48 }
 0x422   :  { %v1121_v10 = vadd.f32 %v1120_v25, %v1106_v2  ;;  %v4255_v33 = vpop.eup %3121  ;;  %v1108_v2 = vmul.f32 %v4222_v44, %v4222_v44  ;;  %v1455_v22 = vsel %vm1454_vm11, %v4168_v54, %v1451_v38  ;;  %v4280_v54 = vsub.f32 %v4071_v4, %v4102_v48 }
 0x423   :  { %v4263_v42 = vpop.eup %3123  ;;  %v1460_v56 = vsel %vm1457_vm12, %v1459_v39, %v1455_v22  ;;  %v1111_v39 = vmul.f32 %v4244_v49, %v4244_v49  ;;  %v1112_v4 = vmul.f32 %v4259_v62, %v4259_v62  ;;  %v1113_v32 = vmul.f32 %v4274_v24, %v4274_v24 }
 0x424   :  { %v1122_v25 = vadd.f32 %v1121_v10, %v1107_v19  ;;  %v4270_v16 = vpop.eup %3125  ;;  %v1109_v10 = vmul.f32 %v4235_v58, %v4235_v58  ;;  %v1659_v38 = vsub.f32 -0.027762353, %v1460_v56  ;;  %v1473_v48 = vand.u32 2147483648, %v4107_v6  ;;  %v1283_v56 = vld [vmem:[#allocation2 + $0xf8] sm:$0xff] }
 0x425   :  { %v1466_v22 = vadd.f32 %v4181_v34, %v1465_v60  ;;  %1286 = vmatpush.msrb.mxu2 %v1283_v56  ;;  %v1282_v60 = vld [vmem:[#allocation2 + $0xf0] sm:$0xff]  ;;  %vm1427_vm5 = vcmp.eq.f32.partialorder %v1426_v5, 8.507059e+37  ;;  %vm1527_vm6 = vweird.f32 %v4137_v11  ;;  %vm1528_vm7 = vweird.f32 %v4216_v59 }
 0x426   :  { %v1123_v19 = vadd.f32 %v1122_v25, %v1108_v2  ;;  %1693 = vrot.lane.b32.xlu1 %v1659_v38, %s3273_s21  ;;  %v1428_v25 = vand.u32 2147483648, %v4089_v12  ;;  %v1474_v0 = vor.u32 1.1754944e-38, %v1473_v48  ;;  %v1421_v38 = vadd.f32 %v4153_v29, %v1420_v43  ;;  %vm4333_vm8 = vmor %vm1527_vm6, %vm1528_vm7 }
 0x427   :  { %1287 = vmatpush.msrb.mxu2 %v1282_v60  ;;  %v1531_v60 = vand.u32 2147483647, %v4137_v11  ;;  %vm1438_vm11 = vweird.f32 %v4160_v7  ;;  %3127 = vrcp.f32 %v4231_v3  ;;  %vm1572_vm14 = vweird.f32 %v4173_v8 }
 0x428   :  { %v1124_v2 = vadd.f32 %v1123_v19, %v1109_v10  ;;  %v1471_v10 = vand.u32 2147483647, %v4107_v6  ;;  %v1425_v48 = vsel %vm1424_vm4, %v4153_v29, %v1421_v38  ;;  %vm1439_vm12 = vmor %vm1437_vm9, %vm1438_vm11  ;;  %vm1513_vm4 = vweird.f32 %v4207_v27 }
 0x429   :  { %vm1532_vm10 = vcmp.eq.f32.partialorder %v1531_v60, 8.507059e+37  ;;  %vm1482_vm7 = vweird.f32 %v4113_v50 }
 0x42a   :  { %v1125_v46 = vadd.f32 %v1124_v2, %v1110_v53  ;;  %v1470_v53 = vsel %vm1469_vm15, %v4181_v34, %v1466_v22  ;;  %vm1472_vm2 = vcmp.eq.f32.partialorder %v1471_v10, 8.507059e+37  ;;  %v1433_v34 = vmul.f32 %v4160_v7, %v4094_v18 }
 0x42b   :  { %v1475_v45 = vsel %vm1472_vm2, %v1474_v0, %v1470_v53  ;;  %v1114_v22 = vmul.f32 %v4280_v54, %v4280_v54  ;;  %v1116_v0 = vmul.f32 %v4288_v57, %v4288_v57  ;;  %v1280_v53 = vld [vmem:[#allocation2 + $0xe0] sm:$0xff]  ;;  %vm1573_vm15 = vweird.f32 %v4255_v33 }
 0x42c   :  { %v1126_v19 = vadd.f32 %v1125_v46, %v1111_v39  ;;  %v1429_v39 = vor.u32 1.1754944e-38, %v1428_v25  ;;  %v1523_v46 = vmul.f32 %v4216_v59, %v4137_v11  ;;  %v1660_v43 = vsub.f32 -0.027762353, %v1475_v45  ;;  %vm4365_vm1 = vmor %vm1572_vm14, %vm1573_vm15 }
 0x42d   :  { %v1115_v25 = vmul.f32 %v4284_v20, %v4284_v20  ;;  %v1434_v29 = vsub.f32 1.0, %v1433_v34  ;;  %v1276_v34 = vld [vmem:[#allocation2 + $0xc0] sm:$0xff]  ;;  %vm1512_vm2 = vweird.f32 %v4131_v31  ;;  %vm1557_vm15 = vweird.f32 %v4166_v13 }
 0x42e   :  { %v1127_v2 = vadd.f32 %v1126_v19, %v1112_v4  ;;  %v1281_v4 = vld [vmem:[#allocation2 + $0xe8] sm:$0xff]  ;;  %v1430_v19 = vsel %vm1427_vm5, %v1429_v39, %v1425_v48  ;;  %v1524_v56 = vsub.f32 1.0, %v1523_v46  ;;  %1695 = vrot.lane.b32.xlu1 %v1660_v43, %s3273_s21  ;;  %v1279_v43 = vld [vmem:[#allocation2 + $0xd8] sm:$0xff]  ;;  %vm1514_vm5 = vmor %vm1512_vm2, %vm1513_vm4 }
 0x42f   :  { %1288 = vmatpush.msrb.mxu2 %v1281_v4  ;;  %v1657_v45 = vsub.f32 -0.027762353, %v1430_v19  ;;  %v1435_v39 = vmul.f32 %v4160_v7, %v1434_v29  ;;  %v1441_v4 = vand.u32 2147483647, %v4094_v18  ;;  %v1568_v29 = vmul.f32 %v4255_v33, %v4173_v8 }
 0x430   :  { %v1128_v10 = vadd.f32 %v1127_v2, %v1113_v32  ;;  %v1525_v5 = vmul.f32 %v4216_v59, %v1524_v56  ;;  %v1533_v32 = vand.u32 2147483648, %v4137_v11  ;;  %v1443_v2 = vand.u32 2147483648, %v4094_v18  ;;  %v1278_v56 = vld [vmem:[#allocation2 + $0xd0] sm:$0xff] }
 0x431   :  { %1689 = vrot.lane.b32.xlu0 %v1657_v45, %s3273_s21  ;;  %1289 = vmatpush.msrb.mxu2 %v1280_v53  ;;  %vm1442_vm13 = vcmp.eq.f32.partialorder %v1441_v4, 8.507059e+37  ;;  %v1518_v4 = vand.u32 2147483648, %v4131_v31 }
 0x432   :  { %v1129_v38 = vadd.f32 %v1128_v10, %v1114_v22  ;;  %v1526_v48 = vadd.f32 %v4216_v59, %v1525_v5  ;;  %v1534_v22 = vor.u32 1.1754944e-38, %v1533_v32  ;;  %v1436_v10 = vadd.f32 %v4160_v7, %v1435_v39 }
 0x433   :  { %1290 = vmatpush.msrb.mxu2 %v1279_v43  ;;  %v1444_v45 = vor.u32 1.1754944e-38, %v1443_v2  ;;  %v1508_v5 = vmul.f32 %v4207_v27, %v4131_v31 }
 0x434   :  { %v1130_v46 = vadd.f32 %v1129_v38, %v1115_v25  ;;  %v1530_v25 = vsel %vm4333_vm8, %v4216_v59, %v1526_v48  ;;  %v1440_v53 = vsel %vm1439_vm12, %v4160_v7, %v1436_v10  ;;  %v3213_v59 = vld [vmem:[%s5789_s0 + $0x78] sm:$0xff]  ;;  %v1578_v10 = vand.u32 2147483648, %v4173_v8 }
 0x435   :  { %1291 = vmatpush.msrb.mxu2 %v1278_v56  ;;  %v1535_v38 = vsel %vm1532_vm10, %v1534_v22, %v1530_v25  ;;  %v1445_v39 = vsel %vm1442_vm13, %v1444_v45, %v1440_v53  ;;  %v4353_v2 = vadd.f32 -46.02, %v3213_v59  ;;  %v1509_v7 = vsub.f32 1.0, %v1508_v5  ;;  %v1275_v45 = vld [vmem:[#allocation2 + $0xb8] sm:$0xff] }
 0x436   :  { %v1131_v19 = vadd.f32 %v1130_v46, %v1116_v0  ;;  %v1277_v0 = vld [vmem:[#allocation2 + $0xc8] sm:$0xff]  ;;  %v1664_v60 = vsub.f32 -0.027762353, %v1535_v38  ;;  %v1569_v46 = vsub.f32 1.0, %v1568_v29  ;;  %v1658_v43 = vsub.f32 -0.027762353, %v1445_v39 }
 0x437   :  { %1292 = vmatpush.msrb.mxu2 %v1277_v0  ;;  %v1576_v56 = vand.u32 2147483647, %v4173_v8  ;;  %v1579_v53 = vor.u32 1.1754944e-38, %v1578_v10  ;;  %v1478_v59 = vmul.f32 %v4189_v63, %v4113_v50  ;;  %3129 = vrcp.f32 %v4353_v2  ;;  %v1272_v38 = vld [vmem:[#allocation2 + $0xa0] sm:$0xff] }
 0x438   :  { %v1132_v32 = vrot.slane %v1131_v19, 4  ;;  %1703 = vrot.lane.b32.xlu1 %v1664_v60, %s3273_s21  ;;  %v1570_v22 = vmul.f32 %v4255_v33, %v1569_v46  ;;  %v1274_v60 = vld [vmem:[#allocation2 + $0xb0] sm:$0xff]  ;;  %v1519_v46 = vor.u32 1.1754944e-38, %v1518_v4  ;;  %v1553_v4 = vmul.f32 %v4249_v37, %v4166_v13 }
 0x439   :  { %1691 = vrot.lane.b32.xlu0 %v1658_v43, %s3273_s21  ;;  %1293 = vmatpush.msrb.mxu2 %v1276_v34  ;;  %vm1577_vm3 = vcmp.eq.f32.partialorder %v1576_v56, 8.507059e+37  ;;  %v4378_v43 = vpop.eup %3127  ;;  %v1273_v56 = vld [vmem:[#allocation2 + $0xa8] sm:$0xff]  ;;  %vm1483_vm8 = vweird.f32 %v4189_v63  ;;  %vm1617_vm10 = vweird.f32 %v4187_v26  ;;  %vm1618_vm12 = vweird.f32 %v4263_v42 }
 0x43a   :  { %v1133_v48 = vadd.f32 %v1132_v32, %v1131_v19  ;;  %v1510_v19 = vmul.f32 %v4207_v27, %v1509_v7  ;;  %v1571_v29 = vadd.f32 %v4255_v33, %v1570_v22  ;;  %v1516_v32 = vand.u32 2147483647, %v4131_v31  ;;  %v4383_v22 = vpop.f32.mrf.mxu1  ;;  %vm4397_vm9 = vmor %vm1482_vm7, %vm1483_vm8 }
 0x43b   :  { %1294 = vmatpush.msrb.mxu2 %v1275_v45  ;;  %v1479_v45 = vsub.f32 1.0, %v1478_v59  ;;  %v1270_v59 = vld [vmem:[#allocation2 + $0x90] sm:$0xff]  ;;  %vm4413_vm13 = vmor %vm1617_vm10, %vm1618_vm12  ;;  %vm1602_vm7 = vweird.f32 %v4231_v3  ;;  %vm1603_vm8 = vweird.f32 %v4378_v43 }
 0x43c   :  { %v1134_v25 = vrot.slane %v1133_v48, 2  ;;  %v1511_v5 = vadd.f32 %v4207_v27, %v1510_v19  ;;  %v1575_v39 = vsel %vm4365_vm1, %v4255_v33, %v1571_v29  ;;  %vm1517_vm6 = vcmp.eq.f32.partialorder %v1516_v32, 8.507059e+37 }
 0x43d   :  { %1295 = vmatpush.msrb.mxu2 %v1274_v60  ;;  %v1580_v7 = vsel %vm1577_vm3, %v1579_v53, %v1575_v39  ;;  %v1488_v53 = vand.u32 2147483648, %v4113_v50  ;;  %v1554_v32 = vsub.f32 1.0, %v1553_v4  ;;  %v1271_v60 = vld [vmem:[#allocation2 + $0x98] sm:$0xff]  ;;  %v1480_v39 = vmul.f32 %v4189_v63, %v1479_v45 }
 0x43e   :  { %v1135_v0 = vadd.f32 %v1134_v25, %v1133_v48  ;;  %v1515_v34 = vsel %vm1514_vm5, %v4207_v27, %v1511_v5  ;;  %v1613_v48 = vmul.f32 %v4263_v42, %v4187_v26  ;;  %v1667_v33 = vsub.f32 -0.027762353, %v1580_v7 }
 0x43f   :  { %v1520_v19 = vsel %vm1517_vm6, %v1519_v46, %v1515_v34  ;;  %1296 = vmatpush.msrb.mxu2 %v1273_v56  ;;  %v1623_v5 = vand.u32 2147483648, %v4187_v26  ;;  %v1489_v34 = vor.u32 1.1754944e-38, %v1488_v53  ;;  %vm1558_vm1 = vweird.f32 %v4249_v37 }
 0x440   :  { %v1136_v10 = vrot.slane %v1135_v0, 1  ;;  %v1663_v25 = vsub.f32 -0.027762353, %v1520_v19  ;;  %v1614_v29 = vsub.f32 1.0, %v1613_v48  ;;  %1709 = vrot.lane.b32.xlu1 %v1667_v33, %s3273_s21  ;;  %v1269_v19 = vld [vmem:[#allocation2 + $0x88] sm:$0xff]  ;;  %vm4431_vm2 = vmor %vm1557_vm15, %vm1558_vm1  ;;  %vm1497_vm3 = vweird.f32 %v4125_v17 }
 0x441   :  { %1297 = vmatpush.msrb.mxu2 %v1272_v38  ;;  %v1624_v45 = vor.u32 1.1754944e-38, %v1623_v5  ;;  %vm1498_vm5 = vweird.f32 %v4202_v36  ;;  %vm4492_vm15 = vmor %vm1602_vm7, %vm1603_vm8  ;;  %vm1587_vm8 = vweird.f32 %v4194_v52 }
 0x442   :  { %v1137_v27 = vadd.f32 %v1136_v10, %v1135_v0  ;;  %1701 = vrot.lane.b32.xlu0 %v1663_v25, %s3273_s21  ;;  %v1486_v0 = vand.u32 2147483647, %v4113_v50  ;;  %v1615_v48 = vmul.f32 %v4263_v42, %v1614_v29  ;;  %v1481_v10 = vadd.f32 %v4189_v63, %v1480_v39 }
 0x443   :  { %1298 = vmatpush.msrb.mxu2 %v1271_v60  ;;  %v1555_v29 = vmul.f32 %v4249_v37, %v1554_v32  ;;  %v1268_v60 = vld [vmem:[#allocation2 + $0x80] sm:$0xff] }
 0x444   :  { %v1138_v46 = vmul.f32 %v1137_v27, %v3444_v14  ;;  %vm4404_vm11 = vcmp.eq.f32.partialorder %v1486_v0, 8.507059e+37  ;;  %v1621_v14 = vand.u32 2147483647, %v4187_v26  ;;  %v1616_v4 = vadd.f32 %v4263_v42, %v1615_v48  ;;  %v4418_v27 = vpop.eup %3129 }
 0x445   :  { %1299 = vmatpush.msrb.mxu2 %v1270_v59  ;;  %v1485_v38 = vsel %vm4397_vm9, %v4189_v63, %v1481_v10  ;;  %v1556_v0 = vadd.f32 %v4249_v37, %v1555_v29  ;;  %v4437_v59 = vpop.f32.mrf.mxu1  ;;  %v1501_v10 = vand.u32 2147483647, %v4125_v17 }
 0x446   :  { %v4410_v33 = vadd.f32 1e-05, %v1138_v46  ;;  %vm1622_vm14 = vcmp.eq.f32.partialorder %v1621_v14, 8.507059e+37  ;;  %v1490_v53 = vsel %vm4404_vm11, %v1489_v34, %v1485_v38  ;;  %v1620_v5 = vsel %vm4413_vm13, %v4263_v42, %v1616_v4  ;;  %vm4469_vm11 = vmor %vm1497_vm3, %vm1498_vm5 }
 0x447   :  { %1300 = vmatpush.msrb.mxu2 %v1269_v19  ;;  %v1661_v63 = vsub.f32 -0.027762353, %v1490_v53  ;;  %v1625_v39 = vsel %vm1622_vm14, %v1624_v45, %v1620_v5  ;;  %v1561_v46 = vand.u32 2147483647, %v4166_v13  ;;  %v1563_v34 = vand.u32 2147483648, %v4166_v13 }
 0x448   :  { %3131 = vrsqrt.f32 %v4410_v33  ;;  %v1670_v7 = vsub.f32 -0.027762353, %v1625_v39  ;;  %v1493_v42 = vmul.f32 %v4202_v36, %v4125_v17  ;;  %v1560_v48 = vsel %vm4431_vm2, %v4249_v37, %v1556_v0  ;;  %v4538_v0 = vld [vmem:[#allocation2 + $0x106] ss:$0 sm:$0xff] }
 0x449   :  { %1697 = vrot.lane.b32.xlu2 %v1661_v63, %s3273_s21  ;;  %vm1562_vm4 = vcmp.eq.f32.partialorder %v1561_v46, 8.507059e+37  ;;  %1301 = vmatpush.msrb.mxu2 %v1268_v60  ;;  %v1564_v56 = vor.u32 1.1754944e-38, %v1563_v34  ;;  %v1503_v19 = vand.u32 2147483648, %v4125_v17  ;;  %v1785_v4 = vmul.f32 %v4089_v12, %v4089_v12 }
 0x44a   :  { %1715 = vrot.lane.b32.xlu1 %v1670_v7, %s3273_s21  ;;  %v1494_v14 = vsub.f32 1.0, %v1493_v42  ;;  %vm4453_vm6 = vcmp.eq.f32.partialorder %v1501_v10, 8.507059e+37  ;;  %v1598_v37 = vmul.f32 %v4378_v43, %v4231_v3  ;;  %v1606_v5 = vand.u32 2147483647, %v4231_v3 }
 0x44b   :  { %v1565_v29 = vsel %vm1562_vm4, %v1564_v56, %v1560_v48  ;;  %v1504_v53 = vor.u32 1.1754944e-38, %v1503_v19  ;;  %vm1146_vm9 = vweird.f32 %v4410_v33  ;;  %v1608_v46 = vand.u32 2147483648, %v4231_v3 }
 0x44c   :  { %v1495_v38 = vmul.f32 %v4202_v36, %v1494_v14  ;;  %v1666_v32 = vsub.f32 -0.027762353, %v1565_v29  ;;  %v1599_v63 = vsub.f32 1.0, %v1598_v37  ;;  %vm4474_vm12 = vcmp.eq.f32.partialorder %v1606_v5, 8.507059e+37 }
 0x44d   :  { %v1538_v7 = vmul.f32 %v4226_v55, %v4151_v41  ;;  %vm1542_vm13 = vweird.f32 %v4151_v41  ;;  %vm1543_vm14 = vweird.f32 %v4226_v55  ;;  %v1609_v56 = vor.u32 1.1754944e-38, %v1608_v46  ;;  %v4501_v5 = vpop.f32.mrf.mxu1 }
 0x44e   :  { %v3132_v45 = vpop.eup %3131  ;;  %v1496_v39 = vadd.f32 %v4202_v36, %v1495_v38  ;;  %1707 = vrot.lane.b32.xlu0 %v1666_v32, %s3273_s21  ;;  %v1600_v42 = vmul.f32 %v4378_v43, %v1599_v63  ;;  %v1546_v19 = vand.u32 2147483647, %v4151_v41  ;;  %v1643_v63 = vmul.f32 %v4418_v27, %v4353_v2  ;;  %vm4518_vm2 = vmor %vm1542_vm13, %vm1543_vm14 }
 0x44f   :  { %v1141_v12 = vmul.f32 %v3132_v45, %v4410_v33  ;;  %vm1147_vm10 = vweird.f32 %v3132_v45  ;;  %v1539_v14 = vsub.f32 1.0, %v1538_v7  ;;  %vm1647_vm3 = vweird.f32 %v4353_v2 }
 0x450   :  { %v1500_v48 = vsel %vm4469_vm11, %v4202_v36, %v1496_v39  ;;  %v1601_v38 = vadd.f32 %v4378_v43, %v1600_v42  ;;  %v1548_v36 = vand.u32 2147483648, %v4151_v41  ;;  %vm4505_vm1 = vcmp.eq.f32.partialorder %v1546_v19, 8.507059e+37  ;;  %vm1148_vm5 = vmor %vm1146_vm9, %vm1147_vm10 }
 0x451   :  { %v1142_v34 = vmul.f32 %v3132_v45, %v1141_v12  ;;  %v1505_v29 = vsel %vm4453_vm6, %v1504_v53, %v1500_v48  ;;  %v1540_v32 = vmul.f32 %v4226_v55, %v1539_v14  ;;  %vm1648_vm4 = vweird.f32 %v4418_v27  ;;  %v3214_v14 = vld [vmem:[%s5789_s0 + $0x70] sm:$0xff]  ;;  %s3277_s0 = smov 4  }
 0x452   :  { %v1662_v12 = vsub.f32 -0.027762353, %v1505_v29  ;;  %1817 = vrot.lane.b32.xlu1 %v1785_v4, %s3273_s21  ;;  %v1605_v53 = vsel %vm4492_vm15, %v4378_v43, %v1601_v38  ;;  %v1549_v39 = vor.u32 1.1754944e-38, %v1548_v36  ;;  %v1651_v48 = vand.u32 2147483647, %v4353_v2  ;;  %vm4567_vm7 = vmor %vm1647_vm3, %vm1648_vm4 }
 0x453   :  { %v1143_v37 = vmul.f32 0.5, %v1142_v34  ;;  %v1610_v46 = vsel %vm4474_vm12, %v1609_v56, %v1605_v53  ;;  %v1541_v7 = vadd.f32 %v4226_v55, %v1540_v32  ;;  %v1644_v34 = vsub.f32 1.0, %v1643_v63 }
 0x454   :  { %1699 = vrot.lane.b32.xlu2 %v1662_v12, %s3273_s21  ;;  %v1669_v42 = vsub.f32 -0.027762353, %v1610_v46  ;;  %v1653_v10 = vand.u32 2147483648, %v4353_v2  ;;  %v4533_v19 = vadd.f32 -46.02, %v3214_v14  ;;  %v1583_v29 = vmul.f32 %v4270_v16, %v4194_v52 }
 0x455   :  { %v1144_v25 = vsub.f32 1.5, %v1143_v37  ;;  %v1545_v56 = vsel %vm4518_vm2, %v4226_v55, %v1541_v7  ;;  %v1645_v37 = vmul.f32 %v4418_v27, %v1644_v34  ;;  %vm4551_vm6 = vcmp.eq.f32.partialorder %v1651_v48, 8.507059e+37  ;;  %v4557_v55 = vld [vmem:[#allocation2 + $0x107] ss:$0 sm:$0xff]  ;;  %v4580_v7 = vld [vmem:[#allocation2 + $0x109] ss:$0 sm:$0xff] }
 0x456   :  { %1713 = vrot.lane.b32.xlu0 %v1669_v42, %s3273_s21  ;;  %v1550_v36 = vsel %vm4505_vm1, %v1549_v39, %v1545_v56  ;;  %v1654_v63 = vor.u32 1.1754944e-38, %v1653_v10  ;;  %v1584_v4 = vsub.f32 1.0, %v1583_v29  ;;  %3133 = vrcp.f32 %v4533_v19 }
 0x457   :  { %v1145_v43 = vmul.f32 %v3132_v45, %v1144_v25  ;;  %v1665_v25 = vsub.f32 -0.027762353, %v1550_v36  ;;  %vm1588_vm9 = vweird.f32 %v4270_v16  ;;  %v1591_v29 = vand.u32 2147483647, %v4194_v52 }
 0x458   :  { %vm4605_vm12 = vmor %vm1587_vm8, %vm1588_vm9  ;;  %vm1632_vm15 = vweird.f32 %v4533_v19 }
 0x459   :  { %v4546_v38 = vsel %vm1148_vm5, %v3132_v45, %v1145_v43  ;;  %v1585_v43 = vmul.f32 %v4270_v16, %v1584_v4  ;;  %vm1592_vm13 = vcmp.eq.f32.partialorder %v1591_v29, 8.507059e+37 }
 0x45a   :  { %v1165_v12 = vmul.f32 %v4546_v38, %v4288_v57  ;;  %v1150_v32 = vmul.f32 %v4546_v38, %v4116_v61  ;;  %v1151_v45 = vmul.f32 %v4546_v38, %v4119_v40  ;;  %v1646_v57 = vadd.f32 %v4418_v27, %v1645_v37  ;;  %v4576_v40 = vld [vmem:[#allocation2 + $0x108] ss:$0 sm:$0xff] }
 0x45b   :  { %v1152_v53 = vmul.f32 %v4546_v38, %v4141_v47  ;;  %v4588_v47 = vpop.f32.mrf.mxu1  ;;  %v1586_v37 = vadd.f32 %v4270_v16, %v1585_v43 }
 0x45c   :  { %v1183_v61 = vmul.f32 %v4538_v0, %v1165_v12  ;;  %v1168_v39 = vmul.f32 %v4538_v0, %v1150_v32  ;;  %v1169_v46 = vmul.f32 %v4538_v0, %v1151_v45  ;;  %v1650_v34 = vsel %vm4567_vm7, %v4418_v27, %v1646_v57  ;;  %1705 = vrot.lane.b32.xlu2 %v1665_v25, %s3273_s21  ;;  %v3134_v45 = vpop.eup %3133 }
 0x45d   :  { %v1655_v10 = vsel %vm4551_vm6, %v1654_v63, %v1650_v34  ;;  %v1170_v14 = vmul.f32 %v4538_v0, %v1152_v53  ;;  %v1016_v32 = vadd.f32 %v4580_v7, %v4383_v22  ;;  %v1593_v25 = vand.u32 2147483648, %v4194_v52 }
 0x45e   :  { %v1201_v42 = vadd.f32 %v4557_v55, %v1183_v61  ;;  %v1186_v48 = vadd.f32 %v4557_v55, %v1168_v39  ;;  %v1187_v27 = vadd.f32 %v4557_v55, %v1169_v46  ;;  %v1672_v56 = vsub.f32 -0.027762353, %v1655_v10 }
 0x45f   :  { %v1590_v53 = vsel %vm4605_vm12, %v4270_v16, %v1586_v37  ;;  %v1188_v61 = vadd.f32 %v4557_v55, %v1170_v14  ;;  %v1594_v39 = vor.u32 1.1754944e-38, %v1593_v25  ;;  %v1787_v22 = vmul.f32 %v4099_v1, %v4099_v1 }
 0x460   :  { %vm1217_vm10 = vcmp.gt.f32.partialorder %v1201_v42, 0.0  ;;  %v1235_v36 = vmul.f32 %v4576_v40, %v1201_v42  ;;  %vm1202_vm11 = vcmp.gt.f32.partialorder %v1186_v48, 0.0  ;;  %v1220_v12 = vmul.f32 %v4576_v40, %v1186_v48  ;;  %1719 = vrot.lane.b32.xlu0 %v1672_v56, %s3273_s21 }
 0x461   :  { %v1221_v4 = vmul.f32 %v4576_v40, %v1187_v27  ;;  %vm1203_vm14 = vcmp.gt.f32.partialorder %v1187_v27, 0.0  ;;  %v1153_v46 = vmul.f32 %v4546_v38, %v4158_v15  ;;  %v1628_v34 = vmul.f32 %v3134_v45, %v4533_v19 }
 0x462   :  { %v4612_v60 = vsel %vm1217_vm10, %v1201_v42, %v1235_v36  ;;  %v1236_v63 = vsel %vm1202_vm11, %v1186_v48, %v1220_v12  ;;  %v1595_v43 = vsel %vm1592_vm13, %v1594_v39, %v1590_v53  ;;  %v1638_v16 = vand.u32 2147483648, %v4533_v19 }
 0x463   :  { %v1252_v57 = vadd.f32 %v1236_v63, %v1016_v32  ;;  %v1788_v42 = vmul.f32 %v4107_v6, %v4107_v6  ;;  %v1668_v48 = vsub.f32 -0.027762353, %v1595_v43  ;;  %v1629_v10 = vsub.f32 1.0, %v1628_v34  ;;  %v4630_v56 = vpop.f32.mrf.mxu1 }
 0x464   :  { %vm1633_vm1 = vweird.f32 %v3134_v45  ;;  %v1636_v14 = vand.u32 2147483647, %v4533_v19  ;;  %v1237_v1 = vsel %vm1203_vm14, %v1187_v27, %v1221_v4  ;;  %v1019_v15 = vadd.f32 %v4580_v7, %v4437_v59 }
 0x465   :  { %1302 = vmatmul.f32.vlgmr.msrb.gmra.mxu2 %v1252_v57  ;;  %1823 = vrot.lane.b32.xlu1 %v1788_v42, %s3273_s21  ;;  %v1630_v37 = vmul.f32 %v3134_v45, %v1629_v10  ;;  %v1222_v6 = vmul.f32 %v4576_v40, %v1188_v61  ;;  %vm1634_vm2 = vmor %vm1632_vm15, %vm1633_vm1  ;;  %v1639_v29 = vor.u32 1.1754944e-38, %v1638_v16  ;;  %v1158_v36 = vmul.f32 %v4546_v38, %v4235_v58 }
 0x466   :  { %1711 = vrot.lane.b32.xlu2 %v1668_v48, %s3273_s21  ;;  %v1253_v27 = vadd.f32 %v1237_v1, %v1019_v15  ;;  %v1171_v12 = vmul.f32 %v4538_v0, %v1153_v46  ;;  %vm1637_vm3 = vcmp.eq.f32.partialorder %v1636_v14, 8.507059e+37  ;;  %vm1204_vm4 = vcmp.gt.f32.partialorder %v1188_v61, 0.0 }
 0x467   :  { %v1631_v33 = vadd.f32 %v3134_v45, %v1630_v37  ;;  %v1176_v59 = vmul.f32 %v4538_v0, %v1158_v36  ;;  %v1154_v63 = vmul.f32 %v4546_v38, %v4177_v35  ;;  %v1238_v57 = vsel %vm1204_vm4, %v1188_v61, %v1222_v6 }
 0x468   :  { %1821 = vrot.lane.b32.xlu0 %v1787_v22, %s3273_s21  ;;  %v1189_v53 = vadd.f32 %v4557_v55, %v1171_v12  ;;  %v1790_v58 = vmul.f32 %v4125_v17, %v4125_v17  ;;  %v1022_v39 = vadd.f32 %v4580_v7, %v4501_v5  ;;  %v1025_v46 = vadd.f32 %v4580_v7, %v4588_v47 }
 0x469   :  { %v1635_v32 = vsel %vm1634_vm2, %v3134_v45, %v1631_v33  ;;  %v1194_v22 = vadd.f32 %v4557_v55, %v1176_v59  ;;  %v1172_v35 = vmul.f32 %v4538_v0, %v1154_v63  ;;  %v1159_v45 = vmul.f32 %v4546_v38, %v4239_v28 }
 0x46a   :  { %v1640_v25 = vsel %vm1637_vm3, %v1639_v29, %v1635_v32  ;;  %v1164_v17 = vmul.f32 %v4546_v38, %v4284_v20  ;;  %v1254_v5 = vadd.f32 %v1238_v57, %v1022_v39  ;;  %v1223_v47 = vmul.f32 %v4576_v40, %v1189_v53 }
 0x46b   :  { %v1671_v4 = vsub.f32 -0.027762353, %v1640_v25  ;;  %v4659_v61 = vpop.f32.mrf.mxu1  ;;  %vm1210_vm5 = vcmp.gt.f32.partialorder %v1194_v22, 0.0  ;;  %v1228_v34 = vmul.f32 %v4576_v40, %v1194_v22  ;;  %v1177_v43 = vmul.f32 %v4538_v0, %v1159_v45 }
 0x46c   :  { %v1160_v16 = vmul.f32 %v4546_v38, %v4244_v49  ;;  %v1161_v42 = vmul.f32 %v4546_v38, %v4259_v62  ;;  %vm1205_vm6 = vcmp.gt.f32.partialorder %v1189_v53, 0.0  ;;  %v1786_v28 = vmul.f32 %v4094_v18, %v4094_v18 }
 0x46d   :  { %1305 = vmatmul.f32.gmra.mxu2 %v1253_v27  ;;  %v4672_v48 = vsel %vm1210_vm5, %v1194_v22, %v1228_v34  ;;  %v1162_v20 = vmul.f32 %v4546_v38, %v4274_v24  ;;  %v1190_v10 = vadd.f32 %v4557_v55, %v1172_v35  ;;  %v1155_v14 = vmul.f32 %v4546_v38, %v4198_v51 }
 0x46e   :  { %1717 = vrot.lane.b32.xlu2 %v1671_v4, %s3273_s21  ;;  %v1791_v49 = vmul.f32 %v4131_v31, %v4131_v31  ;;  %v1195_v62 = vadd.f32 %v4557_v55, %v1177_v43  ;;  %v1178_v1 = vmul.f32 %v4538_v0, %v1160_v16  ;;  %v1179_v18 = vmul.f32 %v4538_v0, %v1161_v42 }
 0x46f   :  { %v1180_v15 = vmul.f32 %v4538_v0, %v1162_v20  ;;  %v1163_v24 = vmul.f32 %v4546_v38, %v4280_v54  ;;  %v1239_v37 = vsel %vm1205_vm6, %v1189_v53, %v1223_v47  ;;  %v1182_v6 = vmul.f32 %v4538_v0, %v1164_v17 }
 0x470   :  { %1827 = vrot.lane.b32.xlu0 %v1790_v58, %s3273_s21  ;;  %1829 = vrot.lane.b32.xlu1 %v1791_v49, %s3273_s21  ;;  %vm1211_vm7 = vcmp.gt.f32.partialorder %v1195_v62, 0.0  ;;  %v1229_v51 = vmul.f32 %v4576_v40, %v1195_v62  ;;  %v1196_v31 = vadd.f32 %v4557_v55, %v1178_v1  ;;  %v1197_v29 = vadd.f32 %v4557_v55, %v1179_v18 }
 0x471   :  { %v1198_v36 = vadd.f32 %v4557_v55, %v1180_v15  ;;  %v1181_v27 = vmul.f32 %v4538_v0, %v1163_v24  ;;  %v1173_v54 = vmul.f32 %v4538_v0, %v1155_v14  ;;  %v1200_v33 = vadd.f32 %v4557_v55, %v1182_v6 }
 0x472   :  { %v4696_v12 = vsel %vm1211_vm7, %v1195_v62, %v1229_v51  ;;  %v1255_v59 = vadd.f32 %v1239_v37, %v1025_v46  ;;  %vm1212_vm8 = vcmp.gt.f32.partialorder %v1196_v31, 0.0  ;;  %v1230_v32 = vmul.f32 %v4576_v40, %v1196_v31 }
 0x473   :  { %vm1213_vm9 = vcmp.gt.f32.partialorder %v1197_v29, 0.0  ;;  %v1231_v63 = vmul.f32 %v4576_v40, %v1197_v29  ;;  %vm1214_vm10 = vcmp.gt.f32.partialorder %v1198_v36, 0.0  ;;  %v1232_v25 = vmul.f32 %v4576_v40, %v1198_v36  ;;  %v1033_v53 = vpop.f32.mrf.mxu1 }
 0x474   :  { %v1199_v57 = vadd.f32 %v4557_v55, %v1181_v27  ;;  %v1224_v4 = vmul.f32 %v4576_v40, %v1190_v10  ;;  %v4704_v58 = vsel %vm1212_vm8, %v1196_v31, %v1230_v32  ;;  %vm1216_vm11 = vcmp.gt.f32.partialorder %v1200_v33, 0.0 }
 0x475   :  { %1308 = vmatmul.f32.gmra.mxu2 %v1254_v5  ;;  %v1234_v39 = vmul.f32 %v4576_v40, %v1200_v33  ;;  %vm1206_vm12 = vcmp.gt.f32.partialorder %v1190_v10, 0.0  ;;  %v1789_v22 = vmul.f32 %v4113_v50, %v4113_v50  ;;  %v4709_v46 = vsel %vm1213_vm9, %v1197_v29, %v1231_v63 }
 0x476   :  { %1819 = vrot.lane.b32.xlu2 %v1786_v28, %s3273_s21  ;;  %v4711_v35 = vsel %vm1214_vm10, %v1198_v36, %v1232_v25  ;;  %vm1215_vm13 = vcmp.gt.f32.partialorder %v1199_v57, 0.0  ;;  %v1233_v45 = vmul.f32 %v4576_v40, %v1199_v57  ;;  %v1240_v5 = vsel %vm1206_vm12, %v1190_v10, %v1224_v4 }
 0x477   :  { %v4714_v17 = vsel %vm1216_vm11, %v1200_v33, %v1234_v39  ;;  %v1191_v34 = vadd.f32 %v4557_v55, %v1173_v54  ;;  %v1156_v47 = vmul.f32 %v4546_v38, %v4212_v23  ;;  %v1028_v50 = vadd.f32 %v4580_v7, %v4630_v56 }
 0x478   :  { %v4719_v43 = vsel %vm1215_vm13, %v1199_v57, %v1233_v45  ;;  %v1793_v20 = vmul.f32 %v4151_v41, %v4151_v41  ;;  %v1157_v56 = vmul.f32 %v4546_v38, %v4222_v44  ;;  %v1031_v49 = vadd.f32 %v4580_v7, %v4659_v61 }
 0x479   :  { %v1256_v16 = vadd.f32 %v1240_v5, %v1028_v50  ;;  %v1225_v42 = vmul.f32 %v4576_v40, %v1191_v34  ;;  %v1174_v28 = vmul.f32 %v4538_v0, %v1156_v47  ;;  %vm1207_vm14 = vcmp.gt.f32.partialorder %v1191_v34, 0.0 }
 0x47a   :  { %1833 = vrot.lane.b32.xlu0 %v1793_v20, %s3273_s21  ;;  %v1175_v18 = vmul.f32 %v4538_v0, %v1157_v56  ;;  %v1794_v41 = vmul.f32 %v4166_v13, %v4166_v13  ;;  %v1034_v44 = vadd.f32 %v4580_v7, %v1033_v53  ;;  %v1792_v0 = vmul.f32 %v4137_v11, %v4137_v11 }
 0x47b   :  { %v1036_v10 = vpop.f32.mrf.mxu1  ;;  %v1241_v23 = vsel %vm1207_vm14, %v1191_v34, %v1225_v42  ;;  %v1192_v14 = vadd.f32 %v4557_v55, %v1174_v28  ;;  %v1797_v11 = vmul.f32 %v4231_v3, %v4231_v3  ;;  %v1800_v3 = vmul.f32 %v4353_v2, %v4353_v2 }
 0x47c   :  { %v1257_v62 = vadd.f32 %v1241_v23, %v1031_v49  ;;  %1835 = vrot.lane.b32.xlu1 %v1794_v41, %s3273_s21  ;;  %v1193_v37 = vadd.f32 %v4557_v55, %v1175_v18  ;;  %v1037_v13 = vadd.f32 %v4580_v7, %v1036_v10  ;;  %v1796_v55 = vmul.f32 %v4194_v52, %v4194_v52  ;;  %v4811_v18 = vld [vmem:[#allocation2 + $0x10a] ss:$0 sm:$0xff]  ;;  %v4813_v41 = vld [vmem:[#allocation2 + $0x10b] ss:$0 sm:$0xff] }
 0x47d   :  { %1311 = vmatmul.f32.gmra.mxu2 %v1255_v59  ;;  %v1226_v1 = vmul.f32 %v4576_v40, %v1192_v14  ;;  %vm1208_vm15 = vcmp.gt.f32.partialorder %v1192_v14, 0.0  ;;  %v1795_v52 = vmul.f32 %v4173_v8, %v4173_v8  ;;  %v1798_v2 = vmul.f32 %v4187_v26, %v4187_v26 }
 0x47e   :  { %1825 = vrot.lane.b32.xlu2 %v1789_v22, %s3273_s21  ;;  %v1227_v61 = vmul.f32 %v4576_v40, %v1193_v37  ;;  %vm1209_vm1 = vcmp.gt.f32.partialorder %v1193_v37, 0.0  ;;  %v5811_v50 = vmov 3   ;;  %v5809_v10 = vmov 1  }
 0x47f   :  { %v1242_v24 = vsel %vm1208_vm15, %v1192_v14, %v1226_v1  ;;  %3017 = vset.pattern.permute.xlu0 %v5811_v50  ;;  %3019 = vset.pattern.permute.xlu1 %v5809_v10 }
 0x480   :  { %v1258_v38 = vadd.f32 %v1242_v24, %v1034_v44  ;;  %v1243_v51 = vsel %vm1209_vm1, %v1193_v37, %v1227_v61 }
 0x481   :  { %v1259_v31 = vadd.f32 %v1243_v51, %v1037_v13 }
 0x482   :  { %1839 = vrot.lane.b32.xlu0 %v1796_v55, %s3273_s21 }
 0x483   :  { %v1039_v15 = vpop.f32.mrf.mxu1 }
 0x484   :  { %v1040_v40 = vadd.f32 %v4580_v7, %v1039_v15  ;;  %1841 = vrot.lane.b32.xlu1 %v1797_v11, %s3273_s21 }
 0x485   :  { %1314 = vmatmul.f32.gmra.mxu2 %v1256_v16 }
 0x486   :  { %1831 = vrot.lane.b32.xlu2 %v1792_v0, %s3273_s21  ;;  %v1260_v29 = vadd.f32 %v4672_v48, %v1040_v40 }
 0x48b   :  { %v1042_v6 = vpop.f32.mrf.mxu1 }
 0x48c   :  { %v1043_v27 = vadd.f32 %v4580_v7, %v1042_v6  ;;  %1847 = vrot.lane.b32.xlu1 %v1800_v3, %s3273_s21  ;;  %v5807_v3 = vmov 2  }
 0x48d   :  { %1317 = vmatmul.f32.gmra.mxu2 %v1257_v62 }
 0x48e   :  { %v1261_v54 = vadd.f32 %v4696_v12, %v1043_v27  ;;  %1837 = vrot.lane.b32.xlu2 %v1795_v52, %s3273_s21  ;;  %v1799_v12 = vmul.f32 %v4533_v19, %v4533_v19 }
 0x490   :  { %1845 = vrot.lane.b32.xlu0 %v1799_v12, %s3273_s21 }
 0x493   :  { %v1045_v36 = vpop.f32.mrf.mxu1 }
 0x494   :  { %v1046_v48 = vadd.f32 %v4580_v7, %v1045_v36 }
 0x495   :  { %1320 = vmatmul.f32.gmra.mxu2 %v1258_v38 }
 0x496   :  { %v1262_v32 = vadd.f32 %v4704_v58, %v1046_v48  ;;  %1843 = vrot.lane.b32.xlu2 %v1798_v2, %s3273_s21 }
 0x498   :  { %v4760_v59 = vpop.permute.xlu1 %1693 }
 0x49b   :  { %v1048_v33 = vpop.f32.mrf.mxu1 }
 0x49c   :  { %v1049_v63 = vadd.f32 %v4580_v7, %v1048_v33 }
 0x49d   :  { %1323 = vmatmul.f32.gmra.mxu2 %v1259_v31 }
 0x49e   :  { %v1263_v53 = vadd.f32 %v4709_v46, %v1049_v63 }
 0x4a0   :  { %v4772_v57 = vpop.permute.xlu1 %1695 }
 0x4a3   :  { %v1051_v8 = vpop.f32.mrf.mxu1  ;;  %v4770_v25 = vpop.permute.xlu2 %1697 }
 0x4a4   :  { %v1052_v19 = vadd.f32 %v4580_v7, %v1051_v8  ;;  %v4779_v4 = vpop.permute.xlu0 %1689 }
 0x4a5   :  { %1326 = vmatmul.f32.gmra.mxu2 %v1260_v29 }
 0x4a6   :  { %v1264_v22 = vadd.f32 %v4711_v35, %v1052_v19 }
 0x4aa   :  { %v4784_v45 = vpop.permute.xlu1 %1703 }
 0x4ab   :  { %v1054_v58 = vpop.f32.mrf.mxu1 }
 0x4ac   :  { %v1055_v46 = vadd.f32 %v4580_v7, %v1054_v58  ;;  %v4787_v5 = vpop.permute.xlu0 %1691 }
 0x4ad   :  { %1329 = vmatmul.f32.gmra.mxu2 %v1261_v54 }
 0x4ae   :  { %v4781_v39 = vpop.permute.xlu2 %1699  ;;  %v1265_v26 = vadd.f32 %v4719_v43, %v1055_v46  ;;  %v5805_v43 = vmov 4  }
 0x4af   :  { %3016 = vset.pattern.permute.xlu2 %v5805_v43 }
 0x4b2   :  { %v4793_v16 = vpop.permute.xlu1 %1709 }
 0x4b3   :  { %v1057_v34 = vpop.f32.mrf.mxu1 }
 0x4b4   :  { %v1058_v35 = vadd.f32 %v4580_v7, %v1057_v34  ;;  %v4797_v28 = vpop.permute.xlu0 %1701 }
 0x4b5   :  { %1332 = vmatmul.f32.gmra.mxu2 %v1262_v32 }
 0x4b6   :  { %v4790_v47 = vpop.permute.xlu2 %1705  ;;  %v1266_v42 = vadd.f32 %v4714_v17, %v1058_v35 }
 0x4bb   :  { %v1060_v20 = vpop.f32.mrf.mxu1 }
 0x4bc   :  { %v1061_v14 = vadd.f32 %v4580_v7, %v1060_v20  ;;  %v4804_v56 = vpop.permute.xlu1 %1715 }
 0x4bd   :  { %1335 = vmatmul.f32.gmra.mxu2 %v1263_v53 }
 0x4be   :  { %v1267_v49 = vadd.f32 %v4612_v60, %v1061_v14 }
 0x4c0   :  { %v4801_v23 = vpop.permute.xlu2 %1711  ;;  %v4807_v17 = vpop.permute.xlu0 %1707 }
 0x4c4   :  { %v1818_v1 = vpop.permute.xlu1 %1817 }
 0x4c5   :  { %1338 = vmatmul.f32.gmra.mxu2 %v1264_v22  ;;  %3135 = vrcp.f32 %v1818_v1  ;;  %vm1870_vm4 = vweird.f32 %v1818_v1  ;;  %v1876_v11 = vand.u32 2147483648, %v1818_v1  ;;  %v1874_v52 = vand.u32 2147483647, %v1818_v1 }
 0x4c7   :  { %v1877_v12 = vor.u32 1.1754944e-38, %v1876_v11  ;;  %vm1875_vm7 = vcmp.eq.f32.partialorder %v1874_v52, 8.507059e+37 }
 0x4c8   :  { %v4809_v62 = vpop.permute.xlu2 %1717  ;;  %v4815_v24 = vpop.permute.xlu0 %1713 }
 0x4cb   :  { %v3136_v44 = vpop.eup %3135 }
 0x4cc   :  { %v1866_v61 = vmul.f32 %v3136_v44, %v1818_v1  ;;  %vm1871_vm5 = vweird.f32 %v3136_v44 }
 0x4cd   :  { %1341 = vmatmul.f32.gmra.mxu2 %v1265_v26  ;;  %vm4841_vm6 = vmor %vm1870_vm4, %vm1871_vm5 }
 0x4ce   :  { %v1867_v13 = vsub.f32 1.0, %v1866_v61 }
 0x4d0   :  { %v4818_v37 = vpop.permute.xlu2 %1819  ;;  %v1868_v36 = vmul.f32 %v3136_v44, %v1867_v13 }
 0x4d1   :  { %3137 = vrcp.f32 %v4818_v37  ;;  %vm1885_vm8 = vweird.f32 %v4818_v37  ;;  %v1891_v19 = vand.u32 2147483648, %v4818_v37  ;;  %v1889_v46 = vand.u32 2147483647, %v4818_v37 }
 0x4d2   :  { %v4830_v6 = vpop.permute.xlu0 %1719  ;;  %v1869_v54 = vadd.f32 %v3136_v44, %v1868_v36 }
 0x4d3   :  { %vm1890_vm12 = vcmp.eq.f32.partialorder %v1889_v46, 8.507059e+37 }
 0x4d4   :  { %v1873_v63 = vsel %vm4841_vm6, %v3136_v44, %v1869_v54 }
 0x4d5   :  { %1344 = vmatmul.f32.gmra.mxu2 %v1266_v42  ;;  %v1878_v2 = vsel %vm1875_vm7, %v1877_v12, %v1873_v63  ;;  %v1892_v42 = vor.u32 1.1754944e-38, %v1891_v19 }
 0x4d7   :  { %v3138_v55 = vpop.eup %3137 }
 0x4d8   :  { %v1881_v29 = vmul.f32 %v3138_v55, %v4818_v37  ;;  %vm1886_vm9 = vweird.f32 %v3138_v55  ;;  %v1826_v36 = vpop.permute.xlu2 %1825 }
 0x4d9   :  { %vm4857_vm11 = vmor %vm1885_vm8, %vm1886_vm9  ;;  %vm1930_vm4 = vweird.f32 %v1826_v36 }
 0x4da   :  { %v1882_v27 = vsub.f32 1.0, %v1881_v29  ;;  %v1822_v32 = vpop.permute.xlu0 %1821 }
 0x4db   :  { %3139 = vrcp.f32 %v1822_v32  ;;  %vm1900_vm13 = vweird.f32 %v1822_v32 }
 0x4dc   :  { %v1883_v53 = vmul.f32 %v3138_v55, %v1882_v27  ;;  %v1824_v27 = vpop.permute.xlu1 %1823 }
 0x4dd   :  { %1347 = vmatmul.f32.gmra.mxu2 %v1267_v49  ;;  %vm1915_vm6 = vweird.f32 %v1824_v27 }
 0x4de   :  { %v1884_v22 = vadd.f32 %v3138_v55, %v1883_v53 }
 0x4e0   :  { %v1888_v14 = vsel %vm4857_vm11, %v3138_v55, %v1884_v22 }
 0x4e1   :  { %v3140_v35 = vpop.eup %3139 }
 0x4e2   :  { %v1896_v1 = vmul.f32 %v3140_v35, %v1822_v32  ;;  %vm1901_vm14 = vweird.f32 %v3140_v35 }
 0x4e3   :  { %vm1902_vm15 = vmor %vm1900_vm13, %vm1901_vm14 }
 0x4e4   :  { %v1897_v37 = vsub.f32 1.0, %v1896_v1  ;;  %v1934_v1 = vand.u32 2147483647, %v1826_v36 }
 0x4e6   :  { %v1898_v44 = vmul.f32 %v3140_v35, %v1897_v37 }
 0x4e8   :  { %v1303_v15 = vpop.f32.mrf.mxu2  ;;  %v1899_v61 = vadd.f32 %v3140_v35, %v1898_v44 }
 0x4e9   :  { %v1304_v7 = vadd.f32 %v4811_v18, %v1303_v15  ;;  %v1893_v15 = vsel %vm1890_vm12, %v1892_v42, %v1888_v14  ;;  %v1936_v14 = vand.u32 2147483648, %v1826_v36 }
 0x4ea   :  { %v1903_v55 = vsel %vm1902_vm15, %v3140_v35, %v1899_v61  ;;  %v4909_v35 = vpop.permute.xlu2 %1831 }
 0x4eb   :  { %vm1351_vm2 = vcmp.gt.f32.partialorder %v1304_v7, 0.0  ;;  %v1369_v60 = vmul.f32 %v4813_v41, %v1304_v7  ;;  %v1937_v44 = vor.u32 1.1754944e-38, %v1936_v14 }
 0x4ed   :  { %v4821_v38 = vsel %vm1351_vm2, %v1304_v7, %v1369_v60 }
 0x4ee   :  { %2593 = vperm.xlu0 %3017, %v4821_v38   ;;  %2345 = vrot.lane.b32.xlu2 %v4821_v38, %s3277_s0  ;;  %v1879_v34 = vmul.f32 %v1878_v2, %v4821_v38  ;;  %v1737_v49 = vmul.f32 %v4779_v4, %v4821_v38  ;;  %v1906_v4 = vand.u32 2147483648, %v1822_v32 }
 0x4ef   :  { %2281 = vrot.lane.b32.xlu1 %v4821_v38, %s3278_s26 }
 0x4f0   :  { %v1306_v0 = vpop.f32.mrf.mxu2  ;;  %v1753_v7 = vmul.f32 1.442695, %v1737_v49  ;;  %v1907_v13 = vor.u32 1.1754944e-38, %v1906_v4 }
 0x4f1   :  { %v1307_v51 = vadd.f32 %v4811_v18, %v1306_v0  ;;  %v1904_v0 = vand.u32 2147483647, %v1822_v32 }
 0x4f2   :  { %3141 = vpow2.f32 %v1753_v7  ;;  %v1921_v7 = vand.u32 2147483648, %v1824_v27  ;;  %v4922_v61 = vpop.permute.xlu2 %1837 }
 0x4f3   :  { %vm1352_vm3 = vcmp.gt.f32.partialorder %v1307_v51, 0.0  ;;  %v1370_v31 = vmul.f32 %v4813_v41, %v1307_v51  ;;  %vm1905_vm1 = vcmp.eq.f32.partialorder %v1904_v0, 8.507059e+37  ;;  %3143 = vrcp.f32 %v1826_v36 }
 0x4f4   :  { %v1908_v11 = vsel %vm1905_vm1, %v1907_v13, %v1903_v55  ;;  %3145 = vrcp.f32 %v1824_v27  ;;  %v1922_v0 = vor.u32 1.1754944e-38, %v1921_v7 }
 0x4f5   :  { %v4833_v40 = vsel %vm1352_vm3, %v1307_v51, %v1370_v31 }
 0x4f6   :  { %2347 = vrot.lane.b32.xlu0 %v4833_v40, %s3277_s0  ;;  %2513 = vperm.xlu2 %3016, %v4821_v38   ;;  %v1894_v60 = vmul.f32 %v1893_v15, %v4833_v40  ;;  %v1738_v29 = vmul.f32 %v4787_v5, %v4833_v40 }
 0x4f7   :  { %2753 = vperm.xlu1 %3019, %v4821_v38   ;;  %3020 = vset.pattern.permute.xlu0 %v5805_v43 }
 0x4f8   :  { %v1309_v33 = vpop.f32.mrf.mxu2  ;;  %v3142_v51 = vpop.eup %3141  ;;  %v1755_v54 = vmul.f32 1.442695, %v1738_v29 }
 0x4f9   :  { %v1310_v8 = vadd.f32 %v4811_v18, %v1309_v33  ;;  %v3144_v32 = vpop.eup %3143 }
 0x4fa   :  { %3147 = vpow2.f32 %v1755_v54  ;;  %v3146_v12 = vpop.eup %3145  ;;  %v1926_v63 = vmul.f32 %v3144_v32, %v1826_v36  ;;  %vm1931_vm5 = vweird.f32 %v3144_v32 }
 0x4fb   :  { %v1371_v58 = vmul.f32 %v4813_v41, %v1310_v8  ;;  %vm1353_vm10 = vcmp.gt.f32.partialorder %v1310_v8, 0.0  ;;  %v1911_v19 = vmul.f32 %v3146_v12, %v1824_v27  ;;  %vm1916_vm7 = vweird.f32 %v3146_v12  ;;  %vm4915_vm8 = vmor %vm1930_vm4, %vm1931_vm5 }
 0x4fc   :  { %v1927_v22 = vsub.f32 1.0, %v1926_v63  ;;  %vm1917_vm9 = vmor %vm1915_vm6, %vm1916_vm7  ;;  %vm1975_vm4 = vweird.f32 %v4909_v35 }
 0x4fd   :  { %v4863_v20 = vsel %vm1353_vm10, %v1310_v8, %v1371_v58  ;;  %v1912_v46 = vsub.f32 1.0, %v1911_v19  ;;  %vm1935_vm10 = vcmp.eq.f32.partialorder %v1934_v1, 8.507059e+37 }
 0x4fe   :  { %2517 = vperm.xlu0 %3020, %v4833_v40   ;;  %3018 = vset.pattern.permute.xlu2 %v5807_v3  ;;  %v1909_v33 = vmul.f32 %v1908_v11, %v4863_v20  ;;  %v1739_v55 = vmul.f32 %v4760_v59, %v4863_v20 }
 0x4ff   :  { %3021 = vset.pattern.permute.xlu1 %v5811_v50  ;;  %2673 = vperm.xlu2 %3018, %v4821_v38   ;;  %v1913_v42 = vmul.f32 %v3146_v12, %v1912_v46 }
 0x500   :  { %2597 = vperm.xlu1 %3021, %v4833_v40   ;;  %v1312_v31 = vpop.f32.mrf.mxu2  ;;  %v3148_v2 = vpop.eup %3147 }
 0x501   :  { %v1313_v52 = vadd.f32 %v4811_v18, %v1312_v31  ;;  %v1914_v37 = vadd.f32 %v3146_v12, %v1913_v42 }
 0x503   :  { %v1372_v5 = vmul.f32 %v4813_v41, %v1313_v52  ;;  %vm1354_vm2 = vcmp.gt.f32.partialorder %v1313_v52, 0.0  ;;  %v1918_v13 = vsel %vm1917_vm9, %v3146_v12, %v1914_v37 }
 0x505   :  { %v4897_v53 = vsel %vm1354_vm2, %v1313_v52, %v1372_v5  ;;  %v4936_v52 = vpop.permute.xlu2 %1843 }
 0x506   :  { %3022 = vset.pattern.permute.xlu0 %v5807_v3 }
 0x507   :  { %2677 = vperm.xlu0 %3022, %v4833_v40   ;;  %2121 = vrot.lane.b32.xlu2 %v1879_v34, %s3280_s27  ;;  %v1928_v34 = vmul.f32 %v3144_v32, %v1927_v22 }
 0x508   :  { %2349 = vrot.lane.b32.xlu1 %v4863_v20, %s3277_s0  ;;  %3023 = vset.pattern.permute.xlu2 %v5809_v10  ;;  %v1315_v48 = vpop.f32.mrf.mxu2 }
 0x509   :  { %3024 = vset.pattern.permute.xlu1 %v5805_v43  ;;  %v1316_v8 = vadd.f32 %v4811_v18, %v1315_v48  ;;  %v1929_v49 = vadd.f32 %v3144_v32, %v1928_v34 }
 0x50b   :  { %v1373_v58 = vmul.f32 %v4813_v41, %v1316_v8  ;;  %vm1355_vm3 = vcmp.gt.f32.partialorder %v1316_v8, 0.0  ;;  %v1933_v4 = vsel %vm4915_vm8, %v3144_v32, %v1929_v49 }
 0x50c   :  { %v1938_v31 = vsel %vm1935_vm10, %v1937_v44, %v1933_v4 }
 0x50d   :  { %v4905_v26 = vsel %vm1355_vm3, %v1316_v8, %v1373_v58 }
 0x50e   :  { %v1939_v11 = vmul.f32 %v1938_v31, %v4905_v26 }
 0x50f   :  { %2123 = vrot.lane.b32.xlu0 %v1894_v60, %s3280_s27  ;;  %2283 = vrot.lane.b32.xlu2 %v4833_v40, %s3278_s26  ;;  %v1919_v60 = vand.u32 2147483647, %v1824_v27  ;;  %v1757_v27 = vmul.f32 1.442695, %v1739_v55 }
 0x510   :  { %2521 = vperm.xlu1 %3024, %v4863_v20   ;;  %3027 = vset.pattern.permute.xlu0 %v5809_v10  ;;  %v1318_v59 = vpop.f32.mrf.mxu2 }
 0x511   :  { %vm1920_vm11 = vcmp.eq.f32.partialorder %v1919_v60, 8.507059e+37  ;;  %v1319_v48 = vadd.f32 %v4811_v18, %v1318_v59 }
 0x512   :  { %v1923_v29 = vsel %vm1920_vm11, %v1922_v0, %v1918_v13 }
 0x513   :  { %v1924_v54 = vmul.f32 %v1923_v29, %v4897_v53  ;;  %vm1356_vm12 = vcmp.gt.f32.partialorder %v1319_v48, 0.0 }
 0x517   :  { %2757 = vperm.xlu2 %3023, %v4833_v40   ;;  %2201 = vrot.lane.b32.xlu0 %v3142_v51, %s3280_s27  ;;  %v1740_v51 = vmul.f32 %v4772_v57, %v4897_v53  ;;  %v4934_v57 = vpop.permute.xlu0 %1827 }
 0x518   :  { %3026 = vset.pattern.permute.xlu1 %v5807_v3  ;;  %v1321_v42 = vpop.f32.mrf.mxu2  ;;  %vm1945_vm14 = vweird.f32 %v4934_v57  ;;  %v1951_v0 = vand.u32 2147483648, %v4934_v57  ;;  %v1949_v29 = vand.u32 2147483647, %v4934_v57 }
 0x519   :  { %2681 = vperm.xlu1 %3026, %v4863_v20   ;;  %v1759_v36 = vmul.f32 1.442695, %v1740_v51  ;;  %v1322_v49 = vadd.f32 %v4811_v18, %v1321_v42 }
 0x51a   :  { %vm1950_vm3 = vcmp.eq.f32.partialorder %v1949_v29, 8.507059e+37 }
 0x51b   :  { %3149 = vpow2.f32 %v1759_v36  ;;  %v1375_v60 = vmul.f32 %v4813_v41, %v1322_v49  ;;  %vm1357_vm13 = vcmp.gt.f32.partialorder %v1322_v49, 0.0 }
 0x51c   :  { %3151 = vpow2.f32 %v1757_v27  ;;  %v1952_v27 = vor.u32 1.1754944e-38, %v1951_v0 }
 0x51d   :  { %3153 = vrcp.f32 %v4934_v57  ;;  %v4987_v51 = vsel %vm1357_vm13, %v1322_v49, %v1375_v60 }
 0x51e   :  { %3155 = vrcp.f32 %v4909_v35 }
 0x51f   :  { %3025 = vset.pattern.permute.xlu2 %v5811_v50  ;;  %2285 = vrot.lane.b32.xlu0 %v4863_v20, %s3278_s26  ;;  %v4947_v12 = vpop.permute.xlu0 %1833 }
 0x520   :  { %2601 = vperm.xlu2 %3025, %v4863_v20   ;;  %v1324_v4 = vpop.f32.mrf.mxu2 }
 0x521   :  { %2125 = vrot.lane.b32.xlu1 %v1909_v33, %s3280_s27  ;;  %v4939_v33 = vpop.permute.xlu1 %1829  ;;  %v3150_v5 = vpop.eup %3149  ;;  %v1325_v13 = vadd.f32 %v4811_v18, %v1324_v4 }
 0x522   :  { %3029 = vset.pattern.permute.xlu1 %v5811_v50  ;;  %v3152_v32 = vpop.eup %3151  ;;  %3157 = vrcp.f32 %v4939_v33  ;;  %vm1960_vm8 = vweird.f32 %v4939_v33 }
 0x523   :  { %v3154_v46 = vpop.eup %3153  ;;  %vm1358_vm2 = vcmp.gt.f32.partialorder %v1325_v13, 0.0 }
 0x524   :  { %v1941_v14 = vmul.f32 %v3154_v46, %v4934_v57  ;;  %vm1946_vm15 = vweird.f32 %v3154_v46  ;;  %v1741_v57 = vmul.f32 %v4770_v25, %v4905_v26 }
 0x525   :  { %vm1947_vm1 = vmor %vm1945_vm14, %vm1946_vm15  ;;  %vm1990_vm14 = vweird.f32 %v4947_v12 }
 0x526   :  { %v1942_v1 = vsub.f32 1.0, %v1941_v14 }
 0x527   :  { %2761 = vperm.xlu0 %3027, %v4863_v20   ;;  %v4962_v58 = vpop.permute.xlu0 %1839 }
 0x528   :  { %2351 = vrot.lane.b32.xlu2 %v4897_v53, %s3277_s0  ;;  %v1943_v44 = vmul.f32 %v3154_v46, %v1942_v1 }
 0x529   :  { %2203 = vrot.lane.b32.xlu1 %v3148_v2, %s3280_s27  ;;  %3028 = vset.pattern.permute.xlu2 %v5805_v43  ;;  %v4951_v63 = vpop.permute.xlu1 %1835  ;;  %v1374_v2 = vmul.f32 %v4813_v41, %v1319_v48 }
 0x52a   :  { %v1944_v55 = vadd.f32 %v3154_v46, %v1943_v44 }
 0x52b   :  { %v4958_v19 = vsel %vm1356_vm12, %v1319_v48, %v1374_v2 }
 0x52c   :  { %v1948_v59 = vsel %vm1947_vm1, %v3154_v46, %v1944_v55  ;;  %v1761_v46 = vmul.f32 1.442695, %v1741_v57 }
 0x52e   :  { %3159 = vpow2.f32 %v1761_v46 }
 0x52f   :  { %2353 = vrot.lane.b32.xlu0 %v4905_v26, %s3277_s0  ;;  %v4976_v15 = vpop.permute.xlu0 %1845 }
 0x530   :  { %2525 = vperm.xlu2 %3028, %v4897_v53   ;;  %3032 = vset.pattern.permute.xlu0 %v5805_v43 }
 0x531   :  { %2287 = vrot.lane.b32.xlu1 %v4897_v53, %s3278_s26  ;;  %v4966_v34 = vpop.permute.xlu1 %1841 }
 0x537   :  { %2529 = vperm.xlu0 %3032, %v4905_v26  }
 0x538   :  { %3030 = vset.pattern.permute.xlu2 %v5807_v3 }
 0x539   :  { %2605 = vperm.xlu1 %3029, %v4897_v53   ;;  %2685 = vperm.xlu2 %3030, %v4897_v53   ;;  %v4978_v7 = vpop.permute.xlu1 %1847 }
 0x53f   :  { %2129 = vrot.lane.b32.xlu0 %v1939_v11, %s3280_s27 }
 0x540   :  { %3037 = vset.pattern.permute.xlu0 %v5811_v50 }
 0x541   :  { %3031 = vset.pattern.permute.xlu1 %v5809_v10  ;;  %2127 = vrot.lane.b32.xlu2 %v1924_v54, %s3280_s27  ;;  %v1376_v54 = vmul.f32 %v4813_v41, %v1325_v13 }
 0x542   :  { %2765 = vperm.xlu1 %3031, %v4897_v53   ;;  %3033 = vset.pattern.permute.xlu2 %v5811_v50 }
 0x543   :  { %v5007_v48 = vsel %vm1358_vm2, %v1325_v13, %v1376_v54 }
 0x547   :  { %2207 = vrot.lane.b32.xlu0 %v3150_v5, %s3280_s27  ;;  %v3156_v5 = vpop.eup %3155 }
 0x548   :  { %v4949_v8 = vpop.permute.xlu2 %2345  ;;  %v1971_v42 = vmul.f32 %v3156_v5, %v4909_v35  ;;  %v3158_v44 = vpop.eup %3157  ;;  %vm1976_vm5 = vweird.f32 %v3156_v5 }
 0x549   :  { %2205 = vrot.lane.b32.xlu2 %v3152_v32, %s3280_s27  ;;  %v1953_v32 = vsel %vm1950_vm3, %v1952_v27, %v1948_v59  ;;  %v3160_v55 = vpop.eup %3159  ;;  %v1956_v29 = vmul.f32 %v3158_v44, %v4939_v33  ;;  %v1981_v27 = vand.u32 2147483648, %v4909_v35  ;;  %v1979_v59 = vand.u32 2147483647, %v4909_v35  ;;  %vm1977_vm6 = vmor %vm1975_vm4, %vm1976_vm5 }
 0x54a   :  { %3034 = vset.pattern.permute.xlu1 %v5807_v3  ;;  %v1954_v25 = vmul.f32 %v1953_v32, %v4958_v19  ;;  %v1972_v1 = vsub.f32 1.0, %v1971_v42  ;;  %vm1961_vm9 = vweird.f32 %v3158_v44  ;;  %vm2020_vm4 = vweird.f32 %v4922_v61 }
 0x54b   :  { %2689 = vperm.xlu1 %3034, %v4905_v26   ;;  %v1957_v57 = vsub.f32 1.0, %v1956_v29  ;;  %v1982_v32 = vor.u32 1.1754944e-38, %v1981_v27  ;;  %vm1980_vm7 = vcmp.eq.f32.partialorder %v1979_v59, 8.507059e+37  ;;  %v1966_v27 = vand.u32 2147483648, %v4939_v33  ;;  %vm1962_vm10 = vmor %vm1960_vm8, %vm1961_vm9 }
 0x54c   :  { %v1973_v0 = vmul.f32 %v3156_v5, %v1972_v1  ;;  %v1964_v59 = vand.u32 2147483647, %v4939_v33  ;;  %v1327_v33 = vpop.f32.mrf.mxu2  ;;  %vm2005_vm8 = vweird.f32 %v4951_v63 }
 0x54e   :  { %v1974_v54 = vadd.f32 %v3156_v5, %v1973_v0  ;;  %v1743_v0 = vmul.f32 %v4797_v28, %v4987_v51  ;;  %vm1965_vm11 = vcmp.eq.f32.partialorder %v1964_v59, 8.507059e+37 }
 0x54f   :  { %2291 = vrot.lane.b32.xlu0 %v4958_v19, %s3278_s26 }
 0x550   :  { %v4964_v22 = vpop.permute.xlu2 %2513  ;;  %v1978_v46 = vsel %vm1977_vm6, %v3156_v5, %v1974_v54  ;;  %v1765_v29 = vmul.f32 1.442695, %v1743_v0 }
 0x551   :  { %2289 = vrot.lane.b32.xlu2 %v4905_v26, %s3278_s26  ;;  %v1983_v35 = vsel %vm1980_vm7, %v1982_v32, %v1978_v46  ;;  %v1742_v46 = vmul.f32 %v4781_v39, %v4958_v19 }
 0x552   :  { %v1984_v5 = vmul.f32 %v1983_v35, %v5007_v48  ;;  %3161 = vpow2.f32 %v1765_v29 }
 0x553   :  { %2355 = vrot.lane.b32.xlu1 %v4958_v19, %s3277_s0  ;;  %3163 = vrcp.f32 %v4947_v12 }
 0x554   :  { %3036 = vset.pattern.permute.xlu1 %v5805_v43 }
 0x557   :  { %2613 = vperm.xlu0 %3037, %v4958_v19  }
 0x558   :  { %v3162_v35 = vpop.eup %3161 }
 0x559   :  { %v4980_v37 = vpop.permute.xlu2 %2673  ;;  %2609 = vperm.xlu2 %3033, %v4905_v26  }
 0x55b   :  { %2533 = vperm.xlu1 %3036, %v4958_v19  }
 0x55f   :  { %3042 = vset.pattern.permute.xlu0 %v5807_v3 }
 0x560   :  { %v4992_v31 = vpop.permute.xlu0 %2593  ;;  %2697 = vperm.xlu0 %3042, %v4987_v51  }
 0x561   :  { %v4996_v36 = vpop.permute.xlu1 %2281  ;;  %3035 = vset.pattern.permute.xlu2 %v5809_v10  ;;  %v4999_v11 = vpop.permute.xlu2 %2121 }
 0x562   :  { %2769 = vperm.xlu2 %3035, %v4905_v26   ;;  %v2169_v29 = vmul.f32 %v4999_v11, %v4821_v38  ;;  %v5875_v38 = vmov 3  }
 0x563   :  { %3039 = vset.pattern.permute.xlu1 %v5809_v10 }
 0x564   :  { %2773 = vperm.xlu1 %3039, %v4958_v19  }
 0x568   :  { %v5009_v2 = vpop.permute.xlu0 %2347  ;;  %2359 = vrot.lane.b32.xlu0 %v5007_v48, %s3277_s0 }
 0x569   :  { %v5014_v14 = vpop.permute.xlu1 %2753  ;;  %v5016_v49 = vpop.permute.xlu2 %2283  ;;  %3044 = vset.pattern.permute.xlu0 %v5805_v43 }
 0x56a   :  { %3038 = vset.pattern.permute.xlu2 %v5807_v3 }
 0x56b   :  { %2693 = vperm.xlu2 %3038, %v4958_v19  }
 0x56c   :  { %2131 = vrot.lane.b32.xlu1 %v1954_v25, %s3280_s27 }
 0x56d   :  { %3041 = vset.pattern.permute.xlu1 %v5811_v50 }
 0x570   :  { %v5025_v60 = vpop.permute.xlu0 %2517  ;;  %2541 = vperm.xlu0 %3044, %v5007_v48  }
 0x571   :  { %5866 = vst [vmem:[#allocation23_spill] sm:$0xff] %v5025_v60  ;;  %v5028_v4 = vpop.permute.xlu2 %2757 }
 0x572   :  { %5867 = vst [vmem:[#allocation24_spill] sm:$0xff] %v5028_v4  ;;  %v5030_v13 = vpop.permute.xlu1 %2597 }
 0x573   :  { %5868 = vst [vmem:[#allocation25_spill] sm:$0xff] %v5030_v13  ;;  %2357 = vrot.lane.b32.xlu2 %v4987_v51, %s3277_s0 }
 0x574   :  { %2209 = vrot.lane.b32.xlu1 %v3160_v55, %s3280_s27  ;;  %3040 = vset.pattern.permute.xlu2 %v5805_v43  ;;  %v1958_v55 = vmul.f32 %v3158_v44, %v1957_v57  ;;  %v1967_v57 = vor.u32 1.1754944e-38, %v1966_v27  ;;  %v1763_v27 = vmul.f32 1.442695, %v1742_v46 }
 0x576   :  { %v1959_v54 = vadd.f32 %v3158_v44, %v1958_v55  ;;  %v1328_v55 = vadd.f32 %v4811_v18, %v1327_v33  ;;  %3165 = vpow2.f32 %v1763_v27  ;;  %v3164_v33 = vpop.eup %3163 }
 0x577   :  { %vm1991_vm15 = vweird.f32 %v3164_v33  ;;  %3167 = vrcp.f32 %v4922_v61 }
 0x578   :  { %3047 = vset.pattern.permute.xlu0 %v5809_v10  ;;  %v1963_v32 = vsel %vm1962_vm10, %v3158_v44, %v1959_v54  ;;  %v1377_v39 = vmul.f32 %v4813_v41, %v1328_v55  ;;  %vm1359_vm12 = vcmp.gt.f32.partialorder %v1328_v55, 0.0  ;;  %vm5126_vm1 = vmor %vm1990_vm14, %vm1991_vm15  ;;  %3169 = vrcp.f32 %v4951_v63 }
 0x579   :  { %v5041_v42 = vpop.permute.xlu0 %2677  ;;  %2781 = vperm.xlu0 %3047, %v5007_v48   ;;  %v1968_v0 = vsel %vm1965_vm11, %v1967_v57, %v1963_v32  ;;  %v5874_v57 = vmov 2   ;;  %vm2035_vm14 = vweird.f32 %v4962_v58 }
 0x57a   :  { %5869 = vst [vmem:[#allocation26_spill] sm:$0xff] %v5041_v42  ;;  %v5044_v25 = vpop.permute.xlu1 %2349  ;;  %v5046_v1 = vpop.permute.xlu2 %2601  ;;  %v1969_v44 = vmul.f32 %v1968_v0, %v4987_v51  ;;  %v5086_v11 = vsel %vm1359_vm12, %v1328_v55, %v1377_v39 }
 0x57b   :  { %5870 = vst [vmem:[#allocation27_spill] sm:$0xff] %v5046_v1  ;;  %2537 = vperm.xlu2 %3040, %v4987_v51   ;;  %v1330_v0 = vpop.f32.mrf.mxu2 }
 0x57c   :  { %2293 = vrot.lane.b32.xlu1 %v4987_v51, %s3278_s26  ;;  %v3166_v46 = vpop.eup %3165  ;;  %v1331_v55 = vadd.f32 %v4811_v18, %v1330_v0 }
 0x57d   :  { %v3168_v60 = vpop.eup %3167 }
 0x57e   :  { %vm1360_vm13 = vcmp.gt.f32.partialorder %v1331_v55, 0.0  ;;  %vm2021_vm5 = vweird.f32 %v3168_v60 }
 0x57f   :  { %vm5176_vm6 = vmor %vm2020_vm4, %vm2021_vm5  ;;  %vm2065_vm4 = vweird.f32 %v4936_v52 }
 0x581   :  { %v2124_v43 = vpop.permute.xlu0 %2123  ;;  %2135 = vrot.lane.b32.xlu0 %v1984_v5, %s3280_s27 }
 0x582   :  { %v5058_v28 = vpop.permute.xlu1 %2521  ;;  %v5060_v3 = vpop.permute.xlu2 %2351  ;;  %3049 = vset.pattern.permute.xlu0 %v5811_v50 }
 0x583   :  { %5871 = vst [vmem:[#allocation28_spill] sm:$0xff] %v5058_v28  ;;  %3043 = vset.pattern.permute.xlu2 %v5809_v10  ;;  %v1333_v0 = vpop.f32.mrf.mxu2 }
 0x584   :  { %2617 = vperm.xlu1 %3041, %v4987_v51   ;;  %2777 = vperm.xlu2 %3043, %v4987_v51  }
 0x589   :  { %2213 = vrot.lane.b32.xlu0 %v3162_v35, %s3280_s27  ;;  %v2202_v5 = vpop.permute.xlu0 %2201  ;;  %v1986_v35 = vmul.f32 %v3164_v33, %v4947_v12 }
 0x58a   :  { %v2249_v10 = vmul.f32 %v2202_v5, %v2169_v29  ;;  %v5072_v50 = vpop.permute.xlu2 %2525  ;;  %v5877_v29 = vmov 4  }
 0x58b   :  { %5872 = vst [vmem:[#allocation29_spill] sm:$0xff] %v5072_v50  ;;  %v5075_v54 = vpop.permute.xlu1 %2681  ;;  %v1987_v27 = vsub.f32 1.0, %v1986_v35  ;;  %v1378_v50 = vmul.f32 %v4813_v41, %v1331_v55 }
 0x58c   :  { %5873 = vst [vmem:[#allocation30_spill] sm:$0xff] %v5075_v54  ;;  %v5080_v59 = vmul.f32 %v4996_v36, %v2249_v10  ;;  %3046 = vset.pattern.permute.xlu1 %v5874_v57  ;;  %2133 = vrot.lane.b32.xlu2 %v1969_v44, %s3280_s27  ;;  %v2170_v44 = vmul.f32 %v2124_v43, %v4833_v40  ;;  %v1996_v40 = vand.u32 2147483648, %v4947_v12 }
 0x58d   :  { %2701 = vperm.xlu1 %3046, %v5007_v48   ;;  %3045 = vset.pattern.permute.xlu2 %v5875_v38  ;;  %v1988_v4 = vmul.f32 %v3164_v33, %v1987_v27  ;;  %v5114_v35 = vsel %vm1360_vm13, %v1331_v55, %v1378_v50 }
 0x58f   :  { %v1989_v27 = vadd.f32 %v3164_v33, %v1988_v4 }
 0x591   :  { %2297 = vrot.lane.b32.xlu0 %v5086_v11, %s3278_s26  ;;  %v2286_v32 = vpop.permute.xlu0 %2285 }
 0x593   :  { %v2126_v10 = vpop.permute.xlu1 %2125  ;;  %v5090_v36 = vpop.permute.xlu2 %2685 }
 0x594   :  { %5876 = vst [vmem:[#allocation31_spill] sm:$0xff] %v5090_v36  ;;  %2211 = vrot.lane.b32.xlu2 %v3166_v46, %s3280_s27 }
 0x595   :  { %2361 = vrot.lane.b32.xlu1 %v5086_v11, %s3277_s0 }
 0x596   :  { %3048 = vset.pattern.permute.xlu1 %v5877_v29 }
 0x599   :  { %2625 = vperm.xlu0 %3049, %v5086_v11   ;;  %v5099_v5 = vpop.permute.xlu0 %2761 }
 0x59a   :  { %5878 = vst [vmem:[#allocation32_spill] sm:$0xff] %v5099_v5 }
 0x59b   :  { %v2204_v39 = vpop.permute.xlu1 %2203  ;;  %v5102_v36 = vpop.permute.xlu2 %2127 }
 0x59c   :  { %v2250_v46 = vmul.f32 %v2204_v39, %v2170_v44  ;;  %2295 = vrot.lane.b32.xlu2 %v5007_v48, %s3278_s26  ;;  %v1334_v44 = vadd.f32 %v4811_v18, %v1333_v0  ;;  %v1997_v0 = vor.u32 1.1754944e-38, %v1996_v40 }
 0x59d   :  { %2545 = vperm.xlu1 %3048, %v5086_v11  }
 0x59e   :  { %v2330_v42 = vmul.f32 %v5016_v49, %v2250_v46  ;;  %v2171_v49 = vmul.f32 %v2126_v10, %v4863_v20  ;;  %v1379_v13 = vmul.f32 %v4813_v41, %v1334_v44  ;;  %v5881_v20 = vmov 1  }
 0x59f   :  { %vm1361_vm2 = vcmp.gt.f32.partialorder %v1334_v44, 0.0  ;;  %v1993_v10 = vsel %vm5126_vm1, %v3164_v33, %v1989_v27  ;;  %v3170_v27 = vpop.eup %3169 }
 0x5a0   :  { %v5111_v43 = vadd.f32 %v5009_v2, %v2330_v42  ;;  %v1994_v2 = vand.u32 2147483647, %v4947_v12  ;;  %v1744_v12 = vmul.f32 %v4784_v45, %v5007_v48  ;;  %v5141_v40 = vsel %vm1361_vm2, %v1334_v44, %v1379_v13 }
 0x5a1   :  { %3054 = vset.pattern.permute.xlu0 %v5874_v57  ;;  %v5118_v39 = vpop.permute.xlu0 %2353  ;;  %vm2006_vm9 = vweird.f32 %v3170_v27 }
 0x5a2   :  { %2709 = vperm.xlu0 %3054, %v5114_v35   ;;  %vm1995_vm3 = vcmp.eq.f32.partialorder %v1994_v2, 8.507059e+37  ;;  %v1767_v45 = vmul.f32 1.442695, %v1744_v12  ;;  %vm2007_vm10 = vmor %vm2005_vm8, %vm2006_vm9  ;;  %vm2050_vm8 = vweird.f32 %v4966_v34 }
 0x5a3   :  { %v2288_v42 = vpop.permute.xlu1 %2287  ;;  %v2206_v46 = vpop.permute.xlu2 %2205  ;;  %v1998_v5 = vsel %vm1995_vm3, %v1997_v0, %v1993_v10  ;;  %v2026_v10 = vand.u32 2147483648, %v4922_v61 }
 0x5a4   :  { %v2251_v55 = vmul.f32 %v2206_v46, %v2171_v49  ;;  %2621 = vperm.xlu2 %3045, %v5007_v48   ;;  %v1999_v13 = vmul.f32 %v1998_v5, %v5086_v11  ;;  %3171 = vpow2.f32 %v1767_v45  ;;  %v2172_v45 = vmul.f32 %v5102_v36, %v4897_v53 }
 0x5a5   :  { %3051 = vset.pattern.permute.xlu1 %v5881_v20  ;;  %v1746_v53 = vmul.f32 %v4807_v17, %v5114_v35 }
 0x5a6   :  { %v2331_v4 = vmul.f32 %v2286_v32, %v2251_v55  ;;  %2785 = vperm.xlu1 %3051, %v5086_v11   ;;  %v2016_v32 = vmul.f32 %v3168_v60, %v4922_v61 }
 0x5a8   :  { %v5139_v49 = vadd.f32 %v5044_v25, %v2331_v4  ;;  %v2017_v25 = vsub.f32 1.0, %v2016_v32  ;;  %v2001_v4 = vmul.f32 %v3170_v27, %v4951_v63  ;;  %v2024_v32 = vand.u32 2147483647, %v4922_v61 }
 0x5a9   :  { %v5143_v46 = vpop.permute.xlu0 %2529 }
 0x5aa   :  { %5882 = vst [vmem:[#allocation33_spill] sm:$0xff] %v5143_v46  ;;  %2365 = vrot.lane.b32.xlu0 %v5141_v40, %s3277_s0  ;;  %v2018_v55 = vmul.f32 %v3168_v60, %v2017_v25  ;;  %v3172_v5 = vpop.eup %3171  ;;  %vm2025_vm7 = vcmp.eq.f32.partialorder %v2024_v32, 8.507059e+37  ;;  %v2009_v32 = vand.u32 2147483647, %v4951_v63 }
 0x5ab   :  { %v5148_v50 = vpop.permute.xlu1 %2605  ;;  %v5150_v33 = vpop.permute.xlu2 %2289  ;;  %3056 = vset.pattern.permute.xlu0 %v5877_v29 }
 0x5ac   :  { %5883 = vst [vmem:[#allocation34_spill] sm:$0xff] %v5148_v50  ;;  %3050 = vset.pattern.permute.xlu2 %v5874_v57  ;;  %v2019_v12 = vadd.f32 %v3168_v60, %v2018_v55  ;;  %vm2010_vm11 = vcmp.eq.f32.partialorder %v2009_v32, 8.507059e+37 }
 0x5ad   :  { %2705 = vperm.xlu2 %3050, %v5086_v11  }
 0x5ae   :  { %2137 = vrot.lane.b32.xlu1 %v1999_v13, %s3280_s27  ;;  %v2023_v55 = vsel %vm5176_vm6, %v3168_v60, %v2019_v12  ;;  %v1771_v60 = vmul.f32 1.442695, %v1746_v53 }
 0x5af   :  { %3053 = vset.pattern.permute.xlu1 %v5875_v38 }
 0x5b0   :  { %3173 = vpow2.f32 %v1771_v60 }
 0x5b1   :  { %v5159_v44 = vpop.permute.xlu0 %2129  ;;  %3175 = vrcp.f32 %v4962_v58 }
 0x5b2   :  { %2553 = vperm.xlu0 %3056, %v5141_v40  }
 0x5b3   :  { %v5162_v2 = vpop.permute.xlu2 %2609 }
 0x5b4   :  { %5884 = vst [vmem:[#allocation35_spill] sm:$0xff] %v5162_v2  ;;  %v5164_v0 = vpop.permute.xlu1 %2765 }
 0x5b5   :  { %5885 = vst [vmem:[#allocation36_spill] sm:$0xff] %v5164_v0  ;;  %2363 = vrot.lane.b32.xlu2 %v5114_v35, %s3277_s0  ;;  %v2002_v0 = vsub.f32 1.0, %v2001_v4 }
 0x5b6   :  { %2215 = vrot.lane.b32.xlu1 %v3172_v5, %s3280_s27  ;;  %3052 = vset.pattern.permute.xlu2 %v5877_v29  ;;  %v2027_v5 = vor.u32 1.1754944e-38, %v2026_v10  ;;  %v3174_v53 = vpop.eup %3173 }
 0x5b7   :  { %v3176_v32 = vpop.eup %3175 }
 0x5b8   :  { %v2028_v10 = vsel %vm2025_vm7, %v2027_v5, %v2023_v55  ;;  %v1745_v5 = vmul.f32 %v4790_v47, %v5086_v11  ;;  %vm2036_vm15 = vweird.f32 %v3176_v32 }
 0x5b9   :  { %v2208_v25 = vpop.permute.xlu0 %2207  ;;  %v2029_v17 = vmul.f32 %v2028_v10, %v5141_v40  ;;  %vm5270_vm1 = vmor %vm2035_vm14, %vm2036_vm15  ;;  %vm2080_vm14 = vweird.f32 %v4976_v15 }
 0x5ba   :  { %v2252_v50 = vmul.f32 %v2208_v25, %v2172_v45  ;;  %3059 = vset.pattern.permute.xlu0 %v5881_v20  ;;  %v2003_v45 = vmul.f32 %v3170_v27, %v2002_v0 }
 0x5bb   :  { %2793 = vperm.xlu0 %3059, %v5141_v40  }
 0x5bc   :  { %v2332_v61 = vmul.f32 %v2288_v42, %v2252_v50  ;;  %v5184_v2 = vpop.permute.xlu2 %2769  ;;  %v2011_v50 = vand.u32 2147483648, %v4951_v63  ;;  %v2004_v12 = vadd.f32 %v3170_v27, %v2003_v45  ;;  %v1336_v63 = vpop.f32.mrf.mxu2  ;;  %v1769_v45 = vmul.f32 1.442695, %v1745_v5 }
 0x5bd   :  { %5888 = vst [vmem:[#allocation37_spill] sm:$0xff] %v5184_v2  ;;  %v5188_v36 = vpop.permute.xlu1 %2689  ;;  %2549 = vperm.xlu2 %3052, %v5114_v35   ;;  %v1337_v10 = vadd.f32 %v4811_v18, %v1336_v63 }
 0x5be   :  { %5889 = vst [vmem:[#allocation38_spill] sm:$0xff] %v5188_v36  ;;  %v5192_v4 = vadd.f32 %v5060_v3, %v2332_v61  ;;  %2299 = vrot.lane.b32.xlu1 %v5114_v35, %s3278_s26  ;;  %v2012_v13 = vor.u32 1.1754944e-38, %v2011_v50  ;;  %v2008_v25 = vsel %vm2007_vm10, %v3170_v27, %v2004_v12  ;;  %3177 = vpow2.f32 %v1769_v45  ;;  %v5262_v36 = vld [vmem:[#allocation2 + $0x10a] ss:$0 sm:$0xff] }
 0x5bf   :  { %v1380_v27 = vmul.f32 %v4813_v41, %v1337_v10  ;;  %vm1362_vm12 = vcmp.gt.f32.partialorder %v1337_v10, 0.0  ;;  %3179 = vrcp.f32 %v4936_v52 }
 0x5c0   :  { %v2013_v61 = vsel %vm2010_vm11, %v2012_v13, %v2008_v25  ;;  %3181 = vrcp.f32 %v4966_v34 }
 0x5c1   :  { %v5197_v42 = vpop.permute.xlu0 %2291  ;;  %v2014_v60 = vmul.f32 %v2013_v61, %v5114_v35  ;;  %v5228_v47 = vsel %vm1362_vm12, %v1337_v10, %v1380_v27  ;;  %v2031_v61 = vmul.f32 %v3176_v32, %v4962_v58 }
 0x5c3   :  { %2141 = vrot.lane.b32.xlu0 %v2029_v17, %s3280_s27  ;;  %v2032_v45 = vsub.f32 1.0, %v2031_v61  ;;  %v2041_v61 = vand.u32 2147483648, %v4962_v58 }
 0x5c4   :  { %3061 = vset.pattern.permute.xlu0 %v5875_v38  ;;  %v3178_v13 = vpop.eup %3177  ;;  %v1339_v63 = vpop.f32.mrf.mxu2 }
 0x5c5   :  { %v5204_v3 = vpop.permute.xlu1 %2355  ;;  %3055 = vset.pattern.permute.xlu2 %v5881_v20  ;;  %v5207_v0 = vpop.permute.xlu2 %2693  ;;  %v1340_v10 = vadd.f32 %v4811_v18, %v1339_v63  ;;  %v2042_v54 = vor.u32 1.1754944e-38, %v2041_v61  ;;  %v1747_v61 = vmul.f32 %v4793_v16, %v5141_v40 }
 0x5c6   :  { %2629 = vperm.xlu1 %3053, %v5114_v35   ;;  %2789 = vperm.xlu2 %3055, %v5114_v35   ;;  %v5257_v63 = vpop.eup %3179 }
 0x5c7   :  { %vm1363_vm13 = vcmp.gt.f32.partialorder %v1340_v10, 0.0  ;;  %vm2066_vm5 = vweird.f32 %v5257_v63 }
 0x5c8   :  { %vm2067_vm6 = vmor %vm2065_vm4, %vm2066_vm5 }
 0x5c9   :  { %v5213_v55 = vpop.permute.xlu0 %2613 }
 0x5cb   :  { %2219 = vrot.lane.b32.xlu0 %v3174_v53, %s3280_s27 }
 0x5cd   :  { %v5218_v17 = vpop.permute.xlu1 %2533  ;;  %v5220_v50 = vpop.permute.xlu2 %2357 }
 0x5ce   :  { %3058 = vset.pattern.permute.xlu1 %v5874_v57  ;;  %2139 = vrot.lane.b32.xlu2 %v2014_v60, %s3280_s27 }
 0x5cf   :  { %2713 = vperm.xlu1 %3058, %v5141_v40   ;;  %3057 = vset.pattern.permute.xlu2 %v5875_v38 }
 0x5d2   :  { %v5230_v12 = vpop.permute.xlu0 %2697 }
 0x5d3   :  { %5890 = vst [vmem:[#allocation39_spill] sm:$0xff] %v5230_v12  ;;  %2303 = vrot.lane.b32.xlu0 %v5228_v47, %s3278_s26  ;;  %v2033_v12 = vmul.f32 %v3176_v32, %v2032_v45 }
 0x5d5   :  { %v5234_v25 = vpop.permute.xlu2 %2537  ;;  %v2034_v45 = vadd.f32 %v3176_v32, %v2033_v12  ;;  %v5278_v12 = vld [vmem:[#allocation2 + $0x10b] ss:$0 sm:$0xff] }
 0x5d6   :  { %5891 = vst [vmem:[#allocation40_spill] sm:$0xff] %v5234_v25  ;;  %v5236_v5 = vpop.permute.xlu1 %2773  ;;  %2217 = vrot.lane.b32.xlu2 %v3178_v13, %s3280_s27  ;;  %v1381_v13 = vmul.f32 %v4813_v41, %v1340_v10  ;;  %v1342_v25 = vpop.f32.mrf.mxu2 }
 0x5d7   :  { %2367 = vrot.lane.b32.xlu1 %v5228_v47, %s3277_s0  ;;  %v1343_v41 = vadd.f32 %v5262_v36, %v1342_v25 }
 0x5d8   :  { %3060 = vset.pattern.permute.xlu1 %v5877_v29  ;;  %v5260_v2 = vsel %vm1363_vm13, %v1340_v10, %v1381_v13  ;;  %v2061_v10 = vmul.f32 %v5257_v63, %v4936_v52 }
 0x5d9   :  { %vm1364_vm2 = vcmp.gt.f32.partialorder %v1343_v41, 0.0 }
 0x5da   :  { %v5243_v53 = vpop.permute.xlu0 %2359  ;;  %v2062_v9 = vsub.f32 1.0, %v2061_v10 }
 0x5db   :  { %2637 = vperm.xlu0 %3061, %v5228_v47  }
 0x5de   :  { %v2132_v60 = vpop.permute.xlu1 %2131  ;;  %2301 = vrot.lane.b32.xlu2 %v5141_v40, %s3278_s26  ;;  %v5250_v27 = vpop.permute.xlu2 %2777 }
 0x5df   :  { %5892 = vst [vmem:[#allocation41_spill] sm:$0xff] %v5250_v27  ;;  %2557 = vperm.xlu1 %3060, %v5228_v47   ;;  %v2039_v27 = vand.u32 2147483647, %v4962_v58  ;;  %v1382_v58 = vmul.f32 %v5278_v12, %v1343_v41  ;;  %v2174_v46 = vmul.f32 %v2132_v60, %v4958_v19  ;;  %v2071_v60 = vand.u32 2147483648, %v4936_v52 }
 0x5e1   :  { %vm2040_vm3 = vcmp.eq.f32.partialorder %v2039_v27, 8.507059e+37  ;;  %v5290_v28 = vsel %vm1364_vm2, %v1343_v41, %v1382_v58  ;;  %v2063_v27 = vmul.f32 %v5257_v63, %v2062_v9 }
 0x5e2   :  { %v5255_v18 = vpop.permute.xlu0 %2541 }
 0x5e3   :  { %5893 = vst [vmem:[#allocation42_spill] sm:$0xff] %v5255_v18  ;;  %3066 = vset.pattern.permute.xlu0 %v5874_v57  ;;  %v2173_v18 = vmul.f32 %v5159_v44, %v4905_v26  ;;  %v2038_v26 = vsel %vm5270_vm1, %v3176_v32, %v2034_v45  ;;  %v2064_v9 = vadd.f32 %v5257_v63, %v2063_v27  ;;  %v2069_v45 = vand.u32 2147483647, %v4936_v52 }
 0x5e4   :  { %2721 = vperm.xlu0 %3066, %v5260_v2   ;;  %v2056_v27 = vand.u32 2147483648, %v4966_v34 }
 0x5e5   :  { %vm2070_vm7 = vcmp.eq.f32.partialorder %v2069_v45, 8.507059e+37 }
 0x5e6   :  { %v2210_v25 = vpop.permute.xlu1 %2209  ;;  %2633 = vperm.xlu2 %3057, %v5141_v40   ;;  %v2134_v13 = vpop.permute.xlu2 %2133 }
 0x5e7   :  { %v2253_v1 = vmul.f32 %v2210_v25, %v2173_v18  ;;  %3063 = vset.pattern.permute.xlu1 %v5881_v20  ;;  %v2043_v18 = vsel %vm2040_vm3, %v2042_v54, %v2038_v26  ;;  %v5294_v25 = vpop.eup %3181  ;;  %vm2095_vm3 = vweird.f32 %v4978_v7 }
 0x5e8   :  { %2797 = vperm.xlu1 %3063, %v5228_v47   ;;  %v2044_v32 = vmul.f32 %v2043_v18, %v5228_v47  ;;  %v2046_v54 = vmul.f32 %v5294_v25, %v4966_v34  ;;  %vm2051_vm9 = vweird.f32 %v5294_v25 }
 0x5e9   :  { %v5286_v44 = vmul.f32 %v5150_v33, %v2253_v1  ;;  %v1773_v1 = vmul.f32 1.442695, %v1747_v61  ;;  %v2072_v61 = vor.u32 1.1754944e-38, %v2071_v60  ;;  %vm2052_vm10 = vmor %vm2050_vm8, %vm2051_vm9 }
 0x5ea   :  { %v2047_v10 = vsub.f32 1.0, %v2046_v54 }
 0x5eb   :  { %v5292_v21 = vpop.permute.xlu0 %2781  ;;  %3183 = vpow2.f32 %v1773_v1  ;;  %v2068_v1 = vsel %vm2067_vm6, %v5257_v63, %v2064_v9  ;;  %v1345_v9 = vpop.f32.mrf.mxu2 }
 0x5ec   :  { %2371 = vrot.lane.b32.xlu0 %v5290_v28, %s3277_s0 }
 0x5ed   :  { %3067 = vset.pattern.permute.xlu0 %v5877_v29 }
 0x5ee   :  { %v2294_v33 = vpop.permute.xlu1 %2293  ;;  %3062 = vset.pattern.permute.xlu2 %v5874_v57  ;;  %v2212_v16 = vpop.permute.xlu2 %2211 }
 0x5ef   :  { %v2254_v41 = vmul.f32 %v2212_v16, %v2174_v46  ;;  %2717 = vperm.xlu2 %3062, %v5228_v47   ;;  %v2073_v16 = vsel %vm2070_vm7, %v2072_v61, %v2068_v1 }
 0x5f0   :  { %2143 = vrot.lane.b32.xlu1 %v2044_v32, %s3280_s27  ;;  %v2074_v63 = vmul.f32 %v2073_v16, %v5290_v28 }
 0x5f1   :  { %v2334_v19 = vmul.f32 %v5197_v42, %v2254_v41  ;;  %3065 = vset.pattern.permute.xlu1 %v5875_v38  ;;  %v1749_v42 = vmul.f32 %v4815_v24, %v5260_v2  ;;  %v3184_v52 = vpop.eup %3183  ;;  %v2175_v24 = vmul.f32 %v2134_v13, %v4987_v51  ;;  %v2057_v51 = vor.u32 1.1754944e-38, %v2056_v27 }
 0x5f3   :  { %v5315_v58 = vadd.f32 %v5204_v3, %v2334_v19  ;;  %v5317_v26 = vpop.permute.xlu0 %2135  ;;  %v2048_v3 = vmul.f32 %v5294_v25, %v2047_v10  ;;  %v1777_v32 = vmul.f32 1.442695, %v1749_v42  ;;  %v2054_v19 = vand.u32 2147483647, %v4966_v34 }
 0x5f4   :  { %2565 = vperm.xlu0 %3067, %v5290_v28   ;;  %v1748_v42 = vmul.f32 %v4801_v23, %v5228_v47 }
 0x5f5   :  { %v2049_v41 = vadd.f32 %v5294_v25, %v2048_v3  ;;  %3185 = vpow2.f32 %v1777_v32  ;;  %vm2055_vm11 = vcmp.eq.f32.partialorder %v2054_v19, 8.507059e+37 }
 0x5f6   :  { %v5322_v18 = vpop.permute.xlu1 %2617  ;;  %v5324_v46 = vpop.permute.xlu2 %2295  ;;  %v1775_v16 = vmul.f32 1.442695, %v1748_v42  ;;  %3187 = vrcp.f32 %v4976_v15 }
 0x5f7   :  { %2369 = vrot.lane.b32.xlu2 %v5260_v2, %s3277_s0  ;;  %v2053_v61 = vsel %vm2052_vm10, %v5294_v25, %v2049_v41 }
 0x5f8   :  { %2221 = vrot.lane.b32.xlu1 %v3184_v52, %s3280_s27  ;;  %3064 = vset.pattern.permute.xlu2 %v5877_v29  ;;  %v1346_v52 = vadd.f32 %v5262_v36, %v1345_v9  ;;  %3189 = vpow2.f32 %v1775_v16 }
 0x5fa   :  { %vm1365_vm12 = vcmp.gt.f32.partialorder %v1346_v52, 0.0 }
 0x5fb   :  { %v2214_v54 = vpop.permute.xlu0 %2213  ;;  %v3186_v1 = vpop.eup %3185 }
 0x5fc   :  { %v2255_v60 = vmul.f32 %v2214_v54, %v2175_v24  ;;  %2147 = vrot.lane.b32.xlu0 %v2074_v63, %s3280_s27  ;;  %v1348_v24 = vpop.f32.mrf.mxu2  ;;  %v3188_v41 = vpop.eup %3187 }
 0x5fd   :  { %3071 = vset.pattern.permute.xlu0 %v5875_v38  ;;  %v1349_v27 = vadd.f32 %v5262_v36, %v1348_v24  ;;  %v2076_v36 = vmul.f32 %v3188_v41, %v4976_v15  ;;  %vm2081_vm15 = vweird.f32 %v3188_v41  ;;  %v2084_v24 = vand.u32 2147483647, %v4976_v15 }
 0x5fe   :  { %v2335_v45 = vmul.f32 %v2294_v33, %v2255_v60  ;;  %v5341_v10 = vpop.permute.xlu2 %2621  ;;  %v2058_v33 = vsel %vm2055_vm11, %v2057_v51, %v2053_v61  ;;  %v3190_v19 = vpop.eup %3189  ;;  %vm2082_vm1 = vmor %vm2080_vm14, %vm2081_vm15 }
 0x5ff   :  { %v5343_v13 = vpop.permute.xlu1 %2701  ;;  %2561 = vperm.xlu2 %3064, %v5260_v2   ;;  %v2059_v25 = vmul.f32 %v2058_v33, %v5260_v2  ;;  %v1384_v60 = vmul.f32 %v5278_v12, %v1349_v27  ;;  %vm1366_vm13 = vcmp.gt.f32.partialorder %v1349_v27, 0.0  ;;  %vm2085_vm2 = vcmp.eq.f32.partialorder %v2084_v24, 8.507059e+37 }
 0x600   :  { %v5348_v34 = vadd.f32 %v5220_v50, %v2335_v45  ;;  %2305 = vrot.lane.b32.xlu1 %v5260_v2, %s3278_s26  ;;  %v1383_v50 = vmul.f32 %v5278_v12, %v1346_v52  ;;  %v2077_v12 = vsub.f32 1.0, %v2076_v36 }
 0x601   :  { %v5384_v51 = vsel %vm1366_vm13, %v1349_v27, %v1384_v60 }
 0x602   :  { %v5368_v63 = vsel %vm1365_vm12, %v1346_v52, %v1383_v50  ;;  %v1752_v42 = vmul.f32 %v4830_v6, %v5384_v51  ;;  %v2078_v52 = vmul.f32 %v3188_v41, %v2077_v12  ;;  %v1750_v12 = vmul.f32 %v4804_v56, %v5290_v28 }
 0x603   :  { %v5355_v3 = vpop.permute.xlu0 %2297 }
 0x604   :  { %2225 = vrot.lane.b32.xlu0 %v3186_v1, %s3280_s27  ;;  %v1783_v16 = vmul.f32 1.442695, %v1752_v42  ;;  %v2079_v50 = vadd.f32 %v3188_v41, %v2078_v52 }
 0x606   :  { %3191 = vpow2.f32 %v1783_v16  ;;  %v2083_v36 = vsel %vm2082_vm1, %v3188_v41, %v2079_v50  ;;  %v1779_v16 = vmul.f32 1.442695, %v1750_v12 }
 0x607   :  { %v5361_v32 = vpop.permute.xlu1 %2361  ;;  %2145 = vrot.lane.b32.xlu2 %v2059_v25, %s3280_s27  ;;  %v5364_v23 = vpop.permute.xlu2 %2705  ;;  %v2086_v25 = vand.u32 2147483648, %v4976_v15  ;;  %3193 = vrcp.f32 %v4978_v7 }
 0x608   :  { %2641 = vperm.xlu1 %3065, %v5260_v2   ;;  %3068 = vset.pattern.permute.xlu2 %v5875_v38  ;;  %3195 = vpow2.f32 %v1779_v16 }
 0x609   :  { %v2087_v27 = vor.u32 1.1754944e-38, %v2086_v25 }
 0x60b   :  { %v5371_v54 = vpop.permute.xlu0 %2625  ;;  %v2088_v52 = vsel %vm2085_vm2, %v2087_v27, %v2083_v36  ;;  %v2393_v36 = vadd.f32 %v4949_v8, %v5080_v59 }
 0x60c   :  { %2309 = vrot.lane.b32.xlu0 %v5368_v63, %s3278_s26  ;;  %v3192_v15 = vpop.eup %3191  ;;  %v2089_v41 = vmul.f32 %v2088_v52, %v5368_v63 }
 0x60d   :  { %v3194_v25 = vpop.eup %3193 }
 0x60e   :  { %v2091_v27 = vmul.f32 %v3194_v25, %v4978_v7  ;;  %v3196_v12 = vpop.eup %3195  ;;  %vm2096_vm4 = vweird.f32 %v3194_v25 }
 0x60f   :  { %v5376_v9 = vpop.permute.xlu1 %2545  ;;  %2223 = vrot.lane.b32.xlu2 %v3190_v19, %s3280_s27  ;;  %v5379_v45 = vpop.permute.xlu2 %2363  ;;  %vm2097_vm5 = vmor %vm2095_vm3, %vm2096_vm4 }
 0x610   :  { %3069 = vset.pattern.permute.xlu1 %v5874_v57 }
 0x611   :  { %2725 = vperm.xlu1 %3069, %v5290_v28  }
 0x614   :  { %2649 = vperm.xlu0 %3071, %v5368_v63   ;;  %v5387_v61 = vpop.permute.xlu0 %2709 }
 0x617   :  { %2307 = vrot.lane.b32.xlu2 %v5290_v28, %s3278_s26  ;;  %v5393_v33 = vpop.permute.xlu2 %2549 }
 0x618   :  { %v5395_v1 = vpop.permute.xlu1 %2785 }
 0x619   :  { %2373 = vrot.lane.b32.xlu1 %v5368_v63, %s3277_s0 }
 0x61a   :  { %3070 = vset.pattern.permute.xlu1 %v5877_v29 }
 0x61c   :  { %3075 = vset.pattern.permute.xlu0 %v5874_v57  ;;  %v5403_v6 = vpop.permute.xlu0 %2365 }
 0x61d   :  { %2733 = vperm.xlu0 %3075, %v5384_v51  }
 0x61f   :  { %2645 = vperm.xlu2 %3068, %v5290_v28  }
 0x620   :  { %v2138_v19 = vpop.permute.xlu1 %2137  ;;  %v5408_v60 = vpop.permute.xlu2 %2789 }
 0x621   :  { %5896 = vst [vmem:[#allocation43_spill] sm:$0xff] %v5408_v60  ;;  %2569 = vperm.xlu1 %3070, %v5368_v63   ;;  %v2176_v60 = vmul.f32 %v5317_v26, %v5007_v48  ;;  %v2092_v26 = vsub.f32 1.0, %v2091_v27  ;;  %v2177_v52 = vmul.f32 %v2138_v19, %v5086_v11  ;;  %v1751_v27 = vmul.f32 %v4809_v62, %v5368_v63 }
 0x623   :  { %v2093_v8 = vmul.f32 %v3194_v25, %v2092_v26 }
 0x624   :  { %v5414_v42 = vpop.permute.xlu0 %2553 }
 0x625   :  { %2231 = vrot.lane.b32.xlu0 %v3192_v15, %s3280_s27  ;;  %v2094_v16 = vadd.f32 %v3194_v25, %v2093_v8 }
 0x626   :  { %3077 = vset.pattern.permute.xlu0 %v5877_v29 }
 0x627   :  { %3072 = vset.pattern.permute.xlu2 %v5874_v57 }
 0x628   :  { %v2216_v50 = vpop.permute.xlu1 %2215  ;;  %2729 = vperm.xlu2 %3072, %v5368_v63   ;;  %v2140_v56 = vpop.permute.xlu2 %2139 }
 0x629   :  { %v2256_v24 = vmul.f32 %v2216_v50, %v2176_v60  ;;  %2149 = vrot.lane.b32.xlu1 %v2089_v41, %s3280_s27  ;;  %v2099_v41 = vand.u32 2147483647, %v4978_v7 }
 0x62a   :  { %3074 = vset.pattern.permute.xlu1 %v5875_v38  ;;  %v2101_v38 = vand.u32 2147483648, %v4978_v7  ;;  %v1781_v7 = vmul.f32 1.442695, %v1751_v27 }
 0x62b   :  { %v5429_v48 = vmul.f32 %v5324_v46, %v2256_v24  ;;  %vm2100_vm6 = vcmp.eq.f32.partialorder %v2099_v41, 8.507059e+37  ;;  %v2178_v41 = vmul.f32 %v2140_v56, %v5114_v35 }
 0x62c   :  { %v2102_v24 = vor.u32 1.1754944e-38, %v2101_v38  ;;  %3197 = vpow2.f32 %v1781_v7 }
 0x62d   :  { %2418 = vperm.xlu0 %3077, %v2393_v36   ;;  %v5431_v57 = vpop.permute.xlu0 %2793 }
 0x630   :  { %v2300_v15 = vpop.permute.xlu1 %2299  ;;  %2375 = vrot.lane.b32.xlu2 %v5384_v51, %s3277_s0  ;;  %v2218_v60 = vpop.permute.xlu2 %2217 }
 0x631   :  { %2227 = vrot.lane.b32.xlu1 %v3196_v12, %s3280_s27  ;;  %3073 = vset.pattern.permute.xlu2 %v5877_v29  ;;  %v2257_v59 = vmul.f32 %v2218_v60, %v2177_v52 }
 0x632   :  { %v3198_v52 = vpop.eup %3197 }
 0x633   :  { %v2337_v11 = vmul.f32 %v5355_v3, %v2257_v59 }
 0x635   :  { %2443 = vperm.xlu0 %3077, %v5315_v58   ;;  %v2142_v46 = vpop.permute.xlu0 %2141  ;;  %v2098_v58 = vsel %vm2097_vm5, %v3194_v25, %v2094_v16  ;;  %v2401_v36 = vadd.f32 %v5361_v32, %v2337_v11 }
 0x636   :  { %v2103_v3 = vsel %vm2100_vm6, %v2102_v24, %v2098_v58 }
 0x637   :  { %v2104_v12 = vmul.f32 %v2103_v3, %v5384_v51 }
 0x638   :  { %v5443_v19 = vpop.permute.xlu1 %2629  ;;  %2573 = vperm.xlu2 %3073, %v5384_v51   ;;  %v2302_v50 = vpop.permute.xlu2 %2301 }
 0x639   :  { %2311 = vrot.lane.b32.xlu1 %v5384_v51, %s3278_s26 }
 0x63d   :  { %2458 = vperm.xlu0 %3077, %v2401_v36   ;;  %v2220_v26 = vpop.permute.xlu0 %2219 }
 0x63e   :  { %v2258_v24 = vmul.f32 %v2220_v26, %v2178_v41 }
 0x640   :  { %2151 = vrot.lane.b32.xlu2 %v2104_v12, %s3280_s27  ;;  %v5453_v60 = vpop.permute.xlu2 %2633  ;;  %v2338_v58 = vmul.f32 %v2300_v15, %v2258_v24 }
 0x641   :  { %2653 = vperm.xlu1 %3074, %v5384_v51   ;;  %v5456_v62 = vpop.permute.xlu1 %2713  ;;  %3076 = vset.pattern.permute.xlu2 %v5881_v20 }
 0x642   :  { %v2402_v35 = vadd.f32 %v5379_v45, %v2338_v58 }
 0x645   :  { %v2304_v25 = vpop.permute.xlu0 %2303 }
 0x648   :  { %2229 = vrot.lane.b32.xlu2 %v3198_v52, %s3280_s27 }
 0x649   :  { %3078 = vset.pattern.permute.xlu1 %v5877_v29  ;;  %v2368_v32 = vpop.permute.xlu1 %2367  ;;  %v5461_v8 = vpop.permute.xlu2 %2717 }
 0x64a   :  { %2423 = vperm.xlu1 %3078, %v5111_v43  }
 0x64d   :  { %v5464_v59 = vpop.permute.xlu0 %2637 }
 0x650   :  { %2801 = vperm.xlu2 %3076, %v5260_v2  }
 0x651   :  { %v5467_v38 = vpop.permute.xlu1 %2557  ;;  %v2370_v16 = vpop.permute.xlu2 %2369 }
 0x652   :  { %2433 = vperm.xlu1 %3078, %v5192_v4   ;;  %v2397_v4 = vadd.f32 %v5118_v39, %v5286_v44 }
 0x656   :  { %v5471_v11 = vpop.permute.xlu0 %2721 }
 0x658   :  { %3079 = vset.pattern.permute.xlu2 %v5877_v29 }
 0x659   :  { %v5474_v27 = vpop.permute.xlu2 %2561  ;;  %2428 = vperm.xlu2 %3079, %v5139_v49   ;;  %v2400_v49 = vadd.f32 %v5243_v53, %v5429_v48 }
 0x65a   :  { %v5477_v43 = vpop.permute.xlu1 %2797  ;;  %2448 = vperm.xlu1 %3078, %v5348_v34   ;;  %v2179_v34 = vmul.f32 %v2142_v46, %v5141_v40 }
 0x65e   :  { %v5480_v36 = vpop.permute.xlu0 %2371 }
 0x661   :  { %v2146_v56 = vpop.permute.xlu2 %2145  ;;  %2438 = vperm.xlu2 %3079, %v2397_v4  }
 0x662   :  { %v2144_v7 = vpop.permute.xlu1 %2143  ;;  %2463 = vperm.xlu1 %3078, %v2402_v35   ;;  %v2181_v53 = vmul.f32 %v2146_v56, %v5260_v2 }
 0x663   :  { %v2180_v26 = vmul.f32 %v2144_v7, %v5228_v47 }
 0x666   :  { %v5485_v29 = vpop.permute.xlu0 %2565 }
 0x669   :  { %v2224_v15 = vpop.permute.xlu2 %2223  ;;  %2453 = vperm.xlu2 %3079, %v2400_v49  }
 0x66a   :  { %v2222_v3 = vpop.permute.xlu1 %2221  ;;  %v2260_v12 = vmul.f32 %v2224_v15, %v2180_v26  ;;  %v2409_v15 = vlaneseq }
 0x66b   :  { %v2259_v39 = vmul.f32 %v2222_v3, %v2179_v34 }
 0x66c   :  { %v2340_v44 = vmul.f32 %v2304_v25, %v2260_v12  ;;  %v5509_v12 = vand.u32 127, %v2409_v15 }
 0x66d   :  { %v2339_v45 = vmul.f32 %v2302_v50, %v2259_v39 }
 0x66e   :  { %v2404_v52 = vadd.f32 %v2368_v32, %v2340_v44  ;;  %v2148_v41 = vpop.permute.xlu0 %2147  ;;  %vm2415_vm7 = vcmp.eq.s32.totalorder %v5509_v12, 20  ;;  %vm2414_vm8 = vcmp.eq.s32.totalorder %v5509_v12, 19  ;;  %vm2413_vm9 = vcmp.eq.s32.totalorder %v5509_v12, 18 }
 0x66f   :  { %v2403_v24 = vadd.f32 %v5403_v6, %v2339_v45  ;;  %vm2412_vm10 = vcmp.eq.s32.totalorder %v5509_v12, 17  ;;  %vm2411_vm11 = vcmp.eq.s32.totalorder %v5509_v12, 16 }
 0x670   :  { %2473 = vperm.xlu0 %3077, %v2404_v52  }
 0x671   :  { %v2308_v58 = vpop.permute.xlu2 %2307  ;;  %2468 = vperm.xlu2 %3079, %v2403_v24  }
 0x672   :  { %v2306_v4 = vpop.permute.xlu1 %2305 }
 0x676   :  { %v2226_v47 = vpop.permute.xlu0 %2225 }
 0x677   :  { %v2261_v48 = vmul.f32 %v2226_v47, %v2181_v53 }
 0x679   :  { %v2341_v40 = vmul.f32 %v2306_v4, %v2261_v48  ;;  %v5493_v46 = vpop.permute.xlu2 %2645  ;;  %v2182_v4 = vmul.f32 %v2148_v41, %v5290_v28 }
 0x67a   :  { %v5495_v35 = vpop.permute.xlu1 %2641 }
 0x67b   :  { %v2405_v7 = vadd.f32 %v2370_v16, %v2341_v40 }
 0x67d   :  { %2478 = vperm.xlu1 %3078, %v2405_v7  }
 0x67e   :  { %v2310_v50 = vpop.permute.xlu0 %2309 }
 0x682   :  { %v5497_v25 = vpop.permute.xlu2 %2729 }
 0x683   :  { %v5499_v32 = vpop.permute.xlu1 %2725 }
 0x686   :  { %v5501_v6 = vpop.permute.xlu0 %2649 }
 0x68a   :  { %v2376_v49 = vpop.permute.xlu2 %2375 }
 0x68b   :  { %v2374_v26 = vpop.permute.xlu1 %2373 }
 0x68f   :  { %v5503_v34 = vpop.permute.xlu0 %2733 }
 0x692   :  { %v5505_v2 = vpop.permute.xlu2 %2573 }
 0x693   :  { %v5507_v56 = vpop.permute.xlu1 %2569 }
 0x697   :  { %v2232_v3 = vpop.permute.xlu0 %2231 }
 0x69a   :  { %v2152_v16 = vpop.permute.xlu2 %2151 }
 0x69b   :  { %v2150_v39 = vpop.permute.xlu1 %2149  ;;  %v2184_v41 = vmul.f32 %v2152_v16, %v5384_v51 }
 0x69c   :  { %v2183_v52 = vmul.f32 %v2150_v39, %v5368_v63 }
 0x69d   :  { %v2264_v16 = vmul.f32 %v2232_v3, %v2184_v41 }
 0x69f   :  { %v2419_v44 = vpop.permute.xlu0 %2418 }
 0x6a0   :  { %v2496_v45 = vsel %vm2415_vm7, %v2419_v44, 0.0 }
 0x6a1   :  { %v2576_v24 = vsel %vm2414_vm8, %v4964_v22, %v2496_v45 }
 0x6a2   :  { %v2656_v53 = vsel %vm2413_vm9, %v4992_v31, %v2576_v24  ;;  %v2230_v47 = vpop.permute.xlu2 %2229 }
 0x6a3   :  { %v2736_v48 = vsel %vm2412_vm10, %v4980_v37, %v2656_v53  ;;  %v2228_v40 = vpop.permute.xlu1 %2227  ;;  %v2263_v7 = vmul.f32 %v2230_v47, %v2183_v52 }
 0x6a4   :  { %v2816_v15 = vsel %vm2411_vm11, %v5014_v14, %v2736_v48  ;;  %v2262_v39 = vmul.f32 %v2228_v40, %v2182_v4  ;;  %v5898_v48 = vld [vmem:[#allocation28_spill] sm:$0xff]  ;;  %v5899_v40 = vld [vmem:[#allocation15_spill] sm:$0xff] }
 0x6a5   :  { %2832 = vst [vmem:[#allocation5] sm:$0xff] %v2816_v15  ;;  %v2343_v22 = vmul.f32 %v2310_v50, %v2263_v7  ;;  %v5901_v7 = vld [vmem:[#allocation30_spill] sm:$0xff] }
 0x6a6   :  { %2848 = vst.msk [vmem:[#allocation5] sm:$0xff] %vm46_vm0, %v3951_v30  ;;  %v2342_v31 = vmul.f32 %v2308_v58, %v2262_v39 }
 0x6a7   :  { %v2407_v44 = vadd.f32 %v2374_v26, %v2343_v22  ;;  %v2444_v45 = vpop.permute.xlu0 %2443  ;;  %v5903_v22 = vld [vmem:[#allocation9_spill] sm:$0xff] }
 0x6a8   :  { %v2406_v24 = vadd.f32 %v5480_v36, %v2342_v31  ;;  %v2501_v37 = vsel %vm2415_vm7, %v2444_v45, 0.0 }
 0x6a9   :  { %v2581_v14 = vsel %vm2414_vm8, %v5218_v17, %v2501_v37  ;;  %2488 = vperm.xlu0 %3077, %v2407_v44   ;;  %v5897_v17 = vld [vmem:[#allocation12_spill] sm:$0xff] }
 0x6aa   :  { %v2661_v50 = vsel %vm2413_vm9, %v5213_v55, %v2581_v14  ;;  %2483 = vperm.xlu2 %3079, %v2406_v24   ;;  %v5544_v30 = vpop.permute.xlu2 %2801  ;;  %v5904_v24 = vld [vmem:[#allocation33_spill] sm:$0xff]  ;;  %v5905_v14 = vld [vmem:[#allocation23_spill] sm:$0xff] }
 0x6ab   :  { %v2741_v36 = vsel %vm2412_vm10, %v5207_v0, %v2661_v50  ;;  %v2312_v58 = vpop.permute.xlu1 %2311 }
 0x6ac   :  { %v2821_v26 = vsel %vm2411_vm11, %v5236_v5, %v2741_v36  ;;  %v2344_v52 = vmul.f32 %v2312_v58, %v2264_v16  ;;  %v5907_v16 = vld [vmem:[#allocation25_spill] sm:$0xff]  ;;  %v5908_v58 = vld [vmem:[#allocation38_spill] sm:$0xff] }
 0x6ad   :  { %2837 = vst [vmem:[#allocation5 + $0x28] sm:$0xff] %v2821_v26 }
 0x6ae   :  { %2853 = vst.msk [vmem:[#allocation5 + $0x28] sm:$0xff] %vm46_vm0, %v5897_v17  ;;  %v2408_v4 = vadd.f32 %v2376_v49, %v2344_v52  ;;  %v5909_v52 = vld [vmem:[#allocation26_spill] sm:$0xff] }
 0x6af   :  { %v2459_v55 = vpop.permute.xlu0 %2458 }
 0x6b0   :  { %2493 = vperm.xlu1 %3078, %v2408_v4   ;;  %v2504_v3 = vsel %vm2415_vm7, %v2459_v55, 0.0  ;;  %v5910_v4 = vld [vmem:[#allocation37_spill] sm:$0xff] }
 0x6b1   :  { %v2584_v0 = vsel %vm2414_vm8, %v5376_v9, %v2504_v3  ;;  %3080 = vset.pattern.permute.xlu0 %v5881_v20  ;;  %v5911_v3 = vld [vmem:[#allocation24_spill] sm:$0xff] }
 0x6b2   :  { %v2664_v5 = vsel %vm2413_vm9, %v5371_v54, %v2584_v0  ;;  %3082 = vset.pattern.permute.xlu2 %v5881_v20  ;;  %2805 = vperm.xlu0 %3080, %v5290_v28  }
 0x6b3   :  { %v2744_v49 = vsel %vm2412_vm10, %v5364_v23, %v2664_v5  ;;  %v5568_v53 = vpop.permute.xlu1 %2653  ;;  %2813 = vperm.xlu2 %3082, %v5384_v51   ;;  %v2429_v47 = vpop.permute.xlu2 %2428  ;;  %v5900_v23 = vld [vmem:[#allocation27_spill] sm:$0xff]  ;;  %v5912_v5 = vld [vmem:[#allocation8_spill] sm:$0xff] }
 0x6b4   :  { %v2824_v9 = vsel %vm2411_vm11, %v5395_v1, %v2744_v49  ;;  %v2498_v54 = vsel %vm2415_vm7, %v2429_v47, 0.0  ;;  %v5902_v1 = vld [vmem:[#allocation32_spill] sm:$0xff]  ;;  %v5913_v47 = vld [vmem:[#allocation11_spill] sm:$0xff] }
 0x6b5   :  { %2840 = vst [vmem:[#allocation5 + $0x40] sm:$0xff] %v2824_v9  ;;  %v2578_v28 = vsel %vm2414_vm8, %v5898_v48, %v2498_v54 }
 0x6b6   :  { %2856 = vst.msk [vmem:[#allocation5 + $0x40] sm:$0xff] %vm46_vm0, %v5899_v40  ;;  %v2658_v51 = vsel %vm2413_vm9, %v5900_v23, %v2578_v28  ;;  %v5914_v28 = vld [vmem:[#allocation42_spill] sm:$0xff]  ;;  %v5915_v23 = vld [vmem:[#allocation29_spill] sm:$0xff] }
 0x6b7   :  { %v2738_v15 = vsel %vm2412_vm10, %v5901_v7, %v2658_v51 }
 0x6b8   :  { %v2818_v39 = vsel %vm2411_vm11, %v5902_v1, %v2738_v15  ;;  %3081 = vset.pattern.permute.xlu1 %v5881_v20  ;;  %v5916_v15 = vld [vmem:[#allocation34_spill] sm:$0xff] }
 0x6b9   :  { %2834 = vst [vmem:[#allocation5 + $0x10] sm:$0xff] %v2818_v39  ;;  %2809 = vperm.xlu1 %3081, %v5368_v63   ;;  %v5906_v63 = vld [vmem:[#allocation35_spill] sm:$0xff] }
 0x6ba   :  { %2850 = vst.msk [vmem:[#allocation5 + $0x10] sm:$0xff] %vm46_vm0, %v5903_v22  ;;  %v5917_v22 = vld [vmem:[#allocation31_spill] sm:$0xff] }
 0x6bb   :  { %v2439_v41 = vpop.permute.xlu2 %2438 }
 0x6bc   :  { %v2424_v31 = vpop.permute.xlu1 %2423  ;;  %v2500_v44 = vsel %vm2415_vm7, %v2439_v41, 0.0 }
 0x6bd   :  { %v2497_v45 = vsel %vm2415_vm7, %v2424_v31, 0.0  ;;  %v2580_v37 = vsel %vm2414_vm8, %v5904_v24, %v2500_v44  ;;  %v5918_v44 = vld [vmem:[#allocation36_spill] sm:$0xff] }
 0x6be   :  { %v2577_v20 = vsel %vm2414_vm8, %v5905_v14, %v2497_v45  ;;  %v2660_v50 = vsel %vm2413_vm9, %v5906_v63, %v2580_v37  ;;  %v5919_v45 = vld [vmem:[#allocation10_spill] sm:$0xff]  ;;  %v5921_v63 = vld [vmem:[#allocation40_spill] sm:$0xff] }
 0x6bf   :  { %v2657_v36 = vsel %vm2413_vm9, %v5907_v16, %v2577_v20  ;;  %v2740_v26 = vsel %vm2412_vm10, %v5908_v58, %v2660_v50  ;;  %v5920_v37 = vld [vmem:[#allocation14_spill] sm:$0xff] }
 0x6c0   :  { %v2737_v17 = vsel %vm2412_vm10, %v5909_v52, %v2657_v36  ;;  %v2820_v55 = vsel %vm2411_vm11, %v5910_v4, %v2740_v26  ;;  %v5922_v26 = vld [vmem:[#allocation39_spill] sm:$0xff]  ;;  %v5924_v4 = vld [vmem:[#allocation13_spill] sm:$0xff] }
 0x6c1   :  { %v2817_v0 = vsel %vm2411_vm11, %v5911_v3, %v2737_v17  ;;  %2836 = vst [vmem:[#allocation5 + $0x20] sm:$0xff] %v2820_v55  ;;  %v5923_v17 = vld [vmem:[#allocation41_spill] sm:$0xff] }
 0x6c2   :  { %2833 = vst [vmem:[#allocation5 + $0x8] sm:$0xff] %v2817_v0 }
 0x6c3   :  { %2849 = vst.msk [vmem:[#allocation5 + $0x8] sm:$0xff] %vm46_vm0, %v5912_v5  ;;  %v2454_v49 = vpop.permute.xlu2 %2453  ;;  %v5926_v5 = vld [vmem:[#allocation43_spill] sm:$0xff] }
 0x6c4   :  { %2852 = vst.msk [vmem:[#allocation5 + $0x20] sm:$0xff] %vm46_vm0, %v5913_v47  ;;  %v2434_v9 = vpop.permute.xlu1 %2433  ;;  %v2503_v54 = vsel %vm2415_vm7, %v2454_v49, 0.0  ;;  %v5927_v47 = vld [vmem:[#allocation16_spill] sm:$0xff] }
 0x6c5   :  { %v2499_v48 = vsel %vm2415_vm7, %v2434_v9, 0.0  ;;  %v2583_v40 = vsel %vm2414_vm8, %v5914_v28, %v2503_v54  ;;  %v5928_v28 = vld [vmem:[#allocation18_spill] sm:$0xff] }
 0x6c6   :  { %v2579_v51 = vsel %vm2414_vm8, %v5915_v23, %v2499_v48  ;;  %v2663_v7 = vsel %vm2413_vm9, %v5341_v10, %v2583_v40 }
 0x6c7   :  { %v2659_v1 = vsel %vm2413_vm9, %v5916_v15, %v2579_v51  ;;  %v2743_v39 = vsel %vm2412_vm10, %v5343_v13, %v2663_v7  ;;  %v5929_v51 = vld [vmem:[#allocation19_spill] sm:$0xff] }
 0x6c8   :  { %v2739_v41 = vsel %vm2412_vm10, %v5917_v22, %v2659_v1  ;;  %v2823_v31 = vsel %vm2411_vm11, %v5292_v21, %v2743_v39 }
 0x6c9   :  { %v2819_v10 = vsel %vm2411_vm11, %v5918_v44, %v2739_v41  ;;  %2839 = vst [vmem:[#allocation5 + $0x38] sm:$0xff] %v2823_v31 }
 0x6ca   :  { %2835 = vst [vmem:[#allocation5 + $0x18] sm:$0xff] %v2819_v10 }
 0x6cb   :  { %2851 = vst.msk [vmem:[#allocation5 + $0x18] sm:$0xff] %vm46_vm0, %v5919_v45  ;;  %v2469_v24 = vpop.permute.xlu2 %2468  ;;  %v5930_v45 = vld [vmem:[#allocation20_spill] sm:$0xff] }
 0x6cc   :  { %2855 = vst.msk [vmem:[#allocation5 + $0x38] sm:$0xff] %vm46_vm0, %v5920_v37  ;;  %v2449_v13 = vpop.permute.xlu1 %2448  ;;  %v2506_v14 = vsel %vm2415_vm7, %v2469_v24, 0.0 }
 0x6cd   :  { %v2502_v21 = vsel %vm2415_vm7, %v2449_v13, 0.0  ;;  %v2586_v20 = vsel %vm2414_vm8, %v5414_v42, %v2506_v14 }
 0x6ce   :  { %v2582_v50 = vsel %vm2414_vm8, %v5921_v63, %v2502_v21  ;;  %v2666_v16 = vsel %vm2413_vm9, %v5453_v60, %v2586_v20 }
 0x6cf   :  { %v2662_v36 = vsel %vm2413_vm9, %v5322_v18, %v2582_v50  ;;  %v2746_v58 = vsel %vm2412_vm10, %v5456_v62, %v2666_v16  ;;  %v5925_v18 = vld [vmem:[#allocation17_spill] sm:$0xff] }
 0x6d0   :  { %v2742_v42 = vsel %vm2412_vm10, %v5922_v26, %v2662_v36  ;;  %v2826_v52 = vsel %vm2411_vm11, %v5431_v57, %v2746_v58 }
 0x6d1   :  { %v2822_v60 = vsel %vm2411_vm11, %v5923_v17, %v2742_v42  ;;  %2842 = vst [vmem:[#allocation5 + $0x50] sm:$0xff] %v2826_v52 }
 0x6d2   :  { %2838 = vst [vmem:[#allocation5 + $0x30] sm:$0xff] %v2822_v60 }
 0x6d3   :  { %2854 = vst.msk [vmem:[#allocation5 + $0x30] sm:$0xff] %vm46_vm0, %v5924_v4 }
 0x6d4   :  { %2858 = vst.msk [vmem:[#allocation5 + $0x50] sm:$0xff] %vm46_vm0, %v5925_v18  ;;  %v2464_v62 = vpop.permute.xlu1 %2463 }
 0x6d5   :  { %v2505_v55 = vsel %vm2415_vm7, %v2464_v62, 0.0 }
 0x6d6   :  { %v2585_v57 = vsel %vm2414_vm8, %v5393_v33, %v2505_v55 }
 0x6d7   :  { %v2665_v3 = vsel %vm2413_vm9, %v5443_v19, %v2585_v57 }
 0x6d8   :  { %v2745_v0 = vsel %vm2412_vm10, %v5387_v61, %v2665_v3 }
 0x6d9   :  { %v2825_v49 = vsel %vm2411_vm11, %v5926_v5, %v2745_v0 }
 0x6da   :  { %2841 = vst [vmem:[#allocation5 + $0x48] sm:$0xff] %v2825_v49 }
 0x6db   :  { %2857 = vst.msk [vmem:[#allocation5 + $0x48] sm:$0xff] %vm46_vm0, %v5927_v47 }
 0x6e2   :  { %v2474_v9 = vpop.permute.xlu0 %2473 }
 0x6e3   :  { %v2507_v33 = vsel %vm2415_vm7, %v2474_v9, 0.0 }
 0x6e4   :  { %v2587_v19 = vsel %vm2414_vm8, %v5467_v38, %v2507_v33 }
 0x6e5   :  { %v2667_v61 = vsel %vm2413_vm9, %v5464_v59, %v2587_v19 }
 0x6e6   :  { %v2747_v54 = vsel %vm2412_vm10, %v5461_v8, %v2667_v61 }
 0x6e7   :  { %v2827_v48 = vsel %vm2411_vm11, %v5477_v43, %v2747_v54 }
 0x6e8   :  { %2843 = vst [vmem:[#allocation5 + $0x58] sm:$0xff] %v2827_v48 }
 0x6e9   :  { %2859 = vst.msk [vmem:[#allocation5 + $0x58] sm:$0xff] %vm46_vm0, %v5928_v28 }
 0x6ef   :  { %v2479_v40 = vpop.permute.xlu1 %2478 }
 0x6f0   :  { %v2508_v38 = vsel %vm2415_vm7, %v2479_v40, 0.0 }
 0x6f1   :  { %v2588_v59 = vsel %vm2414_vm8, %v5474_v27, %v2508_v38 }
 0x6f2   :  { %v2668_v8 = vsel %vm2413_vm9, %v5495_v35, %v2588_v59 }
 0x6f3   :  { %v2748_v43 = vsel %vm2412_vm10, %v5471_v11, %v2668_v8 }
 0x6f4   :  { %v2828_v23 = vsel %vm2411_vm11, %v5544_v30, %v2748_v43 }
 0x6f5   :  { %2844 = vst [vmem:[#allocation5 + $0x60] sm:$0xff] %v2828_v23 }
 0x6f6   :  { %2860 = vst.msk [vmem:[#allocation5 + $0x60] sm:$0xff] %vm46_vm0, %v5929_v51 }
 0x704   :  { %v2484_v7 = vpop.permute.xlu2 %2483 }
 0x705   :  { %v2509_v27 = vsel %vm2415_vm7, %v2484_v7, 0.0 }
 0x706   :  { %v2589_v35 = vsel %vm2414_vm8, %v5485_v29, %v2509_v27 }
 0x707   :  { %v2669_v11 = vsel %vm2413_vm9, %v5493_v46, %v2589_v35 }
 0x708   :  { %v2749_v41 = vsel %vm2412_vm10, %v5499_v32, %v2669_v11 }
 0x70d   :  { %v2814_v10 = vpop.permute.xlu2 %2813 }
 0x71b   :  { %v2489_v15 = vpop.permute.xlu0 %2488 }
 0x71c   :  { %v2510_v30 = vsel %vm2415_vm7, %v2489_v15, 0.0 }
 0x71d   :  { %v2590_v46 = vsel %vm2414_vm8, %v5507_v56, %v2510_v30 }
 0x71e   :  { %v2670_v56 = vsel %vm2413_vm9, %v5501_v6, %v2590_v46  ;;  %v5932_v6 = vld [vmem:[#allocation21_spill] sm:$0xff] }
 0x71f   :  { %v2750_v24 = vsel %vm2412_vm10, %v5497_v25, %v2670_v56 }
 0x722   :  { %v2494_v1 = vpop.permute.xlu1 %2493 }
 0x723   :  { %v2511_v39 = vsel %vm2415_vm7, %v2494_v1, 0.0 }
 0x724   :  { %v2591_v22 = vsel %vm2414_vm8, %v5505_v2, %v2511_v39  ;;  %v2806_v29 = vpop.permute.xlu0 %2805 }
 0x725   :  { %v2671_v31 = vsel %vm2413_vm9, %v5568_v53, %v2591_v22  ;;  %v2829_v44 = vsel %vm2411_vm11, %v2806_v29, %v2749_v41  ;;  %v5931_v53 = vld [vmem:[#allocation22_spill] sm:$0xff] }
 0x726   :  { %v2751_v2 = vsel %vm2412_vm10, %v5503_v34, %v2671_v31  ;;  %2845 = vst [vmem:[#allocation5 + $0x68] sm:$0xff] %v2829_v44 }
 0x727   :  { %v2831_v32 = vsel %vm2411_vm11, %v2814_v10, %v2751_v2  ;;  %2861 = vst.msk [vmem:[#allocation5 + $0x68] sm:$0xff] %vm46_vm0, %v5930_v45 }
 0x728   :  { %2847 = vst [vmem:[#allocation5 + $0x78] sm:$0xff] %v2831_v32 }
 0x729   :  { %2863 = vst.msk [vmem:[#allocation5 + $0x78] sm:$0xff] %vm46_vm0, %v5931_v53 }
 0x72b   :  { %v2810_v34 = vpop.permute.xlu1 %2809 }
 0x72c   :  { %v2830_v37 = vsel %vm2411_vm11, %v2810_v34, %v2750_v24 }
 0x72d   :  { %2846 = vst [vmem:[#allocation5 + $0x70] sm:$0xff] %v2830_v37 }
 0x72e   :  { %2862 = vst.msk [vmem:[#allocation5 + $0x70] sm:$0xff] %vm46_vm0, %v5932_v6 }
 0x72f   :  { %2876 = dma.vmem_to_hbm [thread:$0]  %s2869_s29, 2048, %s2871_s4, [#allocation4], %s3270_s14, %s3270_s14, %s3271_s15  }
 0x730   :  { %3267 = dma.done.wait [#allocation4], 2048  }
 0x731   :  { %3268 = vsyncadd [#allocation4], 4294965248 }
 0x732   :  { %2881 = vsyncpa [#allocation3], 1 }
 0x733   :  { %2882 = vsyncpa [#allocation4], 1 }

</bundles_post_ra>
